<compile_context>
chip_gen: v7x
topology: tpu7x:2x2x1
jax: 0.10.0
libtpu: 0.0.40
codegen_flags: <defaults>
</compile_context>

<pallas_src>
import functools

import numpy as np
import jax
import jax.numpy as jnp
from jax.experimental import pallas as pl
from jax.experimental.pallas import tpu as pltpu


_LANES = 128   # lane-dense buffer width (W = 64 data columns + zero halo)
_XR0 = 1       # first data row of the wrapper-padded input (1-row halo for the 3x3 conv)
_R0 = 8        # first data row of the conv1-output scratch (sublane-aligned stores)


# ------------------------------ fused kernel --------------------------------

def fused_cnn_kernel(x_ref, wc1_ref, bc1_ref, wc2_ref, bc2_ref,
                     wf1_ref, bf1_ref, wf2t_ref, bf2_ref,
                     o_ref, h1buf_ref, *, C, H, W, NC):
    """Processes one batch element (the grid is over the batch)."""
    lane = jax.lax.broadcasted_iota(jnp.int32, (H, _LANES), 1)

    # ---- conv1 (3x3, pad=1, C -> 1 channel) + relu --------------------------
    # Group taps by lane shift dw; roll each finished per-dw partial once.
    # Wrapper-side padding guarantees x rows 0 / H+1 and lanes >= W are zero,
    # so the cyclic roll wrap lands on zeros (exact zero-padding semantics).
    acc1 = None
    for dw in (-1, 0, 1):
        part = None
        for c in range(C):
            for dh in (-1, 0, 1):
                row = x_ref[0, c, _XR0 + dh:_XR0 + dh + H, :]          # (H, 128)
                t = wc1_ref[c * 9 + (dh + 1) * 3 + (dw + 1)] * row
                part = t if part is None else part + t
        part = part if dw == 0 else jnp.roll(part, -dw, axis=1)
        acc1 = part if acc1 is None else acc1 + part
    acc1 = acc1 + bc1_ref[0]
    # Lanes >= W are junk; force them to zero so conv2's roll-wrap sees a halo.
    h1 = jnp.where(lane < W, jnp.maximum(acc1, 0.0), 0.0)              # (H, 128)

    # Stage conv1 output: zero ONLY the 4 halo rows, then one aligned,
    # full-width (unmasked) store of the data rows.
    h1buf_ref[_R0 - 2:_R0, :] = jnp.zeros((2, _LANES), jnp.float32)
    h1buf_ref[_R0 + H:_R0 + H + 2, :] = jnp.zeros((2, _LANES), jnp.float32)
    h1buf_ref[_R0:_R0 + H, :] = h1

    # ---- conv2 (5x5, pad=2, 1 -> 1 channel) + relu ---------------------------
    acc2 = None
    for dw in (-2, -1, 0, 1, 2):
        part = None
        for dh in (-2, -1, 0, 1, 2):
            row = h1buf_ref[_R0 + dh:_R0 + dh + H, :]                  # (H, 128)
            t = wc2_ref[(dh + 2) * 5 + (dw + 2)] * row
            part = t if part is None else part + t
        part = part if dw == 0 else jnp.roll(part, -dw, axis=1)
        acc2 = part if acc2 is None else acc2 + part
    acc2 = acc2 + bc2_ref[0]
    h2 = jnp.maximum(acc2, 0.0)    # (H, 128); lanes >= W are junk, killed by wf1

    # ---- fc1 + relu (flatten is implicit: wf1 is (NC, H, 128), zero cols >= W)
    # Sublane-first reduction: per class, sum over H with plain vreg adds to a
    # (1, 128) partial; the cross-lane reduce only ever sees one (NC, 128) slab.
    partial = jnp.concatenate(
        [jnp.sum(h2 * wf1_ref[n], axis=0, keepdims=True) for n in range(NC)],
        axis=0)                                                        # (NC, 128)
    s = jnp.sum(partial, axis=1, keepdims=True) + bf1_ref[...]         # (NC, 1)
    h3 = jnp.maximum(s, 0.0)                                           # (NC, 1)

    # ---- fc2 (10x10 GEMV, exact f32 on the VPU; lane-dense row output) -------
    logits = jnp.sum(h3 * wf2t_ref[...], axis=0, keepdims=True) + bf2_ref[...]
    o_ref[...] = logits[None]                                          # (1, 1, NC)


# ------------------------------ JAX wrapper ---------------------------------

_SMEM = pl.BlockSpec(memory_space=pltpu.MemorySpace.SMEM)


def simple_cnn_forward(x, params):
    """x: (B, C, 64, 64) float32 NCHW.  Returns (B, num_classes) logits."""
    (w_c1, b_c1, w_c2, b_c2, w_f1, b_f1, w_f2, b_f2) = params
    B, C, H, W = x.shape
    NC = w_f1.shape[0]

    # Lane-dense, zero-haloed input: (B, C, H + 2, 128).  Rows 0 / H+1 and lanes
    # >= W are the conv1 zero padding, so the kernel never zero-fills nor copies
    # the input inside VMEM.
    xp = jnp.pad(x, ((0, 0), (0, 0), (_XR0, _XR0), (0, _LANES - W)))

    # Conv weights/biases as flat SMEM scalar tables.
    wc1_flat = w_c1.reshape(-1)                       # (C*9,)
    wc2_flat = w_c2.reshape(-1)                       # (25,)

    # fc1 weight in the conv's lane-dense layout: (NC, H, 128), zero cols >= W.
    # Flatten order of a (B, 1, H, W) activation is h*W + w == [n, h, w] here.
    wf1_p = jnp.pad(w_f1.reshape(NC, H, W), ((0, 0), (0, 0), (0, _LANES - W)))
    bf1_c = b_f1.reshape(NC, 1)
    wf2_t = w_f2.T                                    # (in=NC, out=NC)
    bf2_r = b_f2.reshape(1, NC)

    kernel = functools.partial(fused_cnn_kernel, C=C, H=H, W=W, NC=NC)

    out = pl.pallas_call(
        kernel,
        out_shape=jax.ShapeDtypeStruct((B, 1, NC), jnp.float32),
        grid=(B,),
        in_specs=[
            pl.BlockSpec((1, C, H + 2 * _XR0, _LANES), lambda b: (b, 0, 0, 0)),
            _SMEM, _SMEM, _SMEM, _SMEM,                            # conv w/b tables
            pl.BlockSpec((NC, H, _LANES), lambda b: (0, 0, 0)),    # fc1 weight (resident)
            pl.BlockSpec((NC, 1), lambda b: (0, 0)),               # fc1 bias
            pl.BlockSpec((NC, NC), lambda b: (0, 0)),              # fc2 weight (transposed)
            pl.BlockSpec((1, NC), lambda b: (0, 0)),               # fc2 bias (row)
        ],
        out_specs=pl.BlockSpec((1, 1, NC), lambda b: (b, 0, 0)),
        scratch_shapes=[
            pltpu.VMEM((_R0 + H + _R0, _LANES), jnp.float32),      # conv1 output + halo
        ],
        compiler_params=pltpu.CompilerParams(
            dimension_semantics=("parallel",)),                    # megacore on v7x
    )(xp, wc1_flat, b_c1, wc2_flat, b_c2, wf1_p, bf1_c, wf2_t, bf2_r)

    return out[:, 0, :]


# ------------------------ deterministic parameter init ----------------------

def init_params(key, input_channels, num_classes):
    ks = jax.random.split(key, 8)

    def uni(k, shape, fan_in):
        bound = 1.0 / np.sqrt(fan_in)
        return jax.random.uniform(k, shape, jnp.float32, -bound, bound)

    w_c1 = uni(ks[0], (1, input_channels, 3, 3), input_channels * 9)
    b_c1 = uni(ks[1], (1,), input_channels * 9)
    w_c2 = uni(ks[2], (1, 1, 5, 5), 25)
    b_c2 = uni(ks[3], (1,), 25)
    w_f1 = uni(ks[4], (num_classes, 4096), 4096)
    b_f1 = uni(ks[5], (num_classes,), 4096)
    w_f2 = uni(ks[6], (num_classes, num_classes), num_classes)
    b_f2 = uni(ks[7], (num_classes,), num_classes)
    return (w_c1, b_c1, w_c2, b_c2, w_f1, b_f1, w_f2, b_f2)


# ------------------------------ numpy reference -----------------------------

def reference_forward(x, params):
    (w_c1, b_c1, w_c2, b_c2, w_f1, b_f1, w_f2, b_f2) = [np.asarray(p, np.float64) for p in params]
    x = np.asarray(x, np.float64)
    B, C, H, W = x.shape

    xp = np.pad(x, ((0, 0), (0, 0), (1, 1), (1, 1)))
    h1 = np.full((B, H, W), b_c1[0])
    for c in range(C):
        for kh in range(3):
            for kw in range(3):
                h1 += w_c1[0, c, kh, kw] * xp[:, c, kh:kh + H, kw:kw + W]
    h1 = np.maximum(h1, 0.0)

    xp2 = np.pad(h1, ((0, 0), (2, 2), (2, 2)))
    h2 = np.full((B, H, W), b_c2[0])
    for kh in range(5):
        for kw in range(5):
            h2 += w_c2[0, 0, kh, kw] * xp2[:, kh:kh + H, kw:kw + W]
    h2 = np.maximum(h2, 0.0)

    flat = h2.reshape(B, H * W)
    f1 = np.maximum(flat @ w_f1.T + b_f1, 0.0)
    return f1 @ w_f2.T + b_f2


# ---------------------------------- main ------------------------------------

if __name__ == "__main__":
    input_channels = 4
    num_classes = 10
    B, H, W = 2, 64, 64   # fc1 expects 4096 = 1 * 64 * 64 flattened features

    key = jax.random.PRNGKey(0)
    k_x, k_p = jax.random.split(key)
    x = jax.random.normal(k_x, (B, input_channels, H, W), jnp.float32)
    params = init_params(k_p, input_channels, num_classes)

    fwd = jax.jit(simple_cnn_forward)
    out = jax.block_until_ready(fwd(x, params))

    ref = reference_forward(x, params)
    np.testing.assert_allclose(np.asarray(out, np.float64), ref, rtol=1e-3, atol=1e-3)

    print("KERNEL_OK")
</pallas_src>

<mosaic_0001>
module attributes {stable_mosaic.version = 11 : i64} {
  func.func @fused_cnn_kernel(%arg0: i32, %arg1: memref<1x4x66x128xf32, #tpu.memory_space<vmem>>, %arg2: memref<36xf32, #tpu.memory_space<smem>>, %arg3: memref<1xf32, #tpu.memory_space<smem>>, %arg4: memref<25xf32, #tpu.memory_space<smem>>, %arg5: memref<1xf32, #tpu.memory_space<smem>>, %arg6: memref<10x64x128xf32, #tpu.memory_space<vmem>>, %arg7: memref<10x1xf32, #tpu.memory_space<vmem>>, %arg8: memref<10x10xf32, #tpu.memory_space<vmem>>, %arg9: memref<1x10xf32, #tpu.memory_space<vmem>>, %arg10: memref<1x1x10xf32, #tpu.memory_space<vmem>>, %arg11: memref<80x128xf32, #tpu.memory_space<vmem>>) attributes {dimension_semantics = [#tpu.dimension_semantics<parallel>], iteration_bounds = array<i64: 2>, scalar_prefetch = 0 : i64, scratch_operands = 1 : i64, tpu.core_type = #tpu.core_type<tc>, window_params = [{transform_indices = @transform_0, window_bounds = array<i64: 1, 4, 66, 128>}, {transform_indices = @transform_1, window_bounds = array<i64: 36>}, {transform_indices = @transform_2, window_bounds = array<i64: 1>}, {transform_indices = @transform_3, window_bounds = array<i64: 25>}, {transform_indices = @transform_4, window_bounds = array<i64: 1>}, {pipeline_mode = #tpu.pipeline_mode<synchronous>, transform_indices = @transform_5, window_bounds = array<i64: 10, 64, 128>}, {pipeline_mode = #tpu.pipeline_mode<synchronous>, transform_indices = @transform_6, window_bounds = array<i64: 10, 1>}, {pipeline_mode = #tpu.pipeline_mode<synchronous>, transform_indices = @transform_7, window_bounds = array<i64: 10, 10>}, {pipeline_mode = #tpu.pipeline_mode<synchronous>, transform_indices = @transform_8, window_bounds = array<i64: 1, 10>}, {transform_indices = @transform_9, window_bounds = array<i64: 1, 1, 10>}]} {
    %0 = tpu.iota {dimensions = array<i32: 1>} : vector<64x128xi32>
    %c0 = arith.constant 0 : index
    %c0_0 = arith.constant 0 : index
    %c0_1 = arith.constant 0 : index
    %c0_2 = arith.constant 0 : index
    %1 = vector.load %arg1[%c0, %c0_0, %c0_1, %c0_2] : memref<1x4x66x128xf32, #tpu.memory_space<vmem>>, vector<1x1x64x128xf32>
    %2 = vector.shape_cast %1 : vector<1x1x64x128xf32> to vector<64x128xf32>
    %c0_3 = arith.constant 0 : index
    %3 = memref.load %arg2[%c0_3] : memref<36xf32, #tpu.memory_space<smem>>
    %4 = vector.broadcast %3 : f32 to vector<64x128xf32>
    %5 = arith.mulf %4, %2 : vector<64x128xf32>
    %c0_4 = arith.constant 0 : index
    %c0_5 = arith.constant 0 : index
    %c1 = arith.constant 1 : index
    %c0_6 = arith.constant 0 : index
    %6 = vector.load %arg1[%c0_4, %c0_5, %c1, %c0_6] : memref<1x4x66x128xf32, #tpu.memory_space<vmem>>, vector<1x1x64x128xf32>
    %7 = vector.shape_cast %6 : vector<1x1x64x128xf32> to vector<64x128xf32>
    %c3 = arith.constant 3 : index
    %8 = memref.load %arg2[%c3] : memref<36xf32, #tpu.memory_space<smem>>
    %9 = vector.broadcast %8 : f32 to vector<64x128xf32>
    %10 = arith.mulf %9, %7 : vector<64x128xf32>
    %11 = arith.addf %5, %10 : vector<64x128xf32>
    %c0_7 = arith.constant 0 : index
    %c0_8 = arith.constant 0 : index
    %c2 = arith.constant 2 : index
    %c0_9 = arith.constant 0 : index
    %12 = vector.load %arg1[%c0_7, %c0_8, %c2, %c0_9] : memref<1x4x66x128xf32, #tpu.memory_space<vmem>>, vector<1x1x64x128xf32>
    %13 = vector.shape_cast %12 : vector<1x1x64x128xf32> to vector<64x128xf32>
    %c6 = arith.constant 6 : index
    %14 = memref.load %arg2[%c6] : memref<36xf32, #tpu.memory_space<smem>>
    %15 = vector.broadcast %14 : f32 to vector<64x128xf32>
    %16 = arith.mulf %15, %13 : vector<64x128xf32>
    %17 = arith.addf %11, %16 : vector<64x128xf32>
    %c0_10 = arith.constant 0 : index
    %c1_11 = arith.constant 1 : index
    %c0_12 = arith.constant 0 : index
    %c0_13 = arith.constant 0 : index
    %18 = vector.load %arg1[%c0_10, %c1_11, %c0_12, %c0_13] : memref<1x4x66x128xf32, #tpu.memory_space<vmem>>, vector<1x1x64x128xf32>
    %19 = vector.shape_cast %18 : vector<1x1x64x128xf32> to vector<64x128xf32>
    %c9 = arith.constant 9 : index
    %20 = memref.load %arg2[%c9] : memref<36xf32, #tpu.memory_space<smem>>
    %21 = vector.broadcast %20 : f32 to vector<64x128xf32>
    %22 = arith.mulf %21, %19 : vector<64x128xf32>
    %23 = arith.addf %17, %22 : vector<64x128xf32>
    %c0_14 = arith.constant 0 : index
    %c1_15 = arith.constant 1 : index
    %c1_16 = arith.constant 1 : index
    %c0_17 = arith.constant 0 : index
    %24 = vector.load %arg1[%c0_14, %c1_15, %c1_16, %c0_17] : memref<1x4x66x128xf32, #tpu.memory_space<vmem>>, vector<1x1x64x128xf32>
    %25 = vector.shape_cast %24 : vector<1x1x64x128xf32> to vector<64x128xf32>
    %c12 = arith.constant 12 : index
    %26 = memref.load %arg2[%c12] : memref<36xf32, #tpu.memory_space<smem>>
    %27 = vector.broadcast %26 : f32 to vector<64x128xf32>
    %28 = arith.mulf %27, %25 : vector<64x128xf32>
    %29 = arith.addf %23, %28 : vector<64x128xf32>
    %c0_18 = arith.constant 0 : index
    %c1_19 = arith.constant 1 : index
    %c2_20 = arith.constant 2 : index
    %c0_21 = arith.constant 0 : index
    %30 = vector.load %arg1[%c0_18, %c1_19, %c2_20, %c0_21] : memref<1x4x66x128xf32, #tpu.memory_space<vmem>>, vector<1x1x64x128xf32>
    %31 = vector.shape_cast %30 : vector<1x1x64x128xf32> to vector<64x128xf32>
    %c15 = arith.constant 15 : index
    %32 = memref.load %arg2[%c15] : memref<36xf32, #tpu.memory_space<smem>>
    %33 = vector.broadcast %32 : f32 to vector<64x128xf32>
    %34 = arith.mulf %33, %31 : vector<64x128xf32>
    %35 = arith.addf %29, %34 : vector<64x128xf32>
    %c0_22 = arith.constant 0 : index
    %c2_23 = arith.constant 2 : index
    %c0_24 = arith.constant 0 : index
    %c0_25 = arith.constant 0 : index
    %36 = vector.load %arg1[%c0_22, %c2_23, %c0_24, %c0_25] : memref<1x4x66x128xf32, #tpu.memory_space<vmem>>, vector<1x1x64x128xf32>
    %37 = vector.shape_cast %36 : vector<1x1x64x128xf32> to vector<64x128xf32>
    %c18 = arith.constant 18 : index
    %38 = memref.load %arg2[%c18] : memref<36xf32, #tpu.memory_space<smem>>
    %39 = vector.broadcast %38 : f32 to vector<64x128xf32>
    %40 = arith.mulf %39, %37 : vector<64x128xf32>
    %41 = arith.addf %35, %40 : vector<64x128xf32>
    %c0_26 = arith.constant 0 : index
    %c2_27 = arith.constant 2 : index
    %c1_28 = arith.constant 1 : index
    %c0_29 = arith.constant 0 : index
    %42 = vector.load %arg1[%c0_26, %c2_27, %c1_28, %c0_29] : memref<1x4x66x128xf32, #tpu.memory_space<vmem>>, vector<1x1x64x128xf32>
    %43 = vector.shape_cast %42 : vector<1x1x64x128xf32> to vector<64x128xf32>
    %c21 = arith.constant 21 : index
    %44 = memref.load %arg2[%c21] : memref<36xf32, #tpu.memory_space<smem>>
    %45 = vector.broadcast %44 : f32 to vector<64x128xf32>
    %46 = arith.mulf %45, %43 : vector<64x128xf32>
    %47 = arith.addf %41, %46 : vector<64x128xf32>
    %c0_30 = arith.constant 0 : index
    %c2_31 = arith.constant 2 : index
    %c2_32 = arith.constant 2 : index
    %c0_33 = arith.constant 0 : index
    %48 = vector.load %arg1[%c0_30, %c2_31, %c2_32, %c0_33] : memref<1x4x66x128xf32, #tpu.memory_space<vmem>>, vector<1x1x64x128xf32>
    %49 = vector.shape_cast %48 : vector<1x1x64x128xf32> to vector<64x128xf32>
    %c24 = arith.constant 24 : index
    %50 = memref.load %arg2[%c24] : memref<36xf32, #tpu.memory_space<smem>>
    %51 = vector.broadcast %50 : f32 to vector<64x128xf32>
    %52 = arith.mulf %51, %49 : vector<64x128xf32>
    %53 = arith.addf %47, %52 : vector<64x128xf32>
    %c0_34 = arith.constant 0 : index
    %c3_35 = arith.constant 3 : index
    %c0_36 = arith.constant 0 : index
    %c0_37 = arith.constant 0 : index
    %54 = vector.load %arg1[%c0_34, %c3_35, %c0_36, %c0_37] : memref<1x4x66x128xf32, #tpu.memory_space<vmem>>, vector<1x1x64x128xf32>
    %55 = vector.shape_cast %54 : vector<1x1x64x128xf32> to vector<64x128xf32>
    %c27 = arith.constant 27 : index
    %56 = memref.load %arg2[%c27] : memref<36xf32, #tpu.memory_space<smem>>
    %57 = vector.broadcast %56 : f32 to vector<64x128xf32>
    %58 = arith.mulf %57, %55 : vector<64x128xf32>
    %59 = arith.addf %53, %58 : vector<64x128xf32>
    %c0_38 = arith.constant 0 : index
    %c3_39 = arith.constant 3 : index
    %c1_40 = arith.constant 1 : index
    %c0_41 = arith.constant 0 : index
    %60 = vector.load %arg1[%c0_38, %c3_39, %c1_40, %c0_41] : memref<1x4x66x128xf32, #tpu.memory_space<vmem>>, vector<1x1x64x128xf32>
    %61 = vector.shape_cast %60 : vector<1x1x64x128xf32> to vector<64x128xf32>
    %c30 = arith.constant 30 : index
    %62 = memref.load %arg2[%c30] : memref<36xf32, #tpu.memory_space<smem>>
    %63 = vector.broadcast %62 : f32 to vector<64x128xf32>
    %64 = arith.mulf %63, %61 : vector<64x128xf32>
    %65 = arith.addf %59, %64 : vector<64x128xf32>
    %c0_42 = arith.constant 0 : index
    %c3_43 = arith.constant 3 : index
    %c2_44 = arith.constant 2 : index
    %c0_45 = arith.constant 0 : index
    %66 = vector.load %arg1[%c0_42, %c3_43, %c2_44, %c0_45] : memref<1x4x66x128xf32, #tpu.memory_space<vmem>>, vector<1x1x64x128xf32>
    %67 = vector.shape_cast %66 : vector<1x1x64x128xf32> to vector<64x128xf32>
    %c33 = arith.constant 33 : index
    %68 = memref.load %arg2[%c33] : memref<36xf32, #tpu.memory_space<smem>>
    %69 = vector.broadcast %68 : f32 to vector<64x128xf32>
    %70 = arith.mulf %69, %67 : vector<64x128xf32>
    %71 = arith.addf %65, %70 : vector<64x128xf32>
    %72 = vector.extract_strided_slice %71 {offsets = [0, 127], sizes = [64, 1], strides = [1, 1]} : vector<64x128xf32> to vector<64x1xf32>
    %73 = vector.extract_strided_slice %71 {offsets = [0, 0], sizes = [64, 127], strides = [1, 1]} : vector<64x128xf32> to vector<64x127xf32>
    %74 = tpu.concatenate %72, %73 in 1 : vector<64x1xf32>, vector<64x127xf32> -> vector<64x128xf32>
    %c0_46 = arith.constant 0 : index
    %c0_47 = arith.constant 0 : index
    %c0_48 = arith.constant 0 : index
    %c0_49 = arith.constant 0 : index
    %75 = vector.load %arg1[%c0_46, %c0_47, %c0_48, %c0_49] : memref<1x4x66x128xf32, #tpu.memory_space<vmem>>, vector<1x1x64x128xf32>
    %76 = vector.shape_cast %75 : vector<1x1x64x128xf32> to vector<64x128xf32>
    %c1_50 = arith.constant 1 : index
    %77 = memref.load %arg2[%c1_50] : memref<36xf32, #tpu.memory_space<smem>>
    %78 = vector.broadcast %77 : f32 to vector<64x128xf32>
    %79 = arith.mulf %78, %76 : vector<64x128xf32>
    %c0_51 = arith.constant 0 : index
    %c0_52 = arith.constant 0 : index
    %c1_53 = arith.constant 1 : index
    %c0_54 = arith.constant 0 : index
    %80 = vector.load %arg1[%c0_51, %c0_52, %c1_53, %c0_54] : memref<1x4x66x128xf32, #tpu.memory_space<vmem>>, vector<1x1x64x128xf32>
    %81 = vector.shape_cast %80 : vector<1x1x64x128xf32> to vector<64x128xf32>
    %c4 = arith.constant 4 : index
    %82 = memref.load %arg2[%c4] : memref<36xf32, #tpu.memory_space<smem>>
    %83 = vector.broadcast %82 : f32 to vector<64x128xf32>
    %84 = arith.mulf %83, %81 : vector<64x128xf32>
    %85 = arith.addf %79, %84 : vector<64x128xf32>
    %c0_55 = arith.constant 0 : index
    %c0_56 = arith.constant 0 : index
    %c2_57 = arith.constant 2 : index
    %c0_58 = arith.constant 0 : index
    %86 = vector.load %arg1[%c0_55, %c0_56, %c2_57, %c0_58] : memref<1x4x66x128xf32, #tpu.memory_space<vmem>>, vector<1x1x64x128xf32>
    %87 = vector.shape_cast %86 : vector<1x1x64x128xf32> to vector<64x128xf32>
    %c7 = arith.constant 7 : index
    %88 = memref.load %arg2[%c7] : memref<36xf32, #tpu.memory_space<smem>>
    %89 = vector.broadcast %88 : f32 to vector<64x128xf32>
    %90 = arith.mulf %89, %87 : vector<64x128xf32>
    %91 = arith.addf %85, %90 : vector<64x128xf32>
    %c0_59 = arith.constant 0 : index
    %c1_60 = arith.constant 1 : index
    %c0_61 = arith.constant 0 : index
    %c0_62 = arith.constant 0 : index
    %92 = vector.load %arg1[%c0_59, %c1_60, %c0_61, %c0_62] : memref<1x4x66x128xf32, #tpu.memory_space<vmem>>, vector<1x1x64x128xf32>
    %93 = vector.shape_cast %92 : vector<1x1x64x128xf32> to vector<64x128xf32>
    %c10 = arith.constant 10 : index
    %94 = memref.load %arg2[%c10] : memref<36xf32, #tpu.memory_space<smem>>
    %95 = vector.broadcast %94 : f32 to vector<64x128xf32>
    %96 = arith.mulf %95, %93 : vector<64x128xf32>
    %97 = arith.addf %91, %96 : vector<64x128xf32>
    %c0_63 = arith.constant 0 : index
    %c1_64 = arith.constant 1 : index
    %c1_65 = arith.constant 1 : index
    %c0_66 = arith.constant 0 : index
    %98 = vector.load %arg1[%c0_63, %c1_64, %c1_65, %c0_66] : memref<1x4x66x128xf32, #tpu.memory_space<vmem>>, vector<1x1x64x128xf32>
    %99 = vector.shape_cast %98 : vector<1x1x64x128xf32> to vector<64x128xf32>
    %c13 = arith.constant 13 : index
    %100 = memref.load %arg2[%c13] : memref<36xf32, #tpu.memory_space<smem>>
    %101 = vector.broadcast %100 : f32 to vector<64x128xf32>
    %102 = arith.mulf %101, %99 : vector<64x128xf32>
    %103 = arith.addf %97, %102 : vector<64x128xf32>
    %c0_67 = arith.constant 0 : index
    %c1_68 = arith.constant 1 : index
    %c2_69 = arith.constant 2 : index
    %c0_70 = arith.constant 0 : index
    %104 = vector.load %arg1[%c0_67, %c1_68, %c2_69, %c0_70] : memref<1x4x66x128xf32, #tpu.memory_space<vmem>>, vector<1x1x64x128xf32>
    %105 = vector.shape_cast %104 : vector<1x1x64x128xf32> to vector<64x128xf32>
    %c16 = arith.constant 16 : index
    %106 = memref.load %arg2[%c16] : memref<36xf32, #tpu.memory_space<smem>>
    %107 = vector.broadcast %106 : f32 to vector<64x128xf32>
    %108 = arith.mulf %107, %105 : vector<64x128xf32>
    %109 = arith.addf %103, %108 : vector<64x128xf32>
    %c0_71 = arith.constant 0 : index
    %c2_72 = arith.constant 2 : index
    %c0_73 = arith.constant 0 : index
    %c0_74 = arith.constant 0 : index
    %110 = vector.load %arg1[%c0_71, %c2_72, %c0_73, %c0_74] : memref<1x4x66x128xf32, #tpu.memory_space<vmem>>, vector<1x1x64x128xf32>
    %111 = vector.shape_cast %110 : vector<1x1x64x128xf32> to vector<64x128xf32>
    %c19 = arith.constant 19 : index
    %112 = memref.load %arg2[%c19] : memref<36xf32, #tpu.memory_space<smem>>
    %113 = vector.broadcast %112 : f32 to vector<64x128xf32>
    %114 = arith.mulf %113, %111 : vector<64x128xf32>
    %115 = arith.addf %109, %114 : vector<64x128xf32>
    %c0_75 = arith.constant 0 : index
    %c2_76 = arith.constant 2 : index
    %c1_77 = arith.constant 1 : index
    %c0_78 = arith.constant 0 : index
    %116 = vector.load %arg1[%c0_75, %c2_76, %c1_77, %c0_78] : memref<1x4x66x128xf32, #tpu.memory_space<vmem>>, vector<1x1x64x128xf32>
    %117 = vector.shape_cast %116 : vector<1x1x64x128xf32> to vector<64x128xf32>
    %c22 = arith.constant 22 : index
    %118 = memref.load %arg2[%c22] : memref<36xf32, #tpu.memory_space<smem>>
    %119 = vector.broadcast %118 : f32 to vector<64x128xf32>
    %120 = arith.mulf %119, %117 : vector<64x128xf32>
    %121 = arith.addf %115, %120 : vector<64x128xf32>
    %c0_79 = arith.constant 0 : index
    %c2_80 = arith.constant 2 : index
    %c2_81 = arith.constant 2 : index
    %c0_82 = arith.constant 0 : index
    %122 = vector.load %arg1[%c0_79, %c2_80, %c2_81, %c0_82] : memref<1x4x66x128xf32, #tpu.memory_space<vmem>>, vector<1x1x64x128xf32>
    %123 = vector.shape_cast %122 : vector<1x1x64x128xf32> to vector<64x128xf32>
    %c25 = arith.constant 25 : index
    %124 = memref.load %arg2[%c25] : memref<36xf32, #tpu.memory_space<smem>>
    %125 = vector.broadcast %124 : f32 to vector<64x128xf32>
    %126 = arith.mulf %125, %123 : vector<64x128xf32>
    %127 = arith.addf %121, %126 : vector<64x128xf32>
    %c0_83 = arith.constant 0 : index
    %c3_84 = arith.constant 3 : index
    %c0_85 = arith.constant 0 : index
    %c0_86 = arith.constant 0 : index
    %128 = vector.load %arg1[%c0_83, %c3_84, %c0_85, %c0_86] : memref<1x4x66x128xf32, #tpu.memory_space<vmem>>, vector<1x1x64x128xf32>
    %129 = vector.shape_cast %128 : vector<1x1x64x128xf32> to vector<64x128xf32>
    %c28 = arith.constant 28 : index
    %130 = memref.load %arg2[%c28] : memref<36xf32, #tpu.memory_space<smem>>
    %131 = vector.broadcast %130 : f32 to vector<64x128xf32>
    %132 = arith.mulf %131, %129 : vector<64x128xf32>
    %133 = arith.addf %127, %132 : vector<64x128xf32>
    %c0_87 = arith.constant 0 : index
    %c3_88 = arith.constant 3 : index
    %c1_89 = arith.constant 1 : index
    %c0_90 = arith.constant 0 : index
    %134 = vector.load %arg1[%c0_87, %c3_88, %c1_89, %c0_90] : memref<1x4x66x128xf32, #tpu.memory_space<vmem>>, vector<1x1x64x128xf32>
    %135 = vector.shape_cast %134 : vector<1x1x64x128xf32> to vector<64x128xf32>
    %c31 = arith.constant 31 : index
    %136 = memref.load %arg2[%c31] : memref<36xf32, #tpu.memory_space<smem>>
    %137 = vector.broadcast %136 : f32 to vector<64x128xf32>
    %138 = arith.mulf %137, %135 : vector<64x128xf32>
    %139 = arith.addf %133, %138 : vector<64x128xf32>
    %c0_91 = arith.constant 0 : index
    %c3_92 = arith.constant 3 : index
    %c2_93 = arith.constant 2 : index
    %c0_94 = arith.constant 0 : index
    %140 = vector.load %arg1[%c0_91, %c3_92, %c2_93, %c0_94] : memref<1x4x66x128xf32, #tpu.memory_space<vmem>>, vector<1x1x64x128xf32>
    %141 = vector.shape_cast %140 : vector<1x1x64x128xf32> to vector<64x128xf32>
    %c34 = arith.constant 34 : index
    %142 = memref.load %arg2[%c34] : memref<36xf32, #tpu.memory_space<smem>>
    %143 = vector.broadcast %142 : f32 to vector<64x128xf32>
    %144 = arith.mulf %143, %141 : vector<64x128xf32>
    %145 = arith.addf %139, %144 : vector<64x128xf32>
    %146 = arith.addf %74, %145 : vector<64x128xf32>
    %c0_95 = arith.constant 0 : index
    %c0_96 = arith.constant 0 : index
    %c0_97 = arith.constant 0 : index
    %c0_98 = arith.constant 0 : index
    %147 = vector.load %arg1[%c0_95, %c0_96, %c0_97, %c0_98] : memref<1x4x66x128xf32, #tpu.memory_space<vmem>>, vector<1x1x64x128xf32>
    %148 = vector.shape_cast %147 : vector<1x1x64x128xf32> to vector<64x128xf32>
    %c2_99 = arith.constant 2 : index
    %149 = memref.load %arg2[%c2_99] : memref<36xf32, #tpu.memory_space<smem>>
    %150 = vector.broadcast %149 : f32 to vector<64x128xf32>
    %151 = arith.mulf %150, %148 : vector<64x128xf32>
    %c0_100 = arith.constant 0 : index
    %c0_101 = arith.constant 0 : index
    %c1_102 = arith.constant 1 : index
    %c0_103 = arith.constant 0 : index
    %152 = vector.load %arg1[%c0_100, %c0_101, %c1_102, %c0_103] : memref<1x4x66x128xf32, #tpu.memory_space<vmem>>, vector<1x1x64x128xf32>
    %153 = vector.shape_cast %152 : vector<1x1x64x128xf32> to vector<64x128xf32>
    %c5 = arith.constant 5 : index
    %154 = memref.load %arg2[%c5] : memref<36xf32, #tpu.memory_space<smem>>
    %155 = vector.broadcast %154 : f32 to vector<64x128xf32>
    %156 = arith.mulf %155, %153 : vector<64x128xf32>
    %157 = arith.addf %151, %156 : vector<64x128xf32>
    %c0_104 = arith.constant 0 : index
    %c0_105 = arith.constant 0 : index
    %c2_106 = arith.constant 2 : index
    %c0_107 = arith.constant 0 : index
    %158 = vector.load %arg1[%c0_104, %c0_105, %c2_106, %c0_107] : memref<1x4x66x128xf32, #tpu.memory_space<vmem>>, vector<1x1x64x128xf32>
    %159 = vector.shape_cast %158 : vector<1x1x64x128xf32> to vector<64x128xf32>
    %c8 = arith.constant 8 : index
    %160 = memref.load %arg2[%c8] : memref<36xf32, #tpu.memory_space<smem>>
    %161 = vector.broadcast %160 : f32 to vector<64x128xf32>
    %162 = arith.mulf %161, %159 : vector<64x128xf32>
    %163 = arith.addf %157, %162 : vector<64x128xf32>
    %c0_108 = arith.constant 0 : index
    %c1_109 = arith.constant 1 : index
    %c0_110 = arith.constant 0 : index
    %c0_111 = arith.constant 0 : index
    %164 = vector.load %arg1[%c0_108, %c1_109, %c0_110, %c0_111] : memref<1x4x66x128xf32, #tpu.memory_space<vmem>>, vector<1x1x64x128xf32>
    %165 = vector.shape_cast %164 : vector<1x1x64x128xf32> to vector<64x128xf32>
    %c11 = arith.constant 11 : index
    %166 = memref.load %arg2[%c11] : memref<36xf32, #tpu.memory_space<smem>>
    %167 = vector.broadcast %166 : f32 to vector<64x128xf32>
    %168 = arith.mulf %167, %165 : vector<64x128xf32>
    %169 = arith.addf %163, %168 : vector<64x128xf32>
    %c0_112 = arith.constant 0 : index
    %c1_113 = arith.constant 1 : index
    %c1_114 = arith.constant 1 : index
    %c0_115 = arith.constant 0 : index
    %170 = vector.load %arg1[%c0_112, %c1_113, %c1_114, %c0_115] : memref<1x4x66x128xf32, #tpu.memory_space<vmem>>, vector<1x1x64x128xf32>
    %171 = vector.shape_cast %170 : vector<1x1x64x128xf32> to vector<64x128xf32>
    %c14 = arith.constant 14 : index
    %172 = memref.load %arg2[%c14] : memref<36xf32, #tpu.memory_space<smem>>
    %173 = vector.broadcast %172 : f32 to vector<64x128xf32>
    %174 = arith.mulf %173, %171 : vector<64x128xf32>
    %175 = arith.addf %169, %174 : vector<64x128xf32>
    %c0_116 = arith.constant 0 : index
    %c1_117 = arith.constant 1 : index
    %c2_118 = arith.constant 2 : index
    %c0_119 = arith.constant 0 : index
    %176 = vector.load %arg1[%c0_116, %c1_117, %c2_118, %c0_119] : memref<1x4x66x128xf32, #tpu.memory_space<vmem>>, vector<1x1x64x128xf32>
    %177 = vector.shape_cast %176 : vector<1x1x64x128xf32> to vector<64x128xf32>
    %c17 = arith.constant 17 : index
    %178 = memref.load %arg2[%c17] : memref<36xf32, #tpu.memory_space<smem>>
    %179 = vector.broadcast %178 : f32 to vector<64x128xf32>
    %180 = arith.mulf %179, %177 : vector<64x128xf32>
    %181 = arith.addf %175, %180 : vector<64x128xf32>
    %c0_120 = arith.constant 0 : index
    %c2_121 = arith.constant 2 : index
    %c0_122 = arith.constant 0 : index
    %c0_123 = arith.constant 0 : index
    %182 = vector.load %arg1[%c0_120, %c2_121, %c0_122, %c0_123] : memref<1x4x66x128xf32, #tpu.memory_space<vmem>>, vector<1x1x64x128xf32>
    %183 = vector.shape_cast %182 : vector<1x1x64x128xf32> to vector<64x128xf32>
    %c20 = arith.constant 20 : index
    %184 = memref.load %arg2[%c20] : memref<36xf32, #tpu.memory_space<smem>>
    %185 = vector.broadcast %184 : f32 to vector<64x128xf32>
    %186 = arith.mulf %185, %183 : vector<64x128xf32>
    %187 = arith.addf %181, %186 : vector<64x128xf32>
    %c0_124 = arith.constant 0 : index
    %c2_125 = arith.constant 2 : index
    %c1_126 = arith.constant 1 : index
    %c0_127 = arith.constant 0 : index
    %188 = vector.load %arg1[%c0_124, %c2_125, %c1_126, %c0_127] : memref<1x4x66x128xf32, #tpu.memory_space<vmem>>, vector<1x1x64x128xf32>
    %189 = vector.shape_cast %188 : vector<1x1x64x128xf32> to vector<64x128xf32>
    %c23 = arith.constant 23 : index
    %190 = memref.load %arg2[%c23] : memref<36xf32, #tpu.memory_space<smem>>
    %191 = vector.broadcast %190 : f32 to vector<64x128xf32>
    %192 = arith.mulf %191, %189 : vector<64x128xf32>
    %193 = arith.addf %187, %192 : vector<64x128xf32>
    %c0_128 = arith.constant 0 : index
    %c2_129 = arith.constant 2 : index
    %c2_130 = arith.constant 2 : index
    %c0_131 = arith.constant 0 : index
    %194 = vector.load %arg1[%c0_128, %c2_129, %c2_130, %c0_131] : memref<1x4x66x128xf32, #tpu.memory_space<vmem>>, vector<1x1x64x128xf32>
    %195 = vector.shape_cast %194 : vector<1x1x64x128xf32> to vector<64x128xf32>
    %c26 = arith.constant 26 : index
    %196 = memref.load %arg2[%c26] : memref<36xf32, #tpu.memory_space<smem>>
    %197 = vector.broadcast %196 : f32 to vector<64x128xf32>
    %198 = arith.mulf %197, %195 : vector<64x128xf32>
    %199 = arith.addf %193, %198 : vector<64x128xf32>
    %c0_132 = arith.constant 0 : index
    %c3_133 = arith.constant 3 : index
    %c0_134 = arith.constant 0 : index
    %c0_135 = arith.constant 0 : index
    %200 = vector.load %arg1[%c0_132, %c3_133, %c0_134, %c0_135] : memref<1x4x66x128xf32, #tpu.memory_space<vmem>>, vector<1x1x64x128xf32>
    %201 = vector.shape_cast %200 : vector<1x1x64x128xf32> to vector<64x128xf32>
    %c29 = arith.constant 29 : index
    %202 = memref.load %arg2[%c29] : memref<36xf32, #tpu.memory_space<smem>>
    %203 = vector.broadcast %202 : f32 to vector<64x128xf32>
    %204 = arith.mulf %203, %201 : vector<64x128xf32>
    %205 = arith.addf %199, %204 : vector<64x128xf32>
    %c0_136 = arith.constant 0 : index
    %c3_137 = arith.constant 3 : index
    %c1_138 = arith.constant 1 : index
    %c0_139 = arith.constant 0 : index
    %206 = vector.load %arg1[%c0_136, %c3_137, %c1_138, %c0_139] : memref<1x4x66x128xf32, #tpu.memory_space<vmem>>, vector<1x1x64x128xf32>
    %207 = vector.shape_cast %206 : vector<1x1x64x128xf32> to vector<64x128xf32>
    %c32 = arith.constant 32 : index
    %208 = memref.load %arg2[%c32] : memref<36xf32, #tpu.memory_space<smem>>
    %209 = vector.broadcast %208 : f32 to vector<64x128xf32>
    %210 = arith.mulf %209, %207 : vector<64x128xf32>
    %211 = arith.addf %205, %210 : vector<64x128xf32>
    %c0_140 = arith.constant 0 : index
    %c3_141 = arith.constant 3 : index
    %c2_142 = arith.constant 2 : index
    %c0_143 = arith.constant 0 : index
    %212 = vector.load %arg1[%c0_140, %c3_141, %c2_142, %c0_143] : memref<1x4x66x128xf32, #tpu.memory_space<vmem>>, vector<1x1x64x128xf32>
    %213 = vector.shape_cast %212 : vector<1x1x64x128xf32> to vector<64x128xf32>
    %c35 = arith.constant 35 : index
    %214 = memref.load %arg2[%c35] : memref<36xf32, #tpu.memory_space<smem>>
    %215 = vector.broadcast %214 : f32 to vector<64x128xf32>
    %216 = arith.mulf %215, %213 : vector<64x128xf32>
    %217 = arith.addf %211, %216 : vector<64x128xf32>
    %218 = vector.extract_strided_slice %217 {offsets = [0, 1], sizes = [64, 127], strides = [1, 1]} : vector<64x128xf32> to vector<64x127xf32>
    %219 = vector.extract_strided_slice %217 {offsets = [0, 0], sizes = [64, 1], strides = [1, 1]} : vector<64x128xf32> to vector<64x1xf32>
    %220 = tpu.concatenate %218, %219 in 1 : vector<64x127xf32>, vector<64x1xf32> -> vector<64x128xf32>
    %221 = arith.addf %146, %220 : vector<64x128xf32>
    %c0_144 = arith.constant 0 : index
    %222 = memref.load %arg3[%c0_144] : memref<1xf32, #tpu.memory_space<smem>>
    %223 = vector.broadcast %222 : f32 to vector<64x128xf32>
    %224 = arith.addf %221, %223 : vector<64x128xf32>
    %c64_i32 = arith.constant 64 : i32
    %225 = vector.broadcast %c64_i32 : i32 to vector<64x128xi32>
    %226 = arith.cmpi slt, %0, %225 : vector<64x128xi32>
    %cst = arith.constant 0.000000e+00 : f32
    %227 = vector.broadcast %cst : f32 to vector<64x128xf32>
    %228 = arith.maximumf %224, %227 : vector<64x128xf32>
    %cst_145 = arith.constant 0.000000e+00 : f32
    %229 = vector.broadcast %cst_145 : f32 to vector<64x128xf32>
    %230 = arith.select %226, %228, %229 : vector<64x128xi1>, vector<64x128xf32>
    %cst_146 = arith.constant 0.000000e+00 : f32
    %231 = vector.broadcast %cst_146 : f32 to vector<2x128xf32>
    %c6_147 = arith.constant 6 : index
    %c0_148 = arith.constant 0 : index
    %232 = vector.load %arg11[%c6_147, %c0_148] : memref<80x128xf32, #tpu.memory_space<vmem>>, vector<2x128xf32>
    tpu.vector_store %arg11[%c6_147, %c0_148], %231 {strides = array<i32>} : memref<80x128xf32, #tpu.memory_space<vmem>>, vector<2x128xf32>,
    %cst_149 = arith.constant 0.000000e+00 : f32
    %233 = vector.broadcast %cst_149 : f32 to vector<2x128xf32>
    %c72 = arith.constant 72 : index
    %c0_150 = arith.constant 0 : index
    %234 = vector.load %arg11[%c72, %c0_150] : memref<80x128xf32, #tpu.memory_space<vmem>>, vector<2x128xf32>
    tpu.vector_store %arg11[%c72, %c0_150], %233 {strides = array<i32>} : memref<80x128xf32, #tpu.memory_space<vmem>>, vector<2x128xf32>,
    %c8_151 = arith.constant 8 : index
    %c0_152 = arith.constant 0 : index
    %235 = vector.load %arg11[%c8_151, %c0_152] : memref<80x128xf32, #tpu.memory_space<vmem>>, vector<64x128xf32>
    tpu.vector_store %arg11[%c8_151, %c0_152], %230 {strides = array<i32>} : memref<80x128xf32, #tpu.memory_space<vmem>>, vector<64x128xf32>,
    %c6_153 = arith.constant 6 : index
    %c0_154 = arith.constant 0 : index
    %236 = vector.load %arg11[%c6_153, %c0_154] : memref<80x128xf32, #tpu.memory_space<vmem>>, vector<64x128xf32>
    %c0_155 = arith.constant 0 : index
    %237 = memref.load %arg4[%c0_155] : memref<25xf32, #tpu.memory_space<smem>>
    %238 = vector.broadcast %237 : f32 to vector<64x128xf32>
    %239 = arith.mulf %238, %236 : vector<64x128xf32>
    %c7_156 = arith.constant 7 : index
    %c0_157 = arith.constant 0 : index
    %240 = vector.load %arg11[%c7_156, %c0_157] : memref<80x128xf32, #tpu.memory_space<vmem>>, vector<64x128xf32>
    %c5_158 = arith.constant 5 : index
    %241 = memref.load %arg4[%c5_158] : memref<25xf32, #tpu.memory_space<smem>>
    %242 = vector.broadcast %241 : f32 to vector<64x128xf32>
    %243 = arith.mulf %242, %240 : vector<64x128xf32>
    %244 = arith.addf %239, %243 : vector<64x128xf32>
    %c8_159 = arith.constant 8 : index
    %c0_160 = arith.constant 0 : index
    %245 = vector.load %arg11[%c8_159, %c0_160] : memref<80x128xf32, #tpu.memory_space<vmem>>, vector<64x128xf32>
    %c10_161 = arith.constant 10 : index
    %246 = memref.load %arg4[%c10_161] : memref<25xf32, #tpu.memory_space<smem>>
    %247 = vector.broadcast %246 : f32 to vector<64x128xf32>
    %248 = arith.mulf %247, %245 : vector<64x128xf32>
    %249 = arith.addf %244, %248 : vector<64x128xf32>
    %c9_162 = arith.constant 9 : index
    %c0_163 = arith.constant 0 : index
    %250 = vector.load %arg11[%c9_162, %c0_163] : memref<80x128xf32, #tpu.memory_space<vmem>>, vector<64x128xf32>
    %c15_164 = arith.constant 15 : index
    %251 = memref.load %arg4[%c15_164] : memref<25xf32, #tpu.memory_space<smem>>
    %252 = vector.broadcast %251 : f32 to vector<64x128xf32>
    %253 = arith.mulf %252, %250 : vector<64x128xf32>
    %254 = arith.addf %249, %253 : vector<64x128xf32>
    %c10_165 = arith.constant 10 : index
    %c0_166 = arith.constant 0 : index
    %255 = vector.load %arg11[%c10_165, %c0_166] : memref<80x128xf32, #tpu.memory_space<vmem>>, vector<64x128xf32>
    %c20_167 = arith.constant 20 : index
    %256 = memref.load %arg4[%c20_167] : memref<25xf32, #tpu.memory_space<smem>>
    %257 = vector.broadcast %256 : f32 to vector<64x128xf32>
    %258 = arith.mulf %257, %255 : vector<64x128xf32>
    %259 = arith.addf %254, %258 : vector<64x128xf32>
    %260 = vector.extract_strided_slice %259 {offsets = [0, 126], sizes = [64, 2], strides = [1, 1]} : vector<64x128xf32> to vector<64x2xf32>
    %261 = vector.extract_strided_slice %259 {offsets = [0, 0], sizes = [64, 126], strides = [1, 1]} : vector<64x128xf32> to vector<64x126xf32>
    %262 = tpu.concatenate %260, %261 in 1 : vector<64x2xf32>, vector<64x126xf32> -> vector<64x128xf32>
    %c6_168 = arith.constant 6 : index
    %c0_169 = arith.constant 0 : index
    %263 = vector.load %arg11[%c6_168, %c0_169] : memref<80x128xf32, #tpu.memory_space<vmem>>, vector<64x128xf32>
    %c1_170 = arith.constant 1 : index
    %264 = memref.load %arg4[%c1_170] : memref<25xf32, #tpu.memory_space<smem>>
    %265 = vector.broadcast %264 : f32 to vector<64x128xf32>
    %266 = arith.mulf %265, %263 : vector<64x128xf32>
    %c7_171 = arith.constant 7 : index
    %c0_172 = arith.constant 0 : index
    %267 = vector.load %arg11[%c7_171, %c0_172] : memref<80x128xf32, #tpu.memory_space<vmem>>, vector<64x128xf32>
    %c6_173 = arith.constant 6 : index
    %268 = memref.load %arg4[%c6_173] : memref<25xf32, #tpu.memory_space<smem>>
    %269 = vector.broadcast %268 : f32 to vector<64x128xf32>
    %270 = arith.mulf %269, %267 : vector<64x128xf32>
    %271 = arith.addf %266, %270 : vector<64x128xf32>
    %c8_174 = arith.constant 8 : index
    %c0_175 = arith.constant 0 : index
    %272 = vector.load %arg11[%c8_174, %c0_175] : memref<80x128xf32, #tpu.memory_space<vmem>>, vector<64x128xf32>
    %c11_176 = arith.constant 11 : index
    %273 = memref.load %arg4[%c11_176] : memref<25xf32, #tpu.memory_space<smem>>
    %274 = vector.broadcast %273 : f32 to vector<64x128xf32>
    %275 = arith.mulf %274, %272 : vector<64x128xf32>
    %276 = arith.addf %271, %275 : vector<64x128xf32>
    %c9_177 = arith.constant 9 : index
    %c0_178 = arith.constant 0 : index
    %277 = vector.load %arg11[%c9_177, %c0_178] : memref<80x128xf32, #tpu.memory_space<vmem>>, vector<64x128xf32>
    %c16_179 = arith.constant 16 : index
    %278 = memref.load %arg4[%c16_179] : memref<25xf32, #tpu.memory_space<smem>>
    %279 = vector.broadcast %278 : f32 to vector<64x128xf32>
    %280 = arith.mulf %279, %277 : vector<64x128xf32>
    %281 = arith.addf %276, %280 : vector<64x128xf32>
    %c10_180 = arith.constant 10 : index
    %c0_181 = arith.constant 0 : index
    %282 = vector.load %arg11[%c10_180, %c0_181] : memref<80x128xf32, #tpu.memory_space<vmem>>, vector<64x128xf32>
    %c21_182 = arith.constant 21 : index
    %283 = memref.load %arg4[%c21_182] : memref<25xf32, #tpu.memory_space<smem>>
    %284 = vector.broadcast %283 : f32 to vector<64x128xf32>
    %285 = arith.mulf %284, %282 : vector<64x128xf32>
    %286 = arith.addf %281, %285 : vector<64x128xf32>
    %287 = vector.extract_strided_slice %286 {offsets = [0, 127], sizes = [64, 1], strides = [1, 1]} : vector<64x128xf32> to vector<64x1xf32>
    %288 = vector.extract_strided_slice %286 {offsets = [0, 0], sizes = [64, 127], strides = [1, 1]} : vector<64x128xf32> to vector<64x127xf32>
    %289 = tpu.concatenate %287, %288 in 1 : vector<64x1xf32>, vector<64x127xf32> -> vector<64x128xf32>
    %290 = arith.addf %262, %289 : vector<64x128xf32>
    %c6_183 = arith.constant 6 : index
    %c0_184 = arith.constant 0 : index
    %291 = vector.load %arg11[%c6_183, %c0_184] : memref<80x128xf32, #tpu.memory_space<vmem>>, vector<64x128xf32>
    %c2_185 = arith.constant 2 : index
    %292 = memref.load %arg4[%c2_185] : memref<25xf32, #tpu.memory_space<smem>>
    %293 = vector.broadcast %292 : f32 to vector<64x128xf32>
    %294 = arith.mulf %293, %291 : vector<64x128xf32>
    %c7_186 = arith.constant 7 : index
    %c0_187 = arith.constant 0 : index
    %295 = vector.load %arg11[%c7_186, %c0_187] : memref<80x128xf32, #tpu.memory_space<vmem>>, vector<64x128xf32>
    %c7_188 = arith.constant 7 : index
    %296 = memref.load %arg4[%c7_188] : memref<25xf32, #tpu.memory_space<smem>>
    %297 = vector.broadcast %296 : f32 to vector<64x128xf32>
    %298 = arith.mulf %297, %295 : vector<64x128xf32>
    %299 = arith.addf %294, %298 : vector<64x128xf32>
    %c8_189 = arith.constant 8 : index
    %c0_190 = arith.constant 0 : index
    %300 = vector.load %arg11[%c8_189, %c0_190] : memref<80x128xf32, #tpu.memory_space<vmem>>, vector<64x128xf32>
    %c12_191 = arith.constant 12 : index
    %301 = memref.load %arg4[%c12_191] : memref<25xf32, #tpu.memory_space<smem>>
    %302 = vector.broadcast %301 : f32 to vector<64x128xf32>
    %303 = arith.mulf %302, %300 : vector<64x128xf32>
    %304 = arith.addf %299, %303 : vector<64x128xf32>
    %c9_192 = arith.constant 9 : index
    %c0_193 = arith.constant 0 : index
    %305 = vector.load %arg11[%c9_192, %c0_193] : memref<80x128xf32, #tpu.memory_space<vmem>>, vector<64x128xf32>
    %c17_194 = arith.constant 17 : index
    %306 = memref.load %arg4[%c17_194] : memref<25xf32, #tpu.memory_space<smem>>
    %307 = vector.broadcast %306 : f32 to vector<64x128xf32>
    %308 = arith.mulf %307, %305 : vector<64x128xf32>
    %309 = arith.addf %304, %308 : vector<64x128xf32>
    %c10_195 = arith.constant 10 : index
    %c0_196 = arith.constant 0 : index
    %310 = vector.load %arg11[%c10_195, %c0_196] : memref<80x128xf32, #tpu.memory_space<vmem>>, vector<64x128xf32>
    %c22_197 = arith.constant 22 : index
    %311 = memref.load %arg4[%c22_197] : memref<25xf32, #tpu.memory_space<smem>>
    %312 = vector.broadcast %311 : f32 to vector<64x128xf32>
    %313 = arith.mulf %312, %310 : vector<64x128xf32>
    %314 = arith.addf %309, %313 : vector<64x128xf32>
    %315 = arith.addf %290, %314 : vector<64x128xf32>
    %c6_198 = arith.constant 6 : index
    %c0_199 = arith.constant 0 : index
    %316 = vector.load %arg11[%c6_198, %c0_199] : memref<80x128xf32, #tpu.memory_space<vmem>>, vector<64x128xf32>
    %c3_200 = arith.constant 3 : index
    %317 = memref.load %arg4[%c3_200] : memref<25xf32, #tpu.memory_space<smem>>
    %318 = vector.broadcast %317 : f32 to vector<64x128xf32>
    %319 = arith.mulf %318, %316 : vector<64x128xf32>
    %c7_201 = arith.constant 7 : index
    %c0_202 = arith.constant 0 : index
    %320 = vector.load %arg11[%c7_201, %c0_202] : memref<80x128xf32, #tpu.memory_space<vmem>>, vector<64x128xf32>
    %c8_203 = arith.constant 8 : index
    %321 = memref.load %arg4[%c8_203] : memref<25xf32, #tpu.memory_space<smem>>
    %322 = vector.broadcast %321 : f32 to vector<64x128xf32>
    %323 = arith.mulf %322, %320 : vector<64x128xf32>
    %324 = arith.addf %319, %323 : vector<64x128xf32>
    %c8_204 = arith.constant 8 : index
    %c0_205 = arith.constant 0 : index
    %325 = vector.load %arg11[%c8_204, %c0_205] : memref<80x128xf32, #tpu.memory_space<vmem>>, vector<64x128xf32>
    %c13_206 = arith.constant 13 : index
    %326 = memref.load %arg4[%c13_206] : memref<25xf32, #tpu.memory_space<smem>>
    %327 = vector.broadcast %326 : f32 to vector<64x128xf32>
    %328 = arith.mulf %327, %325 : vector<64x128xf32>
    %329 = arith.addf %324, %328 : vector<64x128xf32>
    %c9_207 = arith.constant 9 : index
    %c0_208 = arith.constant 0 : index
    %330 = vector.load %arg11[%c9_207, %c0_208] : memref<80x128xf32, #tpu.memory_space<vmem>>, vector<64x128xf32>
    %c18_209 = arith.constant 18 : index
    %331 = memref.load %arg4[%c18_209] : memref<25xf32, #tpu.memory_space<smem>>
    %332 = vector.broadcast %331 : f32 to vector<64x128xf32>
    %333 = arith.mulf %332, %330 : vector<64x128xf32>
    %334 = arith.addf %329, %333 : vector<64x128xf32>
    %c10_210 = arith.constant 10 : index
    %c0_211 = arith.constant 0 : index
    %335 = vector.load %arg11[%c10_210, %c0_211] : memref<80x128xf32, #tpu.memory_space<vmem>>, vector<64x128xf32>
    %c23_212 = arith.constant 23 : index
    %336 = memref.load %arg4[%c23_212] : memref<25xf32, #tpu.memory_space<smem>>
    %337 = vector.broadcast %336 : f32 to vector<64x128xf32>
    %338 = arith.mulf %337, %335 : vector<64x128xf32>
    %339 = arith.addf %334, %338 : vector<64x128xf32>
    %340 = vector.extract_strided_slice %339 {offsets = [0, 1], sizes = [64, 127], strides = [1, 1]} : vector<64x128xf32> to vector<64x127xf32>
    %341 = vector.extract_strided_slice %339 {offsets = [0, 0], sizes = [64, 1], strides = [1, 1]} : vector<64x128xf32> to vector<64x1xf32>
    %342 = tpu.concatenate %340, %341 in 1 : vector<64x127xf32>, vector<64x1xf32> -> vector<64x128xf32>
    %343 = arith.addf %315, %342 : vector<64x128xf32>
    %c6_213 = arith.constant 6 : index
    %c0_214 = arith.constant 0 : index
    %344 = vector.load %arg11[%c6_213, %c0_214] : memref<80x128xf32, #tpu.memory_space<vmem>>, vector<64x128xf32>
    %c4_215 = arith.constant 4 : index
    %345 = memref.load %arg4[%c4_215] : memref<25xf32, #tpu.memory_space<smem>>
    %346 = vector.broadcast %345 : f32 to vector<64x128xf32>
    %347 = arith.mulf %346, %344 : vector<64x128xf32>
    %c7_216 = arith.constant 7 : index
    %c0_217 = arith.constant 0 : index
    %348 = vector.load %arg11[%c7_216, %c0_217] : memref<80x128xf32, #tpu.memory_space<vmem>>, vector<64x128xf32>
    %c9_218 = arith.constant 9 : index
    %349 = memref.load %arg4[%c9_218] : memref<25xf32, #tpu.memory_space<smem>>
    %350 = vector.broadcast %349 : f32 to vector<64x128xf32>
    %351 = arith.mulf %350, %348 : vector<64x128xf32>
    %352 = arith.addf %347, %351 : vector<64x128xf32>
    %c8_219 = arith.constant 8 : index
    %c0_220 = arith.constant 0 : index
    %353 = vector.load %arg11[%c8_219, %c0_220] : memref<80x128xf32, #tpu.memory_space<vmem>>, vector<64x128xf32>
    %c14_221 = arith.constant 14 : index
    %354 = memref.load %arg4[%c14_221] : memref<25xf32, #tpu.memory_space<smem>>
    %355 = vector.broadcast %354 : f32 to vector<64x128xf32>
    %356 = arith.mulf %355, %353 : vector<64x128xf32>
    %357 = arith.addf %352, %356 : vector<64x128xf32>
    %c9_222 = arith.constant 9 : index
    %c0_223 = arith.constant 0 : index
    %358 = vector.load %arg11[%c9_222, %c0_223] : memref<80x128xf32, #tpu.memory_space<vmem>>, vector<64x128xf32>
    %c19_224 = arith.constant 19 : index
    %359 = memref.load %arg4[%c19_224] : memref<25xf32, #tpu.memory_space<smem>>
    %360 = vector.broadcast %359 : f32 to vector<64x128xf32>
    %361 = arith.mulf %360, %358 : vector<64x128xf32>
    %362 = arith.addf %357, %361 : vector<64x128xf32>
    %c10_225 = arith.constant 10 : index
    %c0_226 = arith.constant 0 : index
    %363 = vector.load %arg11[%c10_225, %c0_226] : memref<80x128xf32, #tpu.memory_space<vmem>>, vector<64x128xf32>
    %c24_227 = arith.constant 24 : index
    %364 = memref.load %arg4[%c24_227] : memref<25xf32, #tpu.memory_space<smem>>
    %365 = vector.broadcast %364 : f32 to vector<64x128xf32>
    %366 = arith.mulf %365, %363 : vector<64x128xf32>
    %367 = arith.addf %362, %366 : vector<64x128xf32>
    %368 = vector.extract_strided_slice %367 {offsets = [0, 2], sizes = [64, 126], strides = [1, 1]} : vector<64x128xf32> to vector<64x126xf32>
    %369 = vector.extract_strided_slice %367 {offsets = [0, 0], sizes = [64, 2], strides = [1, 1]} : vector<64x128xf32> to vector<64x2xf32>
    %370 = tpu.concatenate %368, %369 in 1 : vector<64x126xf32>, vector<64x2xf32> -> vector<64x128xf32>
    %371 = arith.addf %343, %370 : vector<64x128xf32>
    %c0_228 = arith.constant 0 : index
    %372 = memref.load %arg5[%c0_228] : memref<1xf32, #tpu.memory_space<smem>>
    %373 = vector.broadcast %372 : f32 to vector<64x128xf32>
    %374 = arith.addf %371, %373 : vector<64x128xf32>
    %cst_229 = arith.constant 0.000000e+00 : f32
    %375 = vector.broadcast %cst_229 : f32 to vector<64x128xf32>
    %376 = arith.maximumf %374, %375 : vector<64x128xf32>
    %c0_230 = arith.constant 0 : index
    %c0_231 = arith.constant 0 : index
    %c0_232 = arith.constant 0 : index
    %377 = vector.load %arg6[%c0_230, %c0_231, %c0_232] : memref<10x64x128xf32, #tpu.memory_space<vmem>>, vector<1x64x128xf32>
    %378 = vector.shape_cast %377 : vector<1x64x128xf32> to vector<64x128xf32>
    %379 = arith.mulf %376, %378 : vector<64x128xf32>
    %cst_233 = arith.constant dense<0.000000e+00> : vector<128xf32>
    %380 = vector.multi_reduction <add>, %379, %cst_233 [0] : vector<64x128xf32> to vector<128xf32>
    %381 = vector.shape_cast %380 : vector<128xf32> to vector<1x128xf32>
    %c1_234 = arith.constant 1 : index
    %c0_235 = arith.constant 0 : index
    %c0_236 = arith.constant 0 : index
    %382 = vector.load %arg6[%c1_234, %c0_235, %c0_236] : memref<10x64x128xf32, #tpu.memory_space<vmem>>, vector<1x64x128xf32>
    %383 = vector.shape_cast %382 : vector<1x64x128xf32> to vector<64x128xf32>
    %384 = arith.mulf %376, %383 : vector<64x128xf32>
    %cst_237 = arith.constant dense<0.000000e+00> : vector<128xf32>
    %385 = vector.multi_reduction <add>, %384, %cst_237 [0] : vector<64x128xf32> to vector<128xf32>
    %386 = vector.shape_cast %385 : vector<128xf32> to vector<1x128xf32>
    %c2_238 = arith.constant 2 : index
    %c0_239 = arith.constant 0 : index
    %c0_240 = arith.constant 0 : index
    %387 = vector.load %arg6[%c2_238, %c0_239, %c0_240] : memref<10x64x128xf32, #tpu.memory_space<vmem>>, vector<1x64x128xf32>
    %388 = vector.shape_cast %387 : vector<1x64x128xf32> to vector<64x128xf32>
    %389 = arith.mulf %376, %388 : vector<64x128xf32>
    %cst_241 = arith.constant dense<0.000000e+00> : vector<128xf32>
    %390 = vector.multi_reduction <add>, %389, %cst_241 [0] : vector<64x128xf32> to vector<128xf32>
    %391 = vector.shape_cast %390 : vector<128xf32> to vector<1x128xf32>
    %c3_242 = arith.constant 3 : index
    %c0_243 = arith.constant 0 : index
    %c0_244 = arith.constant 0 : index
    %392 = vector.load %arg6[%c3_242, %c0_243, %c0_244] : memref<10x64x128xf32, #tpu.memory_space<vmem>>, vector<1x64x128xf32>
    %393 = vector.shape_cast %392 : vector<1x64x128xf32> to vector<64x128xf32>
    %394 = arith.mulf %376, %393 : vector<64x128xf32>
    %cst_245 = arith.constant dense<0.000000e+00> : vector<128xf32>
    %395 = vector.multi_reduction <add>, %394, %cst_245 [0] : vector<64x128xf32> to vector<128xf32>
    %396 = vector.shape_cast %395 : vector<128xf32> to vector<1x128xf32>
    %c4_246 = arith.constant 4 : index
    %c0_247 = arith.constant 0 : index
    %c0_248 = arith.constant 0 : index
    %397 = vector.load %arg6[%c4_246, %c0_247, %c0_248] : memref<10x64x128xf32, #tpu.memory_space<vmem>>, vector<1x64x128xf32>
    %398 = vector.shape_cast %397 : vector<1x64x128xf32> to vector<64x128xf32>
    %399 = arith.mulf %376, %398 : vector<64x128xf32>
    %cst_249 = arith.constant dense<0.000000e+00> : vector<128xf32>
    %400 = vector.multi_reduction <add>, %399, %cst_249 [0] : vector<64x128xf32> to vector<128xf32>
    %401 = vector.shape_cast %400 : vector<128xf32> to vector<1x128xf32>
    %c5_250 = arith.constant 5 : index
    %c0_251 = arith.constant 0 : index
    %c0_252 = arith.constant 0 : index
    %402 = vector.load %arg6[%c5_250, %c0_251, %c0_252] : memref<10x64x128xf32, #tpu.memory_space<vmem>>, vector<1x64x128xf32>
    %403 = vector.shape_cast %402 : vector<1x64x128xf32> to vector<64x128xf32>
    %404 = arith.mulf %376, %403 : vector<64x128xf32>
    %cst_253 = arith.constant dense<0.000000e+00> : vector<128xf32>
    %405 = vector.multi_reduction <add>, %404, %cst_253 [0] : vector<64x128xf32> to vector<128xf32>
    %406 = vector.shape_cast %405 : vector<128xf32> to vector<1x128xf32>
    %c6_254 = arith.constant 6 : index
    %c0_255 = arith.constant 0 : index
    %c0_256 = arith.constant 0 : index
    %407 = vector.load %arg6[%c6_254, %c0_255, %c0_256] : memref<10x64x128xf32, #tpu.memory_space<vmem>>, vector<1x64x128xf32>
    %408 = vector.shape_cast %407 : vector<1x64x128xf32> to vector<64x128xf32>
    %409 = arith.mulf %376, %408 : vector<64x128xf32>
    %cst_257 = arith.constant dense<0.000000e+00> : vector<128xf32>
    %410 = vector.multi_reduction <add>, %409, %cst_257 [0] : vector<64x128xf32> to vector<128xf32>
    %411 = vector.shape_cast %410 : vector<128xf32> to vector<1x128xf32>
    %c7_258 = arith.constant 7 : index
    %c0_259 = arith.constant 0 : index
    %c0_260 = arith.constant 0 : index
    %412 = vector.load %arg6[%c7_258, %c0_259, %c0_260] : memref<10x64x128xf32, #tpu.memory_space<vmem>>, vector<1x64x128xf32>
    %413 = vector.shape_cast %412 : vector<1x64x128xf32> to vector<64x128xf32>
    %414 = arith.mulf %376, %413 : vector<64x128xf32>
    %cst_261 = arith.constant dense<0.000000e+00> : vector<128xf32>
    %415 = vector.multi_reduction <add>, %414, %cst_261 [0] : vector<64x128xf32> to vector<128xf32>
    %416 = vector.shape_cast %415 : vector<128xf32> to vector<1x128xf32>
    %c8_262 = arith.constant 8 : index
    %c0_263 = arith.constant 0 : index
    %c0_264 = arith.constant 0 : index
    %417 = vector.load %arg6[%c8_262, %c0_263, %c0_264] : memref<10x64x128xf32, #tpu.memory_space<vmem>>, vector<1x64x128xf32>
    %418 = vector.shape_cast %417 : vector<1x64x128xf32> to vector<64x128xf32>
    %419 = arith.mulf %376, %418 : vector<64x128xf32>
    %cst_265 = arith.constant dense<0.000000e+00> : vector<128xf32>
    %420 = vector.multi_reduction <add>, %419, %cst_265 [0] : vector<64x128xf32> to vector<128xf32>
    %421 = vector.shape_cast %420 : vector<128xf32> to vector<1x128xf32>
    %c9_266 = arith.constant 9 : index
    %c0_267 = arith.constant 0 : index
    %c0_268 = arith.constant 0 : index
    %422 = vector.load %arg6[%c9_266, %c0_267, %c0_268] : memref<10x64x128xf32, #tpu.memory_space<vmem>>, vector<1x64x128xf32>
    %423 = vector.shape_cast %422 : vector<1x64x128xf32> to vector<64x128xf32>
    %424 = arith.mulf %376, %423 : vector<64x128xf32>
    %cst_269 = arith.constant dense<0.000000e+00> : vector<128xf32>
    %425 = vector.multi_reduction <add>, %424, %cst_269 [0] : vector<64x128xf32> to vector<128xf32>
    %426 = vector.shape_cast %425 : vector<128xf32> to vector<1x128xf32>
    %427 = tpu.concatenate %381, %386, %391, %396, %401, %406, %411, %416, %421, %426 in 0 : vector<1x128xf32>, vector<1x128xf32>, vector<1x128xf32>, vector<1x128xf32>, vector<1x128xf32>, vector<1x128xf32>, vector<1x128xf32>, vector<1x128xf32>, vector<1x128xf32>, vector<1x128xf32> -> vector<10x128xf32>
    %cst_270 = arith.constant dense<0.000000e+00> : vector<10xf32>
    %428 = vector.multi_reduction <add>, %427, %cst_270 [1] : vector<10x128xf32> to vector<10xf32>
    %429 = vector.shape_cast %428 : vector<10xf32> to vector<10x1xf32>
    %c0_271 = arith.constant 0 : index
    %c0_272 = arith.constant 0 : index
    %430 = vector.load %arg7[%c0_271, %c0_272] : memref<10x1xf32, #tpu.memory_space<vmem>>, vector<10x1xf32>
    %431 = arith.addf %429, %430 : vector<10x1xf32>
    %cst_273 = arith.constant 0.000000e+00 : f32
    %432 = vector.broadcast %cst_273 : f32 to vector<10x1xf32>
    %433 = arith.maximumf %431, %432 : vector<10x1xf32>
    %c0_274 = arith.constant 0 : index
    %c0_275 = arith.constant 0 : index
    %434 = vector.load %arg8[%c0_274, %c0_275] : memref<10x10xf32, #tpu.memory_space<vmem>>, vector<10x10xf32>
    %435 = vector.broadcast %433 : vector<10x1xf32> to vector<10x10xf32>
    %436 = arith.mulf %435, %434 : vector<10x10xf32>
    %cst_276 = arith.constant dense<0.000000e+00> : vector<10xf32>
    %437 = vector.multi_reduction <add>, %436, %cst_276 [0] : vector<10x10xf32> to vector<10xf32>
    %438 = vector.shape_cast %437 : vector<10xf32> to vector<1x10xf32>
    %c0_277 = arith.constant 0 : index
    %c0_278 = arith.constant 0 : index
    %439 = vector.load %arg9[%c0_277, %c0_278] : memref<1x10xf32, #tpu.memory_space<vmem>>, vector<1x10xf32>
    %440 = arith.addf %438, %439 : vector<1x10xf32>
    %441 = vector.shape_cast %440 : vector<1x10xf32> to vector<1x1x10xf32>
    %c0_279 = arith.constant 0 : index
    %c0_280 = arith.constant 0 : index
    %c0_281 = arith.constant 0 : index
    %442 = vector.load %arg10[%c0_279, %c0_280, %c0_281] : memref<1x1x10xf32, #tpu.memory_space<vmem>>, vector<1x1x10xf32>
    tpu.vector_store %arg10[%c0_279, %c0_280, %c0_281], %441 {strides = array<i32>} : memref<1x1x10xf32, #tpu.memory_space<vmem>>, vector<1x1x10xf32>,
    return
  }
  func.func @transform_0(%arg0: i32) -> (i32, i32, i32, i32) {
    %c0_i32 = arith.constant 0 : i32
    %c0_i32_0 = arith.constant 0 : i32
    %c0_i32_1 = arith.constant 0 : i32
    %c0_i32_2 = arith.constant 0 : i32
    return %arg0, %c0_i32, %c0_i32_0, %c0_i32_1 : i32, i32, i32, i32
  }
  func.func @transform_1(%arg0: i32) -> i32 {
    %c0_i32 = arith.constant 0 : i32
    %c0_i32_0 = arith.constant 0 : i32
    return %c0_i32 : i32
  }
  func.func @transform_2(%arg0: i32) -> i32 {
    %c0_i32 = arith.constant 0 : i32
    %c0_i32_0 = arith.constant 0 : i32
    return %c0_i32 : i32
  }
  func.func @transform_3(%arg0: i32) -> i32 {
    %c0_i32 = arith.constant 0 : i32
    %c0_i32_0 = arith.constant 0 : i32
    return %c0_i32 : i32
  }
  func.func @transform_4(%arg0: i32) -> i32 {
    %c0_i32 = arith.constant 0 : i32
    %c0_i32_0 = arith.constant 0 : i32
    return %c0_i32 : i32
  }
  func.func @transform_5(%arg0: i32) -> (i32, i32, i32) {
    %c0_i32 = arith.constant 0 : i32
    %c0_i32_0 = arith.constant 0 : i32
    %c0_i32_1 = arith.constant 0 : i32
    %c0_i32_2 = arith.constant 0 : i32
    return %c0_i32, %c0_i32_0, %c0_i32_1 : i32, i32, i32
  }
  func.func @transform_6(%arg0: i32) -> (i32, i32) {
    %c0_i32 = arith.constant 0 : i32
    %c0_i32_0 = arith.constant 0 : i32
    %c0_i32_1 = arith.constant 0 : i32
    return %c0_i32, %c0_i32_0 : i32, i32
  }
  func.func @transform_7(%arg0: i32) -> (i32, i32) {
    %c0_i32 = arith.constant 0 : i32
    %c0_i32_0 = arith.constant 0 : i32
    %c0_i32_1 = arith.constant 0 : i32
    return %c0_i32, %c0_i32_0 : i32, i32
  }
  func.func @transform_8(%arg0: i32) -> (i32, i32) {
    %c0_i32 = arith.constant 0 : i32
    %c0_i32_0 = arith.constant 0 : i32
    %c0_i32_1 = arith.constant 0 : i32
    return %c0_i32, %c0_i32_0 : i32, i32
  }
  func.func @transform_9(%arg0: i32) -> (i32, i32, i32) {
    %c0_i32 = arith.constant 0 : i32
    %c0_i32_0 = arith.constant 0 : i32
    %c0_i32_1 = arith.constant 0 : i32
    return %arg0, %c0_i32, %c0_i32_0 : i32, i32, i32
  }
}

</mosaic_0001>

<bundles_post_ra>
// kernel: simple_cnn_forward.1
= control target key start
LH: loop header
LB: loop body
LE: loop exit
PB: predicated region body
PF: predicated region fallthrough
CT: control target
= control target key end

     0   :  { %s5063_s0 = inlined_call_operand.vmem [shape: f32[2,4,66,128], index: 0, kind: input, shape index: {}]   ;;  %s5064_s1 = inlined_call_operand.vmem [shape: f32[36], index: 1, kind: input, shape index: {}]   ;;  %s5065_s2 = inlined_call_operand.<no memory space> [shape: f32[1], index: 2, kind: input, shape index: {}]   ;;  %s5066_s3 = inlined_call_operand.vmem [shape: f32[25], index: 3, kind: input, shape index: {}]   ;;  %s5067_s4 = inlined_call_operand.<no memory space> [shape: f32[1], index: 4, kind: input, shape index: {}]   ;;  %s5068_s5 = inlined_call_operand.vmem [shape: f32[10,64,128], index: 5, kind: input, shape index: {}]   ;;  %s5069_s6 = inlined_call_operand.vmem [shape: f32[10,1], index: 6, kind: input, shape index: {}]   ;;  %s5070_s7 = inlined_call_operand.vmem [shape: f32[10,10], index: 7, kind: input, shape index: {}]   ;;  %s5071_s8 = inlined_call_operand.vmem [shape: f32[1,10], index: 8, kind: input, shape index: {}]   ;;  %s5072_s9 = inlined_call_operand.hbm [shape: f32[2,1,10], index: 9, kind: output, shape index: {}]  }
   0x1   :  { %5167 = sst [smem:[#allocation73_spill]] %s5063_s0 }
   0x2   :  { %5168 = sst [smem:[#allocation74_spill]] %s5064_s1 }
   0x3   :  { %5169 = sst [smem:[#allocation75_spill]] %s5066_s3 }
   0x4   :  { %14 = sst [smem:[#allocation3]] %s5065_s2 }
   0x5   :  { %15 = sst [smem:[#allocation4]] %s5067_s4 }
   0x6   :  { %16 = vsyncpa [#allocation7], 0 }
   0x7   :  { %17 = vsyncpa [#allocation9], 0 }
   0x8   :  { %18 = vsyncpa [#allocation6], 0 }
   0x9   :  { %20 = vsyncpa [#allocation6 + $0x1], 0  ;;  %s2737_s13 = smov 0   ;;  %s2739_s14 = smov 0  }
   0xa   :  { %s2741_s15 = smov 0   ;;  %s2743_s16 = smov 0  }
   0xb LB: > { %5170 = sst [smem:[#allocation14_spill]] %s2666_s15  ;;  %s2758_s2 = sadd.s32 4294967295, %s2670_s16   ;;  %s2670_s16 = sphi %s2743_s16, %s5370_s16   ;;  %s2666_s15 = sphi %s2741_s15, %s5372_s15   ;;  %s2662_s14 = sphi %s2739_s14, %s5374_s14   ;;  %s2658_s13 = sphi %s2737_s13, %s5373_s13  }
   0xc   : > { %s2273_s4 = sadd.s32 4294967294, %s2670_s16   ;;  %s2762_s17 = sadd.s32 1, %s2670_s16  }
   0xd   : > { %5171 = sst [smem:[#allocation15_spill]] %s2762_s17  ;;  %s227_s18 = sadd.s32 1, %s2666_s15 }
   0xe   : > { %s224_s19 = ssub.s32 %s2670_s16, %s2762_s17  ;;  %p237_p0 = scmp.ne.s32.totalorder %s2666_s15, %s2662_s14 }
   0xf   : > { %p225_p1 = scmp.eq.s32.totalorder %s224_s19, 0  ;;  %p238_p2 = scmp.eq.s32.totalorder %s2758_s2, 1 }
  0x10   : > { %p243_p3 = scmp.ne.s32.totalorder %s2662_s14, %s2658_s13  ;;  %p244_p4 = scmp.eq.s32.totalorder %s2273_s4, 1 }
  0x11   : > { %s2773_s20 = scalar_select %p225_p1, %s2666_s15, %s227_s18  }
  0x12   : > { %p2775_p5 = por %p238_p2, %p237_p0  ;;  %p2779_p6 = por %p244_p4, %p243_p3 }
  0x13   : > { %5172 = sst [smem:[#allocation16_spill]] %s2773_s20  ;;  %p2274_p7 = scmp.ge.s32.totalorder %s2670_s16, 1 }
  0x14   : > { %s5173_s21 = scalar_select %p2775_p5, 1, 0 }
  0x15   : > { %s5174_s22 = scalar_select %p2779_p6, 1, 0 }
  0x16   : > { %p251_p8 = scmp.lt.s32.totalorder %s2670_s16, 3  ;;  %p5073_p9 = scmp.eq.s32.totalorder %s2758_s2, 0 }
  0x17   : > { %s5176_s1 = sld [smem:[#allocation74_spill]]  ;;  %s5177_s3 = sld [smem:[#allocation75_spill]] }
  0x18   : > { %p2786_p10 = pnand %p2274_p7, %p251_p8 }
  0x1a   : > { %s5175_s23 = scalar_select %p2786_p10, 1, 0 }
  0x1b   : > { %p2499_p11 = pneg %p2786_p10 }
  0x1d   : > { %s264_s26 = sshll.u32 %s5176_s1, 4  ;;  %s278_s29 = sshll.u32 %s5177_s3, 4  ;;  %s265_s26 = int_to_ptr.vmem [resolvable:$true] %s264_s26  ;;  %s279_s29 = int_to_ptr.vmem [resolvable:$true] %s278_s29 }
  0x1e   : > { %p2800_p12 = pnand %p5073_p9, %p2499_p11  ;;  %s2570_s10 = scalar_lea.vmem %s265_s26, 16 }
  0x1f   : > { %p2571_p13 = scmp.ne.s32.totalorder %s265_s26, %s2570_s10  ;;  %p2578_p3 = scmp.lt.s32.totalorder %s265_s26, %s265_s26 }
  0x20   : > { %p2572_p0 = pneg %p2800_p12  ;;  %p2579_p4 = scmp.lt.s32.totalorder %s2570_s10, %s2570_s10 }
  0x22   : > { %p2573_p1 = pnand %p2572_p0, %p2571_p13  ;;  %p2580_p7 = por %p2579_p4, %p2578_p3 }
  0x24   : > { %p2574_p2 = pneg %p2573_p1 }
  0x26   : > { %p2581_p8 = pnand %p2580_p7, %p2574_p2 }
  0x28   : > { %2584 = shalt.err (!%p2581_p8)
}
  0x29   : > { %s2672_s11 = smov [#allocation5]   ;;  %s2585_s12 = scalar_lea.vmem %s279_s29, 16 }
  0x2a   : > { %2502 = dma.vmem_to_smem (!%p2800_p12), %s265_s26, 16, %s2672_s11, [#allocation7]  }
  0x2b   : > { %p2586_p11 = scmp.ne.s32.totalorder %s279_s29, %s2585_s12  ;;  %p2593_p5 = scmp.lt.s32.totalorder %s279_s29, %s279_s29 }
  0x2c   : > { %p2594_p10 = scmp.lt.s32.totalorder %s2585_s12, %s2585_s12 }
  0x2d   : > { %p2588_p9 = pnand %p2586_p11, %p2572_p0 }
  0x2e   : > { %p2595_p13 = por %p2594_p10, %p2593_p5 }
  0x2f   : > { %p2589_p6 = pneg %p2588_p9 }
  0x31   : > { %p2596_p1 = pnand %p2595_p13, %p2589_p6 }
  0x33   : > { %2599 = shalt.err (!%p2596_p1)
}
  0x34   : > { %s2673_s4 = smov [#allocation8]   ;;  %p5179_p2 = scmp.ne.s32.totalorder %s5175_s23, 0 }
  0x35   : > { %2505 = dma.vmem_to_smem (!%p2800_p12), %s279_s29, 16, %s2673_s4, [#allocation9]  }
  0x36   : > { %314 = sbr.rel (%p5179_p2) target bundleno = 825 (0x339), region = 56 }
  0x3d   : > { %p5180_p3 = scmp.eq.s32.totalorder %s2758_s2, 0 }
  0x3f   : > { %2645 = dma.done.wait (%p5180_p3), [#allocation7], 16   ;;  %p5181_p4 = pmov %p5180_p3 }
  0x40   : > { %p5182_p9 = pmov %p5180_p3 }
  0x41   : > { %2647 = vsyncadd (%p5181_p4), [#allocation7], 4294967280 }
  0x42   : > { %2649 = dma.done.wait (%p5182_p9), [#allocation9], 16   ;;  %p5183_p5 = pmov %p5180_p3 }
  0x44   : > { %2651 = vsyncadd (%p5183_p5), [#allocation9], 4294967280 }
  0x45   : > { %324 = sfence }
  0x46   : > { %p354_p6 = scmp.lt.s32.totalorder %s2758_s2, 1  ;;  %s369_s18 = sld [smem:[#allocation5]]  ;;  %vm2128_vm1 = vcmask 1040384   ;;  %vm2130_vm2 = vcmask 1041408   ;;  %vm2132_vm3 = vcmask 1042432   ;;  %vm2134_vm4 = vcmask 1043456  }
  0x47   : > { %s2282_s19 = sld [smem:[#allocation5 + $0x3]]  ;;  %s2283_s23 = sld [smem:[#allocation5 + $0x6]]  ;;  %vm2136_vm5 = vcmask 1044480   ;;  %vm2138_vm6 = vcmask 1045504   ;;  %vm2140_vm7 = vcmask 1046528   ;;  %vm2170_vm8 = vcmask 74752  }
  0x48   : > { %s355_s24 = scalar_select %p354_p6, %s2758_s2, 1  ;;  %vm2168_vm9 = vcmask 80896   ;;  %vm2181_vm10 = vcmask 73728  }
  0x49   : > { %s2292_s25 = sld [smem:[#allocation5 + $0x9]]  ;;  %s2301_s26 = sld [smem:[#allocation5 + $0xc]] }
  0x4a   : > { %s2488_s27 = smul.u32 288, %s355_s24  ;;  %s2310_s28 = sld [smem:[#allocation5 + $0xf]] }
  0x4b   : > { %s2822_s29 = sld [smem:[#allocation5 + $0x12]]  ;;  %s2824_s30 = sld [smem:[#allocation5 + $0x15]] }
  0x4c   : > { %s5184_s0 = sld [smem:[#allocation73_spill]]  ;;  %v2831_v0 = vstv %s369_s18  ;;  %s2833_s4 = sld [smem:[#allocation5 + $0x18]] }
  0x4d   : > { %v2841_v3 = vstv %s2282_s19  ;;  %s2846_s24 = sld [smem:[#allocation5 + $0x1b]]  ;;  %v2852_v7 = vstv %s2283_s23  ;;  %s2873_s18 = sld [smem:[#allocation5 + $0x1e]] }
  0x4e   : > { %s2875_s19 = sld [smem:[#allocation5 + $0x2]]  ;;  %s2880_s23 = sld [smem:[#allocation5 + $0x5]] }
  0x4f   : > { %v2859_v10 = vstv %s2292_s25  ;;  %v2864_v12 = vstv %s2301_s26  ;;  %s2882_s25 = sld [smem:[#allocation5 + $0x8]]  ;;  %s2910_s26 = sld [smem:[#allocation5 + $0xb]] }
  0x50   : > { %v2871_v16 = vstv %s2310_s28  ;;  %s2923_s28 = sld [smem:[#allocation5 + $0x21]]  ;;  %s2963_s10 = sld [smem:[#allocation5 + $0x17]] }
  0x51   : > { %v2901_v25 = vstv %s2822_s29  ;;  %v2915_v30 = vstv %s2824_s30  ;;  %s2941_s29 = sld [smem:[#allocation5 + $0x11]]  ;;  %s2945_s30 = sld [smem:[#allocation5 + $0x14]] }
  0x52   : > { %s2829_s12 = scalar_lea.vmem %s5184_s0, %s2488_s27  ;;  %s2912_s27 = sld [smem:[#allocation5 + $0xe]]  ;;  %v2921_v32 = vstv %s2833_s4 }
  0x53   : > { %v2836_v1 = vld [vmem:[%s2829_s12 + $0x10] sm:$0xff]  ;;  %v2855_v8 = vld [vmem:[%s2829_s12 + $0x58] sm:$0xff]  ;;  %v2878_v17 = vld [vmem:[%s2829_s12] sm:$0xff]  ;;  %v2934_v36 = vstv %s2846_s24  ;;  %s2986_s11 = sld [smem:[#allocation5 + $0x1a]]  ;;  %s2996_s4 = sld [smem:[#allocation5 + $0x1d]] }
  0x54   : > { %v2839_v2 = vld [vmem:[%s2829_s12 + $0x11] sm:$0xff]  ;;  %v373_v5 = vmul.f32 %v2831_v0, %v2836_v1  ;;  %v2862_v11 = vld [vmem:[%s2829_s12 + $0x59] sm:$0xff]  ;;  %v444_v14 = vmul.f32 %v2855_v8, %v2859_v10  ;;  %5186 = vst [vmem:[#allocation18_spill] sm:$0xff] %v2878_v17  ;;  %v2887_v20 = vld [vmem:[%s2829_s12 + $0x1] sm:$0xff]  ;;  %v371_v27 = vmul.f32 %v2831_v0, %v2878_v17  ;;  %v2956_v48 = vstv %s2873_s18  ;;  %s3017_s24 = sld [smem:[#allocation5 + $0x20]]  ;;  %s3035_s18 = sld [smem:[#allocation5 + $0x23]] }
  0x55   : > { %5185 = vst [vmem:[#allocation17_spill] sm:$0xff] %v2839_v2  ;;  %v2844_v4 = vld [vmem:[%s2829_s12 + $0x12] sm:$0xff]  ;;  %v391_v6 = vmul.f32 %v2841_v3, %v2839_v2  ;;  %v2869_v15 = vld [vmem:[%s2829_s12 + $0x5a] sm:$0xff]  ;;  %v470_v19 = vmul.f32 %v2862_v11, %v2864_v12  ;;  %5187 = vst [vmem:[#allocation19_spill] sm:$0xff] %v2887_v20  ;;  %v389_v28 = vmul.f32 %v2841_v3, %v2887_v20  ;;  %v2966_v52 = vstv %s2875_s19  ;;  %s5135_s19 = smov 1   ;;  %s3916_s0 = sld [smem:[#allocation8 + $0x4]] }
  0x56   : > { %v417_v9 = vmul.f32 %v2852_v7, %v2844_v4  ;;  %v2890_v21 = vld [vmem:[%s2829_s12 + $0x2] sm:$0xff]  ;;  %v496_v23 = vmul.f32 %v2869_v15, %v2871_v16  ;;  %v2939_v39 = vld [vmem:[%s2829_s12 + $0x4a] sm:$0xff]  ;;  %v2969_v53 = vstv %s2880_s23  ;;  %v2972_v54 = vstv %s2882_s25  ;;  %s5133_s23 = smov 127   ;;  %s3539_s25 = sld [smem:[#allocation5 + $0x1]] }
  0x57   : > { %v399_v13 = vadd.f32 %v391_v6, %v373_v5  ;;  %5188 = vst [vmem:[#allocation20_spill] sm:$0xff] %v2890_v21  ;;  %v2893_v22 = vld [vmem:[%s2829_s12 + $0x48] sm:$0xff]  ;;  %v2898_v24 = vld [vmem:[%s2829_s12 + $0xa0] sm:$0xff]  ;;  %v415_v33 = vmul.f32 %v2852_v7, %v2890_v21  ;;  %v397_v37 = vadd.f32 %v389_v28, %v371_v27  ;;  %5191 = vst [vmem:[#allocation23_spill] sm:$0xff] %v2939_v39  ;;  %v2991_v63 = vstv %s2910_s26  ;;  %s3545_s26 = sld [smem:[#allocation5 + $0x4]]  ;;  %s3918_s1 = sld [smem:[#allocation8 + $0x9]] }
  0x58   : > { %5189 = vst [vmem:[#allocation21_spill] sm:$0xff] %v2893_v22  ;;  %v2904_v26 = vld [vmem:[%s2829_s12 + $0xa1] sm:$0xff]  ;;  %v2928_v34 = vld [vmem:[%s2829_s12 + $0x49] sm:$0xff]  ;;  %v442_v38 = vmul.f32 %v2893_v22, %v2859_v10  ;;  %v523_v41 = vmul.f32 %v2898_v24, %v2901_v25  ;;  %v494_v49 = vmul.f32 %v2939_v39, %v2871_v16  ;;  %v2978_v57 = vld [vmem:[%s2829_s12 + $0x91] sm:$0xff]  ;;  %v918_v58 = vmul.f32 %v2966_v52, %v2878_v17  ;;  %s3930_s3 = sld [smem:[#allocation8 + $0x15]]  ;;  %s3946_s15 = sld [smem:[#allocation8 + $0x12]] }
  0x59   : > { %v425_v18 = vadd.f32 %v417_v9, %v399_v13  ;;  %v2918_v31 = vld [vmem:[%s2829_s12 + $0xa2] sm:$0xff]  ;;  %5190 = vst [vmem:[#allocation22_spill] sm:$0xff] %v2928_v34  ;;  %v549_v42 = vmul.f32 %v2904_v26, %v2915_v30  ;;  %v423_v44 = vadd.f32 %v415_v33, %v397_v37  ;;  %v468_v45 = vmul.f32 %v2928_v34, %v2864_v12  ;;  %v2961_v50 = vld [vmem:[%s2829_s12 + $0x90] sm:$0xff]  ;;  %s3932_s20 = sld [smem:[#allocation8 + $0xd]]  ;;  %s3948_s17 = sld [smem:[#allocation8 + $0x17]] }
  0x5a   : > { %v2931_v35 = vld [vmem:[%s2829_s12 + $0xe8] sm:$0xff]  ;;  %v575_v43 = vmul.f32 %v2918_v31, %v2921_v32  ;;  %5192 = vst [vmem:[#allocation24_spill] sm:$0xff] %v2961_v50  ;;  %5193 = vst [vmem:[#allocation25_spill] sm:$0xff] %v2978_v57  ;;  %v928_v59 = vmul.f32 %v2969_v53, %v2887_v20  ;;  %v946_v60 = vmul.f32 %v2972_v54, %v2890_v21  ;;  %v2994_v5 = vstv %s2912_s27  ;;  %v3085_v17 = vld [vmem:[%s2829_s12 + $0x52] sm:$0xff]  ;;  %s3570_s27 = sld [smem:[#allocation5 + $0x7]]  ;;  %p5368_p12 = scmp.ne.s32.totalorder %s5173_s21, 0 }
  0x5b   : > { %v452_v29 = vadd.f32 %v444_v14, %v425_v18  ;;  %v602_v47 = vmul.f32 %v2931_v35, %v2934_v36  ;;  %v450_v51 = vadd.f32 %v442_v38, %v423_v44  ;;  %v2975_v56 = vld [vmem:[%s2829_s12 + $0xe9] sm:$0xff]  ;;  %v521_v62 = vmul.f32 %v2961_v50, %v2901_v25  ;;  %v3005_v14 = vld [vmem:[%s2829_s12 + $0x92] sm:$0xff]  ;;  %5203 = vst [vmem:[#allocation35_spill] sm:$0xff] %v3085_v17 }
  0x5c   : > { %v2999_v9 = vld [vmem:[%s2829_s12 + $0xea] sm:$0xff]  ;;  %v3002_v13 = vstv %s2923_s28  ;;  %5195 = vst [vmem:[#allocation27_spill] sm:$0xff] %v3005_v14  ;;  %v2338_v18 = vld [vmem:[%s2829_s12 + $0xd8] sm:$0xff]  ;;  %v628_v27 = vmul.f32 %v2975_v56, %v2956_v48  ;;  %v3015_v33 = vstv %s2941_s29  ;;  %s3589_s28 = sld [smem:[#allocation5 + $0xa]]  ;;  %s2369_s29 = sld [smem:[#allocation5 + $0xd]] }
  0x5d   : > { %v478_v40 = vadd.f32 %v470_v19, %v452_v29  ;;  %v476_v61 = vadd.f32 %v468_v45, %v450_v51  ;;  %5194 = vst [vmem:[#allocation26_spill] sm:$0xff] %v2999_v9  ;;  %v936_v19 = vadd.f32 %v928_v59, %v918_v58  ;;  %v547_v29 = vmul.f32 %v2978_v57, %v2915_v30  ;;  %v3020_v38 = vld [vmem:[%s2829_s12 + $0xd9] sm:$0xff]  ;;  %v3028_v44 = vld [vmem:[%s2829_s12 + $0x8] sm:$0xff] }
  0x5e   : > { %5196 = vst [vmem:[#allocation28_spill] sm:$0xff] %v3020_v38  ;;  %5197 = vst [vmem:[#allocation29_spill] sm:$0xff] %v3028_v44  ;;  %v654_v45 = vmul.f32 %v2999_v9, %v3002_v13  ;;  %v3038_v51 = vld [vmem:[%s2829_s12 + $0x9] sm:$0xff]  ;;  %v1000_v59 = vmul.f32 %v2939_v39, %v3015_v33  ;;  %v3061_v39 = vstv %s2986_s11  ;;  %s2372_s11 = sld [smem:[#allocation5 + $0x16]] }
  0x5f   : > { %v504_v46 = vadd.f32 %v496_v23, %v478_v40  ;;  %v964_v23 = vmul.f32 %v2893_v22, %v2991_v63  ;;  %v502_v28 = vadd.f32 %v494_v49, %v476_v61  ;;  %v954_v40 = vadd.f32 %v946_v60, %v936_v19  ;;  %5198 = vst [vmem:[#allocation30_spill] sm:$0xff] %v3038_v51  ;;  %v3046_v61 = vld [vmem:[%s2829_s12 + $0xa] sm:$0xff] }
  0x60   : > { %v600_v49 = vmul.f32 %v2338_v18, %v2934_v36  ;;  %v3043_v60 = vstv %s2963_s10  ;;  %5199 = vst [vmem:[#allocation31_spill] sm:$0xff] %v3046_v61  ;;  %v416_v22 = vmul.f32 %v2852_v7, %v3046_v61  ;;  %s2371_s10 = sld [smem:[#allocation5 + $0x13]] }
  0x61   : > { %v531_v55 = vadd.f32 %v523_v41, %v504_v46  ;;  %v982_v41 = vmul.f32 %v2928_v34, %v2994_v5  ;;  %v529_v46 = vadd.f32 %v521_v62, %v502_v28  ;;  %v972_v58 = vadd.f32 %v964_v23, %v954_v40  ;;  %v3055_v23 = vld [vmem:[%s2829_s12 + $0x50] sm:$0xff] }
  0x62   : > { %5200 = vst [vmem:[#allocation32_spill] sm:$0xff] %v3055_v23  ;;  %v3068_v34 = vstv %s2996_s4  ;;  %v443_v21 = vmul.f32 %v3055_v23, %v2859_v10  ;;  %s2373_s4 = sld [smem:[#allocation5 + $0x19]] }
  0x63   : > { %v557_v6 = vadd.f32 %v549_v42, %v531_v55  ;;  %v3025_v42 = vstv %s2945_s30  ;;  %v555_v62 = vadd.f32 %v547_v29, %v529_v46  ;;  %v990_v40 = vadd.f32 %v982_v41, %v972_v58  ;;  %s3610_s30 = sld [smem:[#allocation5 + $0x10]] }
  0x64   : > { %v1018_v19 = vmul.f32 %v2961_v50, %v3025_v42  ;;  %v390_v29 = vmul.f32 %v2841_v3, %v3038_v51  ;;  %v1036_v50 = vmul.f32 %v2978_v57, %v3043_v60  ;;  %v3082_v57 = vstv %s3017_s24  ;;  %s2374_s24 = sld [smem:[#allocation5 + $0x1c]] }
  0x65   : > { %v583_v37 = vadd.f32 %v575_v43, %v557_v6  ;;  %v573_v43 = vmul.f32 %v3005_v14, %v2921_v32  ;;  %v626_v6 = vmul.f32 %v3020_v38, %v2956_v48  ;;  %v1008_v41 = vadd.f32 %v1000_v59, %v990_v40 }
  0x66   : > { %v1072_v59 = vmul.f32 %v2338_v18, %v3068_v34  ;;  %v3092_v40 = vstv %s3035_s18  ;;  %v495_v18 = vmul.f32 %v3085_v17, %v2871_v16  ;;  %s2375_s18 = sld [smem:[#allocation5 + $0x1f]] }
  0x67   : > { %v610_v55 = vadd.f32 %v602_v47, %v583_v37  ;;  %v372_v47 = vmul.f32 %v2831_v0, %v3028_v44  ;;  %v3058_v37 = vld [vmem:[%s2829_s12 + $0xda] sm:$0xff]  ;;  %v581_v46 = vadd.f32 %v573_v43, %v555_v62  ;;  %v1054_v62 = vmul.f32 %v3005_v14, %v3061_v39 }
  0x68   : > { %5201 = vst [vmem:[#allocation33_spill] sm:$0xff] %v3058_v37  ;;  %v652_v43 = vmul.f32 %v3058_v37, %v3002_v13  ;;  %v929_v14 = vmul.f32 %v2969_v53, %v3038_v51 }
  0x69   : > { %v636_v28 = vadd.f32 %v628_v27, %v610_v55  ;;  %v3073_v27 = vld [vmem:[%s2829_s12 + $0x51] sm:$0xff]  ;;  %v398_v58 = vadd.f32 %v390_v29, %v372_v47  ;;  %v608_v20 = vadd.f32 %v600_v49, %v581_v46  ;;  %v919_v46 = vmul.f32 %v2966_v52, %v3028_v44  ;;  %v3114_v44 = vld [vmem:[%s2829_s12 + $0xe0] sm:$0xff] }
  0x6a   : > { %5202 = vst [vmem:[#allocation34_spill] sm:$0xff] %v3073_v27  ;;  %v469_v47 = vmul.f32 %v3073_v27, %v2864_v12  ;;  %v3095_v29 = vld [vmem:[%s2829_s12 + $0x98] sm:$0xff]  ;;  %5207 = vst [vmem:[#allocation39_spill] sm:$0xff] %v3114_v44 }
  0x6b   : > { %v662_v55 = vadd.f32 %v654_v45, %v636_v28  ;;  %v1026_v45 = vadd.f32 %v1018_v19, %v1008_v41  ;;  %v424_v49 = vadd.f32 %v416_v22, %v398_v58  ;;  %v634_v28 = vadd.f32 %v626_v6, %v608_v20  ;;  %5204 = vst [vmem:[#allocation36_spill] sm:$0xff] %v3095_v29  ;;  %v3104_v22 = vld [vmem:[%s2829_s12 + $0x99] sm:$0xff] }
  0x6c   : > { %5205 = vst [vmem:[#allocation37_spill] sm:$0xff] %v3104_v22  ;;  %v3107_v20 = vld [vmem:[%s2829_s12 + $0x9a] sm:$0xff]  ;;  %v947_v6 = vmul.f32 %v2972_v54, %v3046_v61  ;;  %v1090_v58 = vmul.f32 %v3020_v38, %v3082_v57  ;;  %v522_v9 = vmul.f32 %v3095_v29, %v2901_v25 }
  0x6d   : > { %680 = vrot.lane.b32.xlu1 %v662_v55, %s5135_s19  ;;  %v1044_v55 = vadd.f32 %v1036_v50, %v1026_v45  ;;  %v451_v19 = vadd.f32 %v443_v21, %v424_v49  ;;  %5206 = vst [vmem:[#allocation38_spill] sm:$0xff] %v3107_v20  ;;  %v660_v41 = vadd.f32 %v652_v43, %v634_v28  ;;  %v3148_v61 = vld [vmem:[%s2829_s12 + $0x18] sm:$0xff] }
  0x6e   : > { %v937_v50 = vadd.f32 %v929_v14, %v919_v46  ;;  %v965_v21 = vmul.f32 %v3055_v23, %v2991_v63  ;;  %v1108_v49 = vmul.f32 %v3058_v37, %v3092_v40  ;;  %v548_v43 = vmul.f32 %v3104_v22, %v2915_v30  ;;  %v2348_v14 = vld [vmem:[%s2829_s12 + $0xe1] sm:$0xff] }
  0x6f   : > { %v1062_v45 = vadd.f32 %v1054_v62, %v1044_v55  ;;  %v477_v51 = vadd.f32 %v469_v47, %v451_v19  ;;  %676 = vrot.lane.b32.xlu0 %v660_v41, %s5135_s19  ;;  %v574_v28 = vmul.f32 %v3107_v20, %v2921_v32  ;;  %v2357_v46 = vld [vmem:[%s2829_s12 + $0xe2] sm:$0xff]  ;;  %v983_v62 = vmul.f32 %v3073_v27, %v2994_v5 }
  0x70   : > { %v955_v38 = vadd.f32 %v947_v6, %v937_v50  ;;  %v601_v19 = vmul.f32 %v3114_v44, %v2934_v36  ;;  %v920_v41 = vmul.f32 %v2966_v52, %v2836_v1  ;;  %v1001_v23 = vmul.f32 %v3085_v17, %v3015_v33 }
  0x71   : > { %v1080_v55 = vadd.f32 %v1072_v59, %v1062_v45  ;;  %v503_v47 = vadd.f32 %v495_v18, %v477_v51  ;;  %v930_v6 = vmul.f32 %v2969_v53, %v2839_v2  ;;  %v948_v59 = vmul.f32 %v2972_v54, %v2844_v4  ;;  %v3151_v2 = vld [vmem:[%s2829_s12 + $0x19] sm:$0xff] }
  0x72   : > { %v973_v37 = vadd.f32 %v965_v21, %v955_v38  ;;  %v627_v18 = vmul.f32 %v2348_v14, %v2956_v48  ;;  %v653_v45 = vmul.f32 %v2357_v46, %v3002_v13  ;;  %v1019_v38 = vmul.f32 %v3095_v29, %v3025_v42  ;;  %v3154_v4 = vld [vmem:[%s2829_s12 + $0x1a] sm:$0xff] }
  0x73   : > { %v1098_v50 = vadd.f32 %v1090_v58, %v1080_v55  ;;  %v530_v51 = vadd.f32 %v522_v9, %v503_v47  ;;  %v938_v21 = vadd.f32 %v930_v6, %v920_v41  ;;  %v966_v17 = vmul.f32 %v2855_v8, %v2991_v63  ;;  %v3165_v6 = vld [vmem:[%s2829_s12 + $0x60] sm:$0xff] }
  0x74   : > { %v991_v27 = vadd.f32 %v983_v62, %v973_v37  ;;  %v1037_v55 = vmul.f32 %v3104_v22, %v3043_v60  ;;  %v1055_v37 = vmul.f32 %v3107_v20, %v3061_v39  ;;  %v1073_v47 = vmul.f32 %v3114_v44, %v3068_v34  ;;  %5208 = vst [vmem:[#allocation40_spill] sm:$0xff] %v3165_v6  ;;  %v3184_v20 = vld [vmem:[%s2829_s12 + $0x62] sm:$0xff] }
  0x75   : > { %v1116_v9 = vadd.f32 %v1108_v49, %v1098_v50  ;;  %v556_v58 = vadd.f32 %v548_v43, %v530_v51  ;;  %v956_v8 = vadd.f32 %v948_v59, %v938_v21  ;;  %v984_v41 = vmul.f32 %v2862_v11, %v2994_v5  ;;  %v3178_v21 = vld [vmem:[%s2829_s12 + $0x61] sm:$0xff]  ;;  %5210 = vst [vmem:[#allocation42_spill] sm:$0xff] %v3184_v20 }
  0x76   : > { %v1009_v62 = vadd.f32 %v1001_v23, %v991_v27  ;;  %v374_v43 = vmul.f32 %v2831_v0, %v3148_v61  ;;  %v392_v23 = vmul.f32 %v2841_v3, %v3151_v2  ;;  %v418_v27 = vmul.f32 %v2852_v7, %v3154_v4  ;;  %5209 = vst [vmem:[#allocation41_spill] sm:$0xff] %v3178_v21 }
  0x77   : > { %1132 = vrot.lane.b32.xlu1 %v1116_v9, %s5133_s23  ;;  %v582_v49 = vadd.f32 %v574_v28, %v556_v58  ;;  %v1091_v50 = vmul.f32 %v2348_v14, %v3082_v57  ;;  %v974_v11 = vadd.f32 %v966_v17, %v956_v8  ;;  %v1002_v51 = vmul.f32 %v2869_v15, %v3015_v33 }
  0x78   : > { %v1027_v59 = vadd.f32 %v1019_v38, %v1009_v62  ;;  %v1109_v28 = vmul.f32 %v2357_v46, %v3092_v40  ;;  %v400_v58 = vadd.f32 %v392_v23, %v374_v43  ;;  %v445_v44 = vmul.f32 %v3165_v6, %v2859_v10  ;;  %v3202_v23 = vld [vmem:[%s2829_s12 + $0xa9] sm:$0xff] }
  0x79   : > { %v609_v9 = vadd.f32 %v601_v19, %v582_v49  ;;  %v992_v62 = vadd.f32 %v984_v41, %v974_v11  ;;  %v1020_v17 = vmul.f32 %v2898_v24, %v3025_v42  ;;  %v1038_v15 = vmul.f32 %v2904_v26, %v3043_v60  ;;  %v3197_v41 = vld [vmem:[%s2829_s12 + $0xa8] sm:$0xff]  ;;  %5212 = vst [vmem:[#allocation44_spill] sm:$0xff] %v3202_v23 }
  0x7a   : > { %v1045_v38 = vadd.f32 %v1037_v55, %v1027_v59  ;;  %v1056_v19 = vmul.f32 %v2918_v31, %v3061_v39  ;;  %v426_v46 = vadd.f32 %v418_v27, %v400_v58  ;;  %v471_v8 = vmul.f32 %v3178_v21, %v2864_v12  ;;  %5211 = vst [vmem:[#allocation43_spill] sm:$0xff] %v3197_v41 }
  0x7b   : > { %v635_v14 = vadd.f32 %v627_v18, %v609_v9  ;;  %v1010_v43 = vadd.f32 %v1002_v51, %v992_v62  ;;  %v497_v55 = vmul.f32 %v3184_v20, %v2871_v16  ;;  %v921_v24 = vmul.f32 %v2966_v52, %v3148_v61 }
  0x7c   : > { %v1063_v49 = vadd.f32 %v1055_v37, %v1045_v38  ;;  %v453_v18 = vadd.f32 %v445_v44, %v426_v46  ;;  %v931_v31 = vmul.f32 %v2969_v53, %v3151_v2  ;;  %v949_v37 = vmul.f32 %v2972_v54, %v3154_v4  ;;  %v3213_v44 = vld [vmem:[%s2829_s12 + $0xaa] sm:$0xff]  ;;  %v3221_v38 = vld [vmem:[%s2829_s12 + $0x20] sm:$0xff] }
  0x7d   : > { %v661_v26 = vadd.f32 %v653_v45, %v635_v14  ;;  %v1028_v59 = vadd.f32 %v1020_v17, %v1010_v43  ;;  %v1074_v11 = vmul.f32 %v2931_v35, %v3068_v34  ;;  %v1092_v51 = vmul.f32 %v2975_v56, %v3082_v57  ;;  %5213 = vst [vmem:[#allocation45_spill] sm:$0xff] %v3213_v44  ;;  %v5214_v56 = vld [vmem:[#allocation26_spill] sm:$0xff] }
  0x7e   : > { %v1081_v27 = vadd.f32 %v1073_v47, %v1063_v49  ;;  %v479_v45 = vadd.f32 %v471_v8, %v453_v18  ;;  %v524_v9 = vmul.f32 %v3197_v41, %v2901_v25  ;;  %v939_v58 = vadd.f32 %v931_v31, %v921_v24  ;;  %v3228_v46 = vld [vmem:[%s2829_s12 + $0x21] sm:$0xff]  ;;  %v3236_v24 = vld [vmem:[%s2829_s12 + $0xf0] sm:$0xff] }
  0x7f   : > { %678 = vrot.lane.b32.xlu0 %v661_v26, %s5135_s19  ;;  %v967_v47 = vmul.f32 %v3165_v6, %v2991_v63  ;;  %v1046_v62 = vadd.f32 %v1038_v15, %v1028_v59  ;;  %v1110_v17 = vmul.f32 %v5214_v56, %v3092_v40  ;;  %v550_v14 = vmul.f32 %v3202_v23, %v2915_v30  ;;  %v3231_v8 = vld [vmem:[%s2829_s12 + $0x22] sm:$0xff]  ;;  %v3251_v56 = vld [vmem:[%s2829_s12 + $0xf2] sm:$0xff] }
  0x80   : > { %v1099_v35 = vadd.f32 %v1091_v50, %v1081_v27  ;;  %5215 = vst [vmem:[#allocation26_spill] sm:$0xff] %v3228_v46  ;;  %5216 = vst [vmem:[#allocation46_spill] sm:$0xff] %v3231_v8  ;;  %v505_v49 = vadd.f32 %v497_v55, %v479_v45  ;;  %v576_v43 = vmul.f32 %v3213_v44, %v2921_v32  ;;  %v3239_v50 = vld [vmem:[%s2829_s12 + $0xf1] sm:$0xff]  ;;  %v3248_v59 = vld [vmem:[%s2829_s12 + $0x68] sm:$0xff] }
  0x81   : > { %5217 = vst [vmem:[#allocation47_spill] sm:$0xff] %v3236_v24  ;;  %5218 = vst [vmem:[#allocation48_spill] sm:$0xff] %v3239_v50  ;;  %v957_v15 = vadd.f32 %v949_v37, %v939_v58  ;;  %v985_v26 = vmul.f32 %v3178_v21, %v2994_v5  ;;  %v1064_v31 = vadd.f32 %v1056_v19, %v1046_v62  ;;  %v3265_v62 = vld [vmem:[%s2829_s12 + $0x69] sm:$0xff] }
  0x82   : > { %v1117_v18 = vadd.f32 %v1109_v28, %v1099_v35  ;;  %v1003_v27 = vmul.f32 %v3184_v20, %v3015_v33  ;;  %v375_v55 = vmul.f32 %v2831_v0, %v3221_v38  ;;  %5219 = vst [vmem:[#allocation49_spill] sm:$0xff] %v3248_v59  ;;  %v532_v45 = vadd.f32 %v524_v9, %v505_v49 }
  0x83   : > { %5220 = vst [vmem:[#allocation50_spill] sm:$0xff] %v3251_v56  ;;  %v975_v22 = vadd.f32 %v967_v47, %v957_v15  ;;  %v393_v37 = vmul.f32 %v2841_v3, %v3228_v46  ;;  %v419_v28 = vmul.f32 %v2852_v7, %v3231_v8  ;;  %v1082_v19 = vadd.f32 %v1074_v11, %v1064_v31 }
  0x84   : > { %1134 = vrot.lane.b32.xlu0 %v1117_v18, %s5133_s23  ;;  %v603_v58 = vmul.f32 %v3236_v24, %v2934_v36  ;;  %v629_v35 = vmul.f32 %v3239_v50, %v2956_v48  ;;  %v1021_v9 = vmul.f32 %v3197_v41, %v3025_v42  ;;  %5221 = vst [vmem:[#allocation51_spill] sm:$0xff] %v3265_v62  ;;  %v3270_v18 = vld [vmem:[%s2829_s12 + $0x6a] sm:$0xff] }
  0x85   : > { %v558_v47 = vadd.f32 %v550_v14, %v532_v45  ;;  %v993_v49 = vadd.f32 %v985_v26, %v975_v22  ;;  %v401_v15 = vadd.f32 %v393_v37, %v375_v55  ;;  %v446_v20 = vmul.f32 %v3248_v59, %v2859_v10  ;;  %5222 = vst [vmem:[#allocation52_spill] sm:$0xff] %v3270_v18  ;;  %v3283_v45 = vld [vmem:[%s2829_s12 + $0xb0] sm:$0xff] }
  0x86   : > { %v1100_v11 = vadd.f32 %v1092_v51, %v1082_v19  ;;  %v655_v31 = vmul.f32 %v3251_v56, %v3002_v13  ;;  %v1039_v21 = vmul.f32 %v3202_v23, %v3043_v60  ;;  %v1057_v41 = vmul.f32 %v3213_v44, %v3061_v39  ;;  %5223 = vst [vmem:[#allocation53_spill] sm:$0xff] %v3283_v45  ;;  %v3327_v23 = vld [vmem:[%s2829_s12 + $0x70] sm:$0xff] }
  0x87   : > { %v584_v29 = vadd.f32 %v576_v43, %v558_v47  ;;  %v1011_v14 = vadd.f32 %v1003_v27, %v993_v49  ;;  %v427_v22 = vadd.f32 %v419_v28, %v401_v15  ;;  %v472_v26 = vmul.f32 %v3265_v62, %v2864_v12  ;;  %v3290_v47 = vld [vmem:[%s2829_s12 + $0xb1] sm:$0xff]  ;;  %5230 = vst [vmem:[#allocation60_spill] sm:$0xff] %v3327_v23 }
  0x88   : > { %v1118_v55 = vadd.f32 %v1110_v17, %v1100_v11  ;;  %v498_v51 = vmul.f32 %v3270_v18, %v2871_v16  ;;  %v922_v37 = vmul.f32 %v2966_v52, %v3221_v38  ;;  %v932_v19 = vmul.f32 %v2969_v53, %v3228_v46  ;;  %5224 = vst [vmem:[#allocation54_spill] sm:$0xff] %v3290_v47  ;;  %v3300_v11 = vld [vmem:[%s2829_s12 + $0xb2] sm:$0xff] }
  0x89   : > { %v611_v43 = vadd.f32 %v603_v58, %v584_v29  ;;  %v1029_v27 = vadd.f32 %v1021_v9, %v1011_v14  ;;  %v454_v28 = vadd.f32 %v446_v20, %v427_v22  ;;  %v950_v17 = vmul.f32 %v2972_v54, %v3231_v8  ;;  %5225 = vst [vmem:[#allocation55_spill] sm:$0xff] %v3300_v11 }
  0x8a   : > { %1136 = vrot.lane.b32.xlu0 %v1118_v55, %s5133_s23  ;;  %v1075_v49 = vmul.f32 %v3236_v24, %v3068_v34  ;;  %v1093_v15 = vmul.f32 %v3239_v50, %v3082_v57  ;;  %v940_v29 = vadd.f32 %v932_v19, %v922_v37  ;;  %v968_v20 = vmul.f32 %v3248_v59, %v2991_v63  ;;  %v3307_v55 = vld [vmem:[%s2829_s12 + $0x28] sm:$0xff]  ;;  %v3317_v19 = vld [vmem:[%s2829_s12 + $0xf8] sm:$0xff] }
  0x8b   : > { %v637_v58 = vadd.f32 %v629_v35, %v611_v43  ;;  %v1047_v9 = vadd.f32 %v1039_v21, %v1029_v27  ;;  %v480_v14 = vadd.f32 %v472_v26, %v454_v28  ;;  %v525_v22 = vmul.f32 %v3283_v45, %v2901_v25  ;;  %5226 = vst [vmem:[#allocation56_spill] sm:$0xff] %v3307_v55  ;;  %v3310_v24 = vld [vmem:[%s2829_s12 + $0x29] sm:$0xff]  ;;  %v3333_v59 = vld [vmem:[%s2829_s12 + $0xfa] sm:$0xff] }
  0x8c   : > { %5227 = vst [vmem:[#allocation57_spill] sm:$0xff] %v3310_v24  ;;  %v1111_v50 = vmul.f32 %v3251_v56, %v3092_v40  ;;  %v551_v37 = vmul.f32 %v3290_v47, %v2915_v30  ;;  %5228 = vst [vmem:[#allocation58_spill] sm:$0xff] %v3317_v19  ;;  %v958_v35 = vadd.f32 %v950_v17, %v940_v29  ;;  %v3322_v26 = vld [vmem:[%s2829_s12 + $0x2a] sm:$0xff]  ;;  %v3330_v56 = vld [vmem:[%s2829_s12 + $0xf9] sm:$0xff] }
  0x8d   : > { %v986_v21 = vmul.f32 %v3265_v62, %v2994_v5  ;;  %5229 = vst [vmem:[#allocation59_spill] sm:$0xff] %v3322_v26  ;;  %v663_v43 = vadd.f32 %v655_v31, %v637_v58  ;;  %v1065_v27 = vadd.f32 %v1057_v41, %v1047_v9  ;;  %v506_v28 = vadd.f32 %v498_v51, %v480_v14  ;;  %v3347_v14 = vld [vmem:[%s2829_s12 + $0x71] sm:$0xff] }
  0x8e   : > { %v577_v44 = vmul.f32 %v3300_v11, %v2921_v32  ;;  %5231 = vst [vmem:[#allocation61_spill] sm:$0xff] %v3330_v56  ;;  %5232 = vst [vmem:[#allocation62_spill] sm:$0xff] %v3333_v59  ;;  %v976_v17 = vadd.f32 %v968_v20, %v958_v35  ;;  %v1004_v29 = vmul.f32 %v3270_v18, %v3015_v33 }
  0x8f   : > { %v376_v31 = vmul.f32 %v2831_v0, %v3307_v55  ;;  %v394_v41 = vmul.f32 %v2841_v3, %v3310_v24  ;;  %682 = vrot.lane.b32.xlu1 %v663_v43, %s5135_s19  ;;  %v1083_v51 = vadd.f32 %v1075_v49, %v1065_v27  ;;  %v533_v58 = vadd.f32 %v525_v22, %v506_v28  ;;  %v3354_v43 = vld [vmem:[%s2829_s12 + $0x72] sm:$0xff] }
  0x90   : > { %v604_v9 = vmul.f32 %v3317_v19, %v2934_v36  ;;  %v420_v20 = vmul.f32 %v2852_v7, %v3322_v26  ;;  %5233 = vst [vmem:[#allocation63_spill] sm:$0xff] %v3347_v14  ;;  %v994_v35 = vadd.f32 %v986_v21, %v976_v17  ;;  %v1022_v18 = vmul.f32 %v3283_v45, %v3025_v42 }
  0x91   : > { %v402_v62 = vadd.f32 %v394_v41, %v376_v31  ;;  %v447_v6 = vmul.f32 %v3327_v23, %v2859_v10  ;;  %5234 = vst [vmem:[#allocation64_spill] sm:$0xff] %v3354_v43  ;;  %v1101_v49 = vadd.f32 %v1093_v15, %v1083_v51  ;;  %v559_v22 = vadd.f32 %v551_v37, %v533_v58  ;;  %v3365_v41 = vld [vmem:[%s2829_s12 + $0xb8] sm:$0xff] }
  0x92   : > { %v630_v27 = vmul.f32 %v3330_v56, %v2956_v48  ;;  %v656_v28 = vmul.f32 %v3333_v59, %v3002_v13  ;;  %v1012_v8 = vadd.f32 %v1004_v29, %v994_v35  ;;  %v1040_v21 = vmul.f32 %v3290_v47, %v3043_v60  ;;  %5235 = vst [vmem:[#allocation65_spill] sm:$0xff] %v3365_v41  ;;  %v3372_v35 = vld [vmem:[%s2829_s12 + $0xb9] sm:$0xff] }
  0x93   : > { %v428_v17 = vadd.f32 %v420_v20, %v402_v62  ;;  %v473_v31 = vmul.f32 %v3347_v14, %v2864_v12  ;;  %v1119_v45 = vadd.f32 %v1111_v50, %v1101_v49  ;;  %v585_v15 = vadd.f32 %v577_v44, %v559_v22  ;;  %5236 = vst [vmem:[#allocation66_spill] sm:$0xff] %v3372_v35  ;;  %v3386_v22 = vld [vmem:[%s2829_s12 + $0xba] sm:$0xff] }
  0x94   : > { %v1058_v37 = vmul.f32 %v3300_v11, %v3061_v39  ;;  %v499_v51 = vmul.f32 %v3354_v43, %v2871_v16  ;;  %v1030_v29 = vadd.f32 %v1022_v18, %v1012_v8  ;;  %v923_v62 = vmul.f32 %v2966_v52, %v3307_v55  ;;  %5237 = vst [vmem:[#allocation67_spill] sm:$0xff] %v3386_v22 }
  0x95   : > { %v455_v58 = vadd.f32 %v447_v6, %v428_v17  ;;  %v933_v20 = vmul.f32 %v2969_v53, %v3310_v24  ;;  %1138 = vrot.lane.b32.xlu0 %v1119_v45, %s5133_s23  ;;  %v612_v44 = vadd.f32 %v604_v9, %v585_v15  ;;  %v1076_v50 = vmul.f32 %v3317_v19, %v3068_v34  ;;  %v3391_v9 = vld [vmem:[%s2829_s12 + $0x30] sm:$0xff] }
  0x96   : > { %v526_v8 = vmul.f32 %v3365_v41, %v2901_v25  ;;  %v951_v6 = vmul.f32 %v2972_v54, %v3322_v26  ;;  %v1048_v18 = vadd.f32 %v1040_v21, %v1030_v29  ;;  %v969_v45 = vmul.f32 %v3327_v23, %v2991_v63  ;;  %v3440_v26 = vld [vmem:[%s2829_s12 + $0x7a] sm:$0xff] }
  0x97   : > { %v481_v49 = vadd.f32 %v473_v31, %v455_v58  ;;  %v941_v17 = vadd.f32 %v933_v20, %v923_v62  ;;  %v638_v15 = vadd.f32 %v630_v27, %v612_v44  ;;  %v1094_v19 = vmul.f32 %v3330_v56, %v3082_v57  ;;  %v3400_v31 = vld [vmem:[%s2829_s12 + $0x31] sm:$0xff]  ;;  %v3403_v62 = vld [vmem:[%s2829_s12 + $0x100] sm:$0xff]  ;;  %5242 = vst [vmem:[#allocation72_spill] sm:$0xff] %v3440_v26 }
  0x98   : > { %v1112_v11 = vmul.f32 %v3333_v59, %v3092_v40  ;;  %v552_v21 = vmul.f32 %v3372_v35, %v2915_v30  ;;  %v1066_v29 = vadd.f32 %v1058_v37, %v1048_v18  ;;  %5238 = vst [vmem:[#allocation68_spill] sm:$0xff] %v3403_v62  ;;  %v987_v27 = vmul.f32 %v3347_v14, %v2994_v5  ;;  %v3408_v44 = vld [vmem:[%s2829_s12 + $0x32] sm:$0xff]  ;;  %v3420_v18 = vld [vmem:[%s2829_s12 + $0x101] sm:$0xff] }
  0x99   : > { %v507_v58 = vadd.f32 %v499_v51, %v481_v49  ;;  %v959_v20 = vadd.f32 %v951_v6, %v941_v17  ;;  %v3411_v56 = vld [vmem:[%s2829_s12 + $0x78] sm:$0xff]  ;;  %v664_v59 = vadd.f32 %v656_v28, %v638_v15  ;;  %v578_v47 = vmul.f32 %v3386_v22, %v2921_v32  ;;  %5240 = vst [vmem:[#allocation70_spill] sm:$0xff] %v3420_v18  ;;  %v3423_v49 = vld [vmem:[%s2829_s12 + $0x102] sm:$0xff] }
  0x9a   : > { %5239 = vst [vmem:[#allocation69_spill] sm:$0xff] %v3411_v56  ;;  %v1005_v23 = vmul.f32 %v3354_v43, %v3015_v33  ;;  %v377_v37 = vmul.f32 %v2831_v0, %v3391_v9  ;;  %v1084_v51 = vadd.f32 %v1076_v50, %v1066_v29  ;;  %5241 = vst [vmem:[#allocation71_spill] sm:$0xff] %v3423_v49  ;;  %v3428_v15 = vld [vmem:[%s2829_s12 + $0x79] sm:$0xff] }
  0x9b   : > { %v534_v6 = vadd.f32 %v526_v8, %v507_v58  ;;  %v977_v17 = vadd.f32 %v969_v45, %v959_v20  ;;  %v395_v28 = vmul.f32 %v2841_v3, %v3400_v31  ;;  %684 = vrot.lane.b32.xlu1 %v664_v59, %s5135_s19  ;;  %v605_v43 = vmul.f32 %v3403_v62, %v2934_v36 }
  0x9c   : > { %v1023_v50 = vmul.f32 %v3365_v41, %v3025_v42  ;;  %v421_v8 = vmul.f32 %v2852_v7, %v3408_v44  ;;  %v448_v29 = vmul.f32 %v3411_v56, %v2859_v10  ;;  %v1102_v45 = vadd.f32 %v1094_v19, %v1084_v51 }
  0x9d   : > { %v560_v58 = vadd.f32 %v552_v21, %v534_v6  ;;  %v995_v20 = vadd.f32 %v987_v27, %v977_v17  ;;  %v403_v14 = vadd.f32 %v395_v28, %v377_v37  ;;  %v631_v59 = vmul.f32 %v3420_v18, %v2956_v48  ;;  %v3455_v6 = vld [vmem:[%s2829_s12 + $0xc0] sm:$0xff] }
  0x9e   : > { %v657_v24 = vmul.f32 %v3423_v49, %v3002_v13  ;;  %v1041_v41 = vmul.f32 %v3372_v35, %v3043_v60  ;;  %v474_v55 = vmul.f32 %v3428_v15, %v2864_v12  ;;  %v1120_v46 = vadd.f32 %v1112_v11, %v1102_v45  ;;  %v3499_v35 = vld [vmem:[%s2829_s12 + $0x80] sm:$0xff] }
  0x9f   : > { %v586_v19 = vadd.f32 %v578_v47, %v560_v58  ;;  %v1013_v21 = vadd.f32 %v1005_v23, %v995_v20  ;;  %v429_v27 = vadd.f32 %v421_v8, %v403_v14  ;;  %v1059_v37 = vmul.f32 %v3386_v22, %v3061_v39  ;;  %v3463_v14 = vld [vmem:[%s2829_s12 + $0xc1] sm:$0xff] }
  0xa0   : > { %v500_v51 = vmul.f32 %v3440_v26, %v2871_v16  ;;  %v924_v17 = vmul.f32 %v2966_v52, %v3391_v9  ;;  %v934_v28 = vmul.f32 %v2969_v53, %v3400_v31  ;;  %1140 = vrot.lane.b32.xlu0 %v1120_v46, %s5133_s23  ;;  %v952_v8 = vmul.f32 %v2972_v54, %v3408_v44  ;;  %v3472_v20 = vld [vmem:[%s2829_s12 + $0xc2] sm:$0xff] }
  0xa1   : > { %v613_v23 = vadd.f32 %v605_v43, %v586_v19  ;;  %v1031_v47 = vadd.f32 %v1023_v50, %v1013_v21  ;;  %v456_v11 = vadd.f32 %v448_v29, %v429_v27  ;;  %v1077_v45 = vmul.f32 %v3403_v62, %v3068_v34  ;;  %v3479_v27 = vld [vmem:[%s2829_s12 + $0x38] sm:$0xff] }
  0xa2   : > { %v1095_v58 = vmul.f32 %v3420_v18, %v3082_v57  ;;  %v942_v46 = vadd.f32 %v934_v28, %v924_v17  ;;  %v970_v43 = vmul.f32 %v3411_v56, %v2991_v63  ;;  %v527_v21 = vmul.f32 %v3455_v6, %v2901_v25  ;;  %v3482_v62 = vld [vmem:[%s2829_s12 + $0x39] sm:$0xff]  ;;  %v3489_v28 = vld [vmem:[%s2829_s12 + $0x108] sm:$0xff] }
  0xa3   : > { %v639_v50 = vadd.f32 %v631_v59, %v613_v23  ;;  %v1049_v29 = vadd.f32 %v1041_v41, %v1031_v47  ;;  %v482_v19 = vadd.f32 %v474_v55, %v456_v11  ;;  %v1113_v18 = vmul.f32 %v3423_v49, %v3092_v40  ;;  %v3494_v41 = vld [vmem:[%s2829_s12 + $0x3a] sm:$0xff]  ;;  %v3502_v49 = vld [vmem:[%s2829_s12 + $0x109] sm:$0xff] }
  0xa4   : > { %v553_v17 = vmul.f32 %v3463_v14, %v2915_v30  ;;  %v960_v59 = vadd.f32 %v952_v8, %v942_v46  ;;  %v988_v55 = vmul.f32 %v3428_v15, %v2994_v5  ;;  %v579_v22 = vmul.f32 %v3472_v20, %v2921_v32  ;;  %v3505_v56 = vld [vmem:[%s2829_s12 + $0x10a] sm:$0xff] }
  0xa5   : > { %v665_v23 = vadd.f32 %v657_v24, %v639_v50  ;;  %v1067_v47 = vadd.f32 %v1059_v37, %v1049_v29  ;;  %v508_v11 = vadd.f32 %v500_v51, %v482_v19  ;;  %v1006_v46 = vmul.f32 %v3440_v26, %v3015_v33  ;;  %v3519_v19 = vld [vmem:[%s2829_s12 + $0x81] sm:$0xff] }
  0xa6   : > { %v978_v8 = vadd.f32 %v970_v43, %v960_v59  ;;  %v378_v24 = vmul.f32 %v2831_v0, %v3479_v27  ;;  %v396_v37 = vmul.f32 %v2841_v3, %v3482_v62  ;;  %v606_v29 = vmul.f32 %v3489_v28, %v2934_v36 }
  0xa7   : > { %686 = vrot.lane.b32.xlu1 %v665_v23, %s5135_s19  ;;  %v1085_v51 = vadd.f32 %v1077_v45, %v1067_v47  ;;  %v535_v50 = vadd.f32 %v527_v21, %v508_v11  ;;  %v422_v43 = vmul.f32 %v2852_v7, %v3494_v41  ;;  %v1024_v0 = vmul.f32 %v3455_v6, %v3025_v42  ;;  %v3526_v23 = vld [vmem:[%s2829_s12 + $0x82] sm:$0xff] }
  0xa8   : > { %v996_v59 = vadd.f32 %v988_v55, %v978_v8  ;;  %v404_v26 = vadd.f32 %v396_v37, %v378_v24  ;;  %v449_v3 = vmul.f32 %v3499_v35, %v2859_v10  ;;  %v632_v47 = vmul.f32 %v3502_v49, %v2956_v48  ;;  %v3537_v10 = vld [vmem:[%s2829_s12 + $0xc8] sm:$0xff] }
  0xa9   : > { %v1103_v45 = vadd.f32 %v1095_v58, %v1085_v51  ;;  %v561_v21 = vadd.f32 %v553_v17, %v535_v50  ;;  %v658_v7 = vmul.f32 %v3505_v56, %v3002_v13  ;;  %v1042_v55 = vmul.f32 %v3463_v14, %v3043_v60  ;;  %v3548_v50 = vld [vmem:[%s2829_s12 + $0xc9] sm:$0xff] }
  0xaa   : > { %v1014_v11 = vadd.f32 %v1006_v46, %v996_v59  ;;  %v430_v8 = vadd.f32 %v422_v43, %v404_v26  ;;  %v475_v24 = vmul.f32 %v3519_v19, %v2864_v12  ;;  %v1060_v37 = vmul.f32 %v3472_v20, %v3061_v39 }
  0xab   : > { %v1121_v58 = vadd.f32 %v1113_v18, %v1103_v45  ;;  %v587_v17 = vadd.f32 %v579_v22, %v561_v21  ;;  %v501_v46 = vmul.f32 %v3526_v23, %v2871_v16  ;;  %v925_v12 = vmul.f32 %v2966_v52, %v3479_v27  ;;  %v3562_v45 = vld [vmem:[%s2829_s12 + $0xca] sm:$0xff] }
  0xac   : > { %v1032_v51 = vadd.f32 %v1024_v0, %v1014_v11  ;;  %v457_v26 = vadd.f32 %v449_v3, %v430_v8  ;;  %v935_v18 = vmul.f32 %v2969_v53, %v3482_v62  ;;  %v1078_v43 = vmul.f32 %v3489_v28, %v3068_v34 }
  0xad   : > { %1142 = vrot.lane.b32.xlu0 %v1121_v58, %s5133_s23  ;;  %v614_v22 = vadd.f32 %v606_v29, %v587_v17  ;;  %v528_v16 = vmul.f32 %v3537_v10, %v2901_v25  ;;  %v953_v59 = vmul.f32 %v2972_v54, %v3494_v41  ;;  %v971_v53 = vmul.f32 %v3499_v35, %v2991_v63 }
  0xae   : > { %v1050_v0 = vadd.f32 %v1042_v55, %v1032_v51  ;;  %v483_v3 = vadd.f32 %v475_v24, %v457_v26  ;;  %v943_v52 = vadd.f32 %v935_v18, %v925_v12  ;;  %v1096_v29 = vmul.f32 %v3502_v49, %v3082_v57  ;;  %v3573_v55 = vld [vmem:[%s2829_s12 + $0x110] sm:$0xff] }
  0xaf   : > { %v640_v21 = vadd.f32 %v632_v47, %v614_v22  ;;  %v554_v25 = vmul.f32 %v3548_v50, %v2915_v30  ;;  %v989_v63 = vmul.f32 %v3519_v19, %v2994_v5  ;;  %v1114_v47 = vmul.f32 %v3505_v56, %v3092_v40  ;;  %v3602_v22 = vld [vmem:[%s2829_s12 + $0x112] sm:$0xff] }
  0xb0   : > { %v1068_v54 = vadd.f32 %v1060_v37, %v1050_v0  ;;  %v509_v11 = vadd.f32 %v501_v46, %v483_v3  ;;  %v961_v8 = vadd.f32 %v953_v59, %v943_v52  ;;  %v580_v58 = vmul.f32 %v3562_v45, %v2921_v32  ;;  %v3584_v46 = vld [vmem:[%s2829_s12 + $0x111] sm:$0xff] }
  0xb1   : > { %v666_v24 = vadd.f32 %v658_v7, %v640_v21  ;;  %v1007_v30 = vmul.f32 %v3526_v23, %v3015_v33  ;;  %v3587_v26 = vstv %s3539_s25  ;;  %v607_v5 = vmul.f32 %v3573_v55, %v2934_v36  ;;  %s2376_s25 = sld [smem:[#allocation5 + $0x22]] }
  0xb2   : > { %v1086_v17 = vadd.f32 %v1078_v43, %v1068_v54  ;;  %v536_v37 = vadd.f32 %v528_v16, %v509_v11  ;;  %v979_v51 = vadd.f32 %v971_v53, %v961_v8  ;;  %v1025_v32 = vmul.f32 %v3537_v10, %v3025_v42  ;;  %v5243_v16 = vld [vmem:[#allocation17_spill] sm:$0xff]  ;;  %v5244_v11 = vld [vmem:[#allocation18_spill] sm:$0xff] }
  0xb3   : > { %688 = vrot.lane.b32.xlu1 %v666_v24, %s5135_s19  ;;  %v704_v33 = vmul.f32 %v3587_v26, %v2836_v1  ;;  %v3599_v7 = vstv %s3545_s26  ;;  %v633_v36 = vmul.f32 %v3584_v46, %v2956_v48  ;;  %v1043_v1 = vmul.f32 %v3548_v50, %v3043_v60  ;;  %v2557_v54 = vld [vmem:[%s2829_s12 + $0x12] sm:$0xff]  ;;  %s3800_s26 = sld [smem:[#allocation3]] }
  0xb4   : > { %v1104_v12 = vadd.f32 %v1096_v29, %v1086_v17  ;;  %v562_v18 = vadd.f32 %v554_v25, %v536_v37  ;;  %v997_v43 = vadd.f32 %v989_v63, %v979_v51  ;;  %v714_v59 = vmul.f32 %v3599_v7, %v5243_v16  ;;  %v5245_v17 = vld [vmem:[#allocation19_spill] sm:$0xff] }
  0xb5   : > { %v659_v52 = vmul.f32 %v3602_v22, %v3002_v13  ;;  %v1061_v53 = vmul.f32 %v3562_v45, %v3061_v39  ;;  %v3617_v21 = vstv %s3570_s27  ;;  %v702_v8 = vmul.f32 %v3587_v26, %v5244_v11  ;;  %s3868_s27 = sld [smem:[#allocation8 + $0xa]] }
  0xb6   : > { %v1122_v42 = vadd.f32 %v1114_v47, %v1104_v12  ;;  %v588_v0 = vadd.f32 %v580_v58, %v562_v18  ;;  %v1015_v3 = vadd.f32 %v1007_v30, %v997_v43  ;;  %v722_v25 = vadd.f32 %v714_v59, %v704_v33  ;;  %v2558_v58 = vld [vmem:[%s2829_s12 + $0x58] sm:$0xff]  ;;  %v5246_v12 = vld [vmem:[#allocation20_spill] sm:$0xff] }
  0xb7   : > { %v732_v60 = vmul.f32 %v2557_v54, %v3617_v21  ;;  %v1079_v24 = vmul.f32 %v3573_v55, %v3068_v34  ;;  %v3627_v39 = vstv %s3589_s28  ;;  %v1097_v47 = vmul.f32 %v3584_v46, %v3082_v57  ;;  %v5247_v43 = vld [vmem:[#allocation21_spill] sm:$0xff]  ;;  %v5249_v54 = vld [vmem:[#allocation23_spill] sm:$0xff]  ;;  %s3870_s28 = sld [smem:[#allocation8 + $0xb]] }
  0xb8   : > { %1144 = vrot.lane.b32.xlu0 %v1122_v42, %s5133_s23  ;;  %v615_v48 = vadd.f32 %v607_v5, %v588_v0  ;;  %v1033_v29 = vadd.f32 %v1025_v32, %v1015_v3  ;;  %v750_v30 = vmul.f32 %v2558_v58, %v3627_v39  ;;  %v712_v37 = vmul.f32 %v3599_v7, %v5245_v17  ;;  %v5248_v0 = vld [vmem:[#allocation22_spill] sm:$0xff] }
  0xb9   : > { %v740_v32 = vadd.f32 %v732_v60, %v722_v25  ;;  %v3635_v33 = vstv %s2369_s29  ;;  %v730_v18 = vmul.f32 %v3617_v21, %v5246_v12  ;;  %v748_v57 = vmul.f32 %v5247_v43, %v3627_v39  ;;  %v2560_v17 = vld [vmem:[%s2829_s12 + $0x5a] sm:$0xff]  ;;  %v5254_v43 = vld [vmem:[#allocation32_spill] sm:$0xff]  ;;  %s3877_s29 = sld [smem:[#allocation8 + $0xc]] }
  0xba   : > { %v641_v63 = vadd.f32 %v633_v36, %v615_v48  ;;  %v1051_v13 = vadd.f32 %v1043_v1, %v1033_v29  ;;  %v720_v34 = vadd.f32 %v712_v37, %v702_v8  ;;  %v1115_v59 = vmul.f32 %v3602_v22, %v3092_v40  ;;  %v5250_v40 = vld [vmem:[#allocation29_spill] sm:$0xff] }
  0xbb   : > { %v3645_v36 = vstv %s3610_s30  ;;  %v766_v3 = vmul.f32 %v5248_v0, %v3635_v33  ;;  %v3651_v29 = vstv %s2371_s10  ;;  %v703_v11 = vmul.f32 %v3587_v26, %v5250_v40  ;;  %v2561_v0 = vld [vmem:[%s2829_s12 + $0xa0] sm:$0xff]  ;;  %s3882_s30 = sld [smem:[#allocation8 + $0x5]]  ;;  %s3884_s10 = sld [smem:[#allocation8 + $0x1]] }
  0xbc   : > { %v667_v51 = vadd.f32 %v659_v52, %v641_v63  ;;  %v1069_v5 = vadd.f32 %v1061_v53, %v1051_v13  ;;  %v738_v42 = vadd.f32 %v730_v18, %v720_v34  ;;  %v758_v52 = vadd.f32 %v750_v30, %v740_v32  ;;  %v2559_v53 = vld [vmem:[%s2829_s12 + $0x59] sm:$0xff] }
  0xbd   : > { %v768_v48 = vmul.f32 %v2559_v53, %v3635_v33  ;;  %v784_v60 = vmul.f32 %v5249_v54, %v3645_v36  ;;  %v5251_v63 = vld [vmem:[#allocation30_spill] sm:$0xff]  ;;  %v786_v37 = vmul.f32 %v2560_v17, %v3645_v36  ;;  %v3666_v34 = vstv %s2372_s11  ;;  %s3886_s11 = sld [smem:[#allocation8 + $0xf]] }
  0xbe   : > { %690 = vrot.lane.b32.xlu1 %v667_v51, %s5135_s19  ;;  %v1087_v16 = vadd.f32 %v1079_v24, %v1069_v5  ;;  %v756_v25 = vadd.f32 %v748_v57, %v738_v42  ;;  %v713_v13 = vmul.f32 %v3599_v7, %v5251_v63  ;;  %v5253_v51 = vld [vmem:[#allocation24_spill] sm:$0xff]  ;;  %v749_v57 = vmul.f32 %v5254_v43, %v3627_v39  ;;  %v5261_v43 = vld [vmem:[#allocation46_spill] sm:$0xff]  ;;  %s3914_s19 = sld [smem:[#allocation8 + $0x7]] }
  0xbf   : > { %v776_v30 = vadd.f32 %v768_v48, %v758_v52  ;;  %v802_v5 = vmul.f32 %v5253_v51, %v3651_v29  ;;  %v5255_v52 = vld [vmem:[#allocation25_spill] sm:$0xff]  ;;  %v3678_v48 = vstv %s2373_s4  ;;  %v3692_v17 = vstv %s2374_s24  ;;  %v5258_v51 = vld [vmem:[#allocation26_spill] sm:$0xff]  ;;  %s3888_s4 = sld [smem:[#allocation8 + $0x6]]  ;;  %s3894_s24 = sld [smem:[#allocation8 + $0x14]] }
  0xc0   : > { %v1105_v1 = vadd.f32 %v1097_v47, %v1087_v16  ;;  %v774_v24 = vadd.f32 %v766_v3, %v756_v25  ;;  %v5252_v47 = vld [vmem:[#allocation31_spill] sm:$0xff]  ;;  %v721_v32 = vadd.f32 %v713_v13, %v703_v11  ;;  %v705_v16 = vmul.f32 %v3587_v26, %v3148_v61  ;;  %v5256_v61 = vld [vmem:[#allocation34_spill] sm:$0xff] }
  0xc1   : > { %v731_v58 = vmul.f32 %v3617_v21, %v5252_v47  ;;  %v794_v42 = vadd.f32 %v786_v37, %v776_v30  ;;  %v804_v3 = vmul.f32 %v2561_v0, %v3651_v29  ;;  %v820_v53 = vmul.f32 %v5255_v52, %v3666_v34  ;;  %v2562_v25 = vld [vmem:[%s2829_s12 + $0xa1] sm:$0xff]  ;;  %v2565_v52 = vld [vmem:[%s2829_s12 + $0xe9] sm:$0xff] }
  0xc2   : > { %v1123_v8 = vadd.f32 %v1115_v59, %v1105_v1  ;;  %v792_v12 = vadd.f32 %v784_v60, %v774_v24  ;;  %v715_v59 = vmul.f32 %v3599_v7, %v3151_v2  ;;  %v822_v54 = vmul.f32 %v2562_v25, %v3666_v34  ;;  %v5257_v13 = vld [vmem:[#allocation27_spill] sm:$0xff] }
  0xc3   : > { %v739_v18 = vadd.f32 %v731_v58, %v721_v32  ;;  %v767_v40 = vmul.f32 %v5256_v61, %v3635_v33  ;;  %v733_v11 = vmul.f32 %v3617_v21, %v3154_v4  ;;  %v838_v24 = vmul.f32 %v5257_v13, %v3678_v48  ;;  %v2563_v58 = vld [vmem:[%s2829_s12 + $0xa2] sm:$0xff]  ;;  %v2566_v61 = vld [vmem:[%s2829_s12 + $0xd8] sm:$0xff] }
  0xc4   : > { %1146 = vrot.lane.b32.xlu1 %v1123_v8, %s5133_s23  ;;  %v810_v1 = vadd.f32 %v802_v5, %v792_v12  ;;  %v723_v2 = vadd.f32 %v715_v59, %v705_v16  ;;  %v812_v8 = vadd.f32 %v804_v3, %v794_v42  ;;  %v706_v47 = vmul.f32 %v3587_v26, %v3221_v38  ;;  %v2564_v5 = vld [vmem:[%s2829_s12 + $0xe8] sm:$0xff]  ;;  %s3912_s23 = sld [smem:[#allocation8 + $0x2]] }
  0xc5   : > { %v757_v60 = vadd.f32 %v749_v57, %v739_v18  ;;  %v840_v30 = vmul.f32 %v2563_v58, %v3678_v48  ;;  %v3694_v37 = vstv %s2375_s18  ;;  %v716_v4 = vmul.f32 %v3599_v7, %v5258_v51  ;;  %v5260_v38 = vld [vmem:[#allocation35_spill] sm:$0xff]  ;;  %v5262_v42 = vld [vmem:[#allocation40_spill] sm:$0xff]  ;;  %s3896_s18 = sld [smem:[#allocation8 + $0x3]] }
  0xc6   : > { %v828_v63 = vadd.f32 %v820_v53, %v810_v1  ;;  %v3700_v32 = vmul.f32 %v2564_v5, %v3692_v17  ;;  %v3702_v12 = vstv %s2376_s25  ;;  %v785_v18 = vmul.f32 %v5260_v38, %v3645_v36  ;;  %v2567_v58 = vld [vmem:[%s2829_s12 + $0xea] sm:$0xff]  ;;  %v5270_v38 = vld [vmem:[#allocation57_spill] sm:$0xff]  ;;  %s3906_s25 = sld [smem:[#allocation8 + $0x10]] }
  0xc7   : > { %v734_v57 = vmul.f32 %v3617_v21, %v5261_v43  ;;  %v775_v16 = vadd.f32 %v767_v40, %v757_v60  ;;  %v741_v59 = vadd.f32 %v733_v11, %v723_v2  ;;  %v751_v0 = vmul.f32 %v5262_v42, %v3627_v39  ;;  %v5265_v60 = vld [vmem:[#allocation28_spill] sm:$0xff]  ;;  %v5266_v2 = vld [vmem:[#allocation33_spill] sm:$0xff] }
  0xc8   : > { %5259 = vst [vmem:[#allocation17_spill] sm:$0xff] %v3700_v32  ;;  %v724_v3 = vadd.f32 %v716_v4, %v706_v47  ;;  %v830_v1 = vadd.f32 %v822_v54, %v812_v8  ;;  %v3712_v53 = vmul.f32 %v2565_v52, %v3694_v37  ;;  %v846_v25 = vadd.f32 %v838_v24, %v828_v63  ;;  %v5267_v54 = vld [vmem:[#allocation36_spill] sm:$0xff]  ;;  %v5268_v63 = vld [vmem:[#allocation49_spill] sm:$0xff] }
  0xc9   : > { %v856_v13 = vmul.f32 %v2566_v61, %v3692_v17  ;;  %v3718_v51 = vmul.f32 %v2567_v58, %v3702_v12  ;;  %v874_v40 = vmul.f32 %v5265_v60, %v3694_v37  ;;  %v3724_v11 = vmul.f32 %v5266_v2, %v3702_v12  ;;  %v5269_v4 = vld [vmem:[#allocation56_spill] sm:$0xff]  ;;  %v5271_v61 = vld [vmem:[#allocation41_spill] sm:$0xff]  ;;  %v5272_v60 = vld [vmem:[#allocation59_spill] sm:$0xff] }
  0xca   : > { %5263 = vst [vmem:[#allocation18_spill] sm:$0xff] %v3712_v53  ;;  %v803_v8 = vmul.f32 %v5267_v54, %v3651_v29  ;;  %v742_v47 = vadd.f32 %v734_v57, %v724_v3  ;;  %v752_v24 = vmul.f32 %v5268_v63, %v3627_v39  ;;  %v707_v5 = vmul.f32 %v3587_v26, %v5269_v4  ;;  %v5273_v63 = vld [vmem:[#allocation37_spill] sm:$0xff]  ;;  %v5274_v4 = vld [vmem:[#allocation38_spill] sm:$0xff] }
  0xcb   : > { %5264 = vst [vmem:[#allocation19_spill] sm:$0xff] %v3718_v51  ;;  %v717_v43 = vmul.f32 %v3599_v7, %v5270_v38  ;;  %v793_v42 = vadd.f32 %v785_v18, %v775_v16  ;;  %v759_v52 = vadd.f32 %v751_v0, %v741_v59  ;;  %v769_v58 = vmul.f32 %v5271_v61, %v3635_v33  ;;  %v5275_v18 = vld [vmem:[#allocation39_spill] sm:$0xff]  ;;  %v5277_v59 = vld [vmem:[#allocation60_spill] sm:$0xff] }
  0xcc   : > { %v735_v2 = vmul.f32 %v3617_v21, %v5272_v60  ;;  %v3738_v51 = vadd.f32 %v840_v30, %v830_v1  ;;  %v864_v57 = vadd.f32 %v856_v13, %v846_v25  ;;  %v821_v53 = vmul.f32 %v5273_v63, %v3666_v34  ;;  %v5278_v30 = vld [vmem:[#allocation42_spill] sm:$0xff]  ;;  %v5279_v13 = vld [vmem:[#allocation51_spill] sm:$0xff] }
  0xcd   : > { %v725_v54 = vadd.f32 %v717_v43, %v707_v5  ;;  %v3744_v32 = vmul.f32 %v5274_v4, %v3678_v48  ;;  %v3748_v16 = vmul.f32 %v5275_v18, %v3692_v17  ;;  %v753_v0 = vmul.f32 %v5277_v59, %v3627_v39  ;;  %v5280_v60 = vld [vmem:[#allocation43_spill] sm:$0xff]  ;;  %v5281_v4 = vld [vmem:[#allocation44_spill] sm:$0xff] }
  0xce   : > { %v787_v1 = vmul.f32 %v5278_v30, %v3645_v36  ;;  %v760_v25 = vadd.f32 %v752_v24, %v742_v47  ;;  %v770_v5 = vmul.f32 %v5279_v13, %v3635_v33  ;;  %v811_v43 = vadd.f32 %v803_v8, %v793_v42  ;;  %v5283_v8 = vld [vmem:[#allocation63_spill] sm:$0xff] }
  0xcf   : > { %5276 = vst [vmem:[#allocation20_spill] sm:$0xff] %v3748_v16  ;;  %v743_v38 = vadd.f32 %v735_v2, %v725_v54  ;;  %v777_v61 = vadd.f32 %v769_v58, %v759_v52  ;;  %v805_v63 = vmul.f32 %v5280_v60, %v3651_v29  ;;  %v823_v18 = vmul.f32 %v5281_v4, %v3666_v34  ;;  %v5282_v16 = vld [vmem:[#allocation52_spill] sm:$0xff]  ;;  %v5284_v58 = vld [vmem:[#allocation69_spill] sm:$0xff] }
  0xd0   : > { %v882_v3 = vadd.f32 %v874_v40, %v864_v57  ;;  %v788_v59 = vmul.f32 %v5282_v16, %v3645_v36  ;;  %v708_v30 = vmul.f32 %v3587_v26, %v3391_v9  ;;  %v718_v47 = vmul.f32 %v3599_v7, %v3400_v31  ;;  %v5285_v9 = vld [vmem:[#allocation72_spill] sm:$0xff]  ;;  %v5286_v31 = vld [vmem:[#allocation53_spill] sm:$0xff] }
  0xd1   : > { %v761_v24 = vadd.f32 %v753_v0, %v743_v38  ;;  %v771_v42 = vmul.f32 %v5283_v8, %v3635_v33  ;;  %v736_v52 = vmul.f32 %v3617_v21, %v3408_v44  ;;  %v754_v2 = vmul.f32 %v5284_v58, %v3627_v39  ;;  %v5290_v58 = vld [vmem:[#allocation45_spill] sm:$0xff] }
  0xd2   : > { %v778_v40 = vadd.f32 %v770_v5, %v760_v25  ;;  %v726_v57 = vadd.f32 %v718_v47, %v708_v30  ;;  %v772_v54 = vmul.f32 %v3428_v15, %v3635_v33  ;;  %v790_v16 = vmul.f32 %v5285_v9, %v3645_v36  ;;  %v5288_v47 = vld [vmem:[#allocation54_spill] sm:$0xff] }
  0xd3   : > { %v795_v13 = vadd.f32 %v787_v1, %v777_v61  ;;  %v806_v0 = vmul.f32 %v5286_v31, %v3651_v29  ;;  %v808_v38 = vmul.f32 %v3455_v6, %v3651_v29  ;;  %v826_v44 = vmul.f32 %v3463_v14, %v3666_v34  ;;  %v5287_v1 = vld [vmem:[#allocation64_spill] sm:$0xff] }
  0xd4   : > { %v829_v60 = vadd.f32 %v821_v53, %v811_v43  ;;  %v744_v4 = vadd.f32 %v736_v52, %v726_v57  ;;  %v844_v25 = vmul.f32 %v3472_v20, %v3678_v48  ;;  %v862_v15 = vmul.f32 %v3489_v28, %v3692_v17 }
  0xd5   : > { %v779_v5 = vadd.f32 %v771_v42, %v761_v24  ;;  %v789_v61 = vmul.f32 %v5287_v1, %v3645_v36  ;;  %v3790_v30 = vmul.f32 %v3502_v49, %v3694_v37  ;;  %v3794_v6 = vmul.f32 %v3505_v56, %v3702_v12 }
  0xd6   : > { %v796_v14 = vadd.f32 %v788_v59, %v778_v40  ;;  %v762_v53 = vadd.f32 %v754_v2, %v744_v4  ;;  %v709_v20 = vmul.f32 %v3587_v26, %v3479_v27  ;;  %v719_v28 = vmul.f32 %v3599_v7, %v3482_v62  ;;  %v5289_v59 = vld [vmem:[#allocation65_spill] sm:$0xff] }
  0xd7   : > { %v813_v43 = vadd.f32 %v805_v63, %v795_v13  ;;  %v824_v24 = vmul.f32 %v5288_v47, %v3666_v34  ;;  %v737_v49 = vmul.f32 %v3617_v21, %v3494_v41  ;;  %v755_v56 = vmul.f32 %v3499_v35, %v3627_v39 }
  0xd8   : > { %v807_v8 = vmul.f32 %v5289_v59, %v3651_v29  ;;  %v780_v42 = vadd.f32 %v772_v54, %v762_v53  ;;  %v727_v27 = vadd.f32 %v719_v28, %v709_v20  ;;  %v773_v62 = vmul.f32 %v3519_v19, %v3635_v33  ;;  %v5297_v20 = vld [vmem:[#allocation20_spill] sm:$0xff] }
  0xd9   : > { %v797_v26 = vadd.f32 %v789_v61, %v779_v5  ;;  %v791_v7 = vmul.f32 %v3526_v23, %v3645_v36  ;;  %v809_v63 = vmul.f32 %v3537_v10, %v3651_v29  ;;  %v827_v41 = vmul.f32 %v3548_v50, %v3666_v34 }
  0xda   : > { %v814_v21 = vadd.f32 %v806_v0, %v796_v14  ;;  %v798_v35 = vadd.f32 %v790_v16, %v780_v42  ;;  %v745_v39 = vadd.f32 %v737_v49, %v727_v27  ;;  %v845_v52 = vmul.f32 %v3562_v45, %v3678_v48  ;;  %v5291_v45 = vld [vmem:[#allocation55_spill] sm:$0xff]  ;;  %v5299_v42 = vld [vmem:[#allocation18_spill] sm:$0xff] }
  0xdb   : > { %v841_v2 = vmul.f32 %v5290_v58, %v3678_v48  ;;  %v3824_v19 = vmul.f32 %v3573_v55, %v3692_v17  ;;  %v3828_v23 = vmul.f32 %v3584_v46, %v3694_v37  ;;  %v3832_v10 = vmul.f32 %v3602_v22, %v3702_v12  ;;  %v5292_v46 = vld [vmem:[#allocation66_spill] sm:$0xff] }
  0xdc   : > { %v900_v33 = vadd.f32 %v3724_v11, %v882_v3  ;;  %v842_v36 = vmul.f32 %v5291_v45, %v3678_v48  ;;  %v816_v29 = vadd.f32 %v808_v38, %v798_v35  ;;  %v763_v55 = vadd.f32 %v755_v56, %v745_v39  ;;  %v5293_v11 = vld [vmem:[#allocation17_spill] sm:$0xff] }
  0xdd   : > { %v847_v40 = vadd.f32 %v3744_v32, %v829_v60  ;;  %v815_v57 = vadd.f32 %v807_v8, %v797_v26  ;;  %v825_v54 = vmul.f32 %v5292_v46, %v3666_v34  ;;  %v831_v22 = vadd.f32 %v823_v18, %v813_v43  ;;  %v2568_v32 = vld [vmem:[%s2829_s12 + $0xe1] sm:$0xff]  ;;  %v5301_v35 = vld [vmem:[#allocation61_spill] sm:$0xff] }
  0xde   : > { %v832_v16 = vadd.f32 %v824_v24, %v814_v21  ;;  %v834_v13 = vadd.f32 %v826_v44, %v816_v29  ;;  %v781_v31 = vadd.f32 %v773_v62, %v763_v55  ;;  %v2676_v0 = vmov 0.0   ;;  %v5295_v34 = vld [vmem:[#allocation47_spill] sm:$0xff]  ;;  %v5296_v44 = vld [vmem:[#allocation58_spill] sm:$0xff] }
  0xdf   : > { %v3834_v50 = vpop.permute.xlu1 %680  ;;  %1191 = vst [vmem:[#allocation2 + $0x6] sm:$0x3] %v2676_v0  ;;  %1192 = vst [vmem:[#allocation2 + $0x48] sm:$0x3] %v2676_v0  ;;  %v866_v3 = vadd.f32 %v5293_v11, %v3738_v51  ;;  %v5294_v38 = vlaneseq  ;;  %v3848_v5 = vstv %s3800_s26  ;;  %v875_v60 = vmul.f32 %v2568_v32, %v3694_v37  ;;  %v5298_v43 = vld [vmem:[#allocation67_spill] sm:$0xff]  ;;  %s3908_s26 = sld [smem:[#allocation8 + $0x8]] }
  0xe0   : > { %v859_v18 = vmul.f32 %v5295_v34, %v3692_v17  ;;  %v860_v1 = vmul.f32 %v5296_v44, %v3692_v17  ;;  %v852_v61 = vadd.f32 %v844_v25, %v834_v13  ;;  %v799_v14 = vadd.f32 %v791_v7, %v781_v31  ;;  %v2569_v26 = vld [vmem:[%s2829_s12 + $0xe2] sm:$0xff]  ;;  %v5300_v7 = vld [vmem:[#allocation48_spill] sm:$0xff]  ;;  %s3875_s12 = sld [smem:[#allocation8]] }
  0xe1   : > { %v677_v9 = vpop.permute.xlu0 %676  ;;  %v3845_v4 = vand.u32 127, %v5294_v38  ;;  %v865_v51 = vadd.f32 %v5297_v20, %v847_v40  ;;  %v833_v28 = vadd.f32 %v825_v54, %v815_v57  ;;  %v843_v47 = vmul.f32 %v5298_v43, %v3678_v48  ;;  %v5304_v57 = vld [vmem:[#allocation50_spill] sm:$0xff]  ;;  %v5308_v32 = vld [vmem:[#allocation71_spill] sm:$0xff] }
  0xe2   : > { %v908_v53 = vadd.f32 %v900_v33, %v677_v9  ;;  %v849_v49 = vadd.f32 %v841_v2, %v831_v22  ;;  %v850_v56 = vadd.f32 %v842_v36, %v832_v16  ;;  %v870_v59 = vadd.f32 %v862_v15, %v852_v61  ;;  %v5302_v33 = vld [vmem:[#allocation68_spill] sm:$0xff]  ;;  %v5306_v16 = vld [vmem:[#allocation70_spill] sm:$0xff] }
  0xe3   : > { %v817_v8 = vadd.f32 %v809_v63, %v799_v14  ;;  %v884_v27 = vadd.f32 %v5299_v42, %v866_v3  ;;  %vm1174_vm0 = vcmp.lt.s32.totalorder %v3845_v4, 64  ;;  %v893_v25 = vmul.f32 %v2569_v26, %v3702_v12 }
  0xe4   : > { %v877_v21 = vmul.f32 %v5300_v7, %v3694_v37  ;;  %v878_v39 = vmul.f32 %v5301_v35, %v3694_v37  ;;  %v888_v48 = vadd.f32 %v3790_v30, %v870_v59  ;;  %v883_v63 = vadd.f32 %v875_v60, %v865_v51 }
  0xe5   : > { %v835_v58 = vadd.f32 %v827_v41, %v817_v8  ;;  %v851_v2 = vadd.f32 %v843_v47, %v833_v28  ;;  %v861_v45 = vmul.f32 %v5302_v33, %v3692_v17  ;;  %v867_v36 = vadd.f32 %v859_v18, %v849_v49  ;;  %v5303_v17 = vld [vmem:[#allocation19_spill] sm:$0xff] }
  0xe6   : > { %v868_v29 = vadd.f32 %v860_v1, %v850_v56  ;;  %v3880_v30 = vadd.f32 %v3794_v6, %v888_v48  ;;  %v902_v40 = vadd.f32 %v5303_v17, %v884_v27  ;;  %v895_v46 = vmul.f32 %v5304_v57, %v3702_v12 }
  0xe7   : > { %v853_v41 = vadd.f32 %v845_v52, %v835_v58  ;;  %v5305_v52 = vld [vmem:[#allocation62_spill] sm:$0xff]  ;;  %v869_v22 = vadd.f32 %v861_v45, %v851_v2  ;;  %v879_v13 = vmul.f32 %v5306_v16, %v3694_v37  ;;  %v885_v0 = vadd.f32 %v877_v21, %v867_v36 }
  0xe8   : > { %v896_v9 = vmul.f32 %v5305_v52, %v3702_v12  ;;  %v886_v11 = vadd.f32 %v878_v39, %v868_v29  ;;  %v897_v60 = vmul.f32 %v5308_v32, %v3702_v12  ;;  %v3935_v1 = vstv %s3875_s12  ;;  %s3972_s12 = sld [smem:[#allocation8 + $0x13]] }
  0xe9   : > { %v1133_v24 = vpop.permute.xlu1 %1132  ;;  %v871_v54 = vadd.f32 %v3824_v19, %v853_v41  ;;  %v901_v19 = vadd.f32 %v893_v25, %v883_v63  ;;  %v887_v38 = vadd.f32 %v879_v13, %v869_v22  ;;  %v3926_v18 = vadd.f32 %v895_v46, %v885_v0 }
  0xea   : > { %v1156_v62 = vadd.f32 %v1133_v24, %v908_v53  ;;  %v3928_v44 = vadd.f32 %v896_v9, %v886_v11  ;;  %v3938_v12 = vstv %s3882_s30  ;;  %v3941_v61 = vstv %s3868_s27  ;;  %s3959_s27 = sld [smem:[#allocation8 + $0xe]] }
  0xeb   : > { %v889_v3 = vadd.f32 %v3828_v23, %v871_v54  ;;  %v910_v23 = vadd.f32 %v902_v40, %v3834_v50  ;;  %v3944_v50 = vstv %s3886_s11  ;;  %v3951_v53 = vstv %s3894_s24 }
  0xec   : > { %v1166_v15 = vadd.f32 %v3848_v5, %v1156_v62  ;;  %v3954_v20 = vstv %s3884_s10  ;;  %v3957_v51 = vstv %s3888_s4  ;;  %v3961_v28 = vadd.f32 %v897_v60, %v887_v38 }
  0xed   : > { %v3921_v37 = vadd.f32 %v3832_v10, %v889_v3  ;;  %v3964_v24 = vstv %s3870_s28  ;;  %v3967_v49 = vstv %s3906_s25  ;;  %v3970_v56 = vstv %s3896_s18  ;;  %s3991_s28 = sld [smem:[#allocation8 + $0x18]]  ;;  %s352_s25 = sand.u32 1, %s2662_s14  }
  0xee   : > { %v1175_v55 = vmax.f32 %v1166_v15, 0.0  ;;  %v3976_v8 = vstv %s3908_s26  ;;  %v3979_v42 = vstv %s3912_s23  ;;  %v3982_v27 = vstv %s3914_s19  ;;  %s1811_s19 = sld [smem:[#allocation4]] }
  0xef   : > { %5307 = vst [vmem:[#allocation21_spill] sm:$0xff] %v3921_v37  ;;  %5309 = vst [vmem:[#allocation22_spill] sm:$0xff] %v3979_v42  ;;  %v3986_v26 = vstv %s3916_s0  ;;  %v3989_v25 = vstv %s3918_s1  ;;  %v3994_v7 = vstv %s3877_s29  ;;  %v4011_v17 = vstv %s3932_s20  ;;  %s2677_s0 = smov 2   ;;  %s5323_s1 = smov 1  }
  0xf0   : > { %v3900_v6 = vsel %vm1174_vm0, %v1175_v55, 0.0  ;;  %5310 = vst [vmem:[#allocation23_spill] sm:$0xff] %v3982_v27  ;;  %5311 = vst [vmem:[#allocation29_spill] sm:$0xff] %v3994_v7  ;;  %v4008_v55 = vstv %s3930_s3  ;;  %v4014_v40 = vstv %s3946_s15  ;;  %v4017_v57 = vstv %s3948_s17  ;;  %s4243_s3 = sld [smem:[#allocation8 + $0x11]]  ;;  %s4274_s15 = sld [smem:[#allocation8 + $0x16]] }
  0xf1   : > { %1193 = vst [vmem:[#allocation2 + $0x8] sm:$0xff] %v3900_v6  ;;  %v679_v31 = vpop.permute.xlu0 %678  ;;  %v4021_v9 = vstv %s3959_s27  ;;  %v4024_v16 = vstv %s3972_s12  ;;  %v1255_v11 = vmul.f32 %v3941_v61, %v3900_v6  ;;  %v1385_v3 = vmul.f32 %v3964_v24, %v3900_v6  ;;  %s5334_s17 = smov 127   ;;  %s2678_s20 = smov 126  }
  0xf2   : > { %v909_v34 = vadd.f32 %v901_v19, %v679_v31  ;;  %v1507_v19 = vmul.f32 %v3994_v7, %v3900_v6  ;;  %v1597_v32 = vmul.f32 %v4011_v17, %v3900_v6  ;;  %v1719_v60 = vmul.f32 %v4021_v9, %v3900_v6  ;;  %s2485_s12 = sshll.u32 %s2758_s2, 4  ;;  %s2680_s2 = smov [#allocation10]  }
  0xf6   : > { %v1135_v10 = vpop.permute.xlu0 %1134 }
  0xf7   : > { %v1157_v14 = vadd.f32 %v1135_v10, %v909_v34 }
  0xf8   : > { %v1201_v43 = vld [vmem:[#allocation2 + $0x6] sm:$0xff] }
  0xf9   : > { %v1219_v47 = vld [vmem:[#allocation2 + $0x7] sm:$0xff]  ;;  %v1167_v59 = vadd.f32 %v3848_v5, %v1157_v14  ;;  %v1211_v62 = vmul.f32 %v3935_v1, %v1201_v43  ;;  %v1357_v39 = vmul.f32 %v3954_v20, %v1201_v43  ;;  %v1569_v15 = vmul.f32 %v3970_v56, %v1201_v43 }
  0xfa   : > { %v1229_v35 = vmul.f32 %v3938_v12, %v1219_v47  ;;  %v1367_v48 = vmul.f32 %v3957_v51, %v1219_v47  ;;  %v1579_v63 = vmul.f32 %v3976_v8, %v1219_v47  ;;  %v1479_v2 = vmul.f32 %v3979_v42, %v1201_v43 }
  0xfb   : > { %v1176_v21 = vmax.f32 %v1167_v59, 0.0  ;;  %v1489_v33 = vmul.f32 %v3982_v27, %v1219_v47  ;;  %v1691_v29 = vmul.f32 %v3986_v26, %v1201_v43  ;;  %v1701_v41 = vmul.f32 %v3989_v25, %v1219_v47 }
  0xfc   : > { %v1137_v58 = vpop.permute.xlu0 %1136  ;;  %v1237_v54 = vadd.f32 %v1229_v35, %v1211_v62  ;;  %v1375_v52 = vadd.f32 %v1367_v48, %v1357_v39  ;;  %v1587_v22 = vadd.f32 %v1579_v63, %v1569_v15 }
  0xfd   : > { %v1184_v45 = vsel %vm1174_vm0, %v1176_v21, 0.0  ;;  %v1158_v36 = vadd.f32 %v1137_v58, %v910_v23  ;;  %v1497_v13 = vadd.f32 %v1489_v33, %v1479_v2  ;;  %v1709_v38 = vadd.f32 %v1701_v41, %v1691_v29 }
  0xfe   : > { %1194 = vst [vmem:[#allocation2 + $0x10] sm:$0xff] %v1184_v45  ;;  %v4037_v23 = vstv %s3991_s28  ;;  %v1263_v14 = vadd.f32 %v1255_v11, %v1237_v54  ;;  %v1393_v43 = vadd.f32 %v1385_v3, %v1375_v52  ;;  %v1256_v47 = vmul.f32 %v3941_v61, %v1184_v45  ;;  %s353_s28 = scalar_lea.vmem [#allocation10], %s352_s25 }
  0xff   : > { %v1168_v46 = vadd.f32 %v3848_v5, %v1158_v36  ;;  %v4039_v34 = vadd.f32 %v1507_v19, %v1497_v13  ;;  %v1386_v62 = vmul.f32 %v3964_v24, %v1184_v45  ;;  %v1605_v21 = vadd.f32 %v1597_v32, %v1587_v22 }
 0x100   : > { %v4047_v35 = vmul.f32 %v4011_v17, %v1184_v45  ;;  %v4058_v15 = vadd.f32 %v1719_v60, %v1709_v38  ;;  %v4061_v63 = vmul.f32 %v4021_v9, %v1184_v45 }
 0x101   : > { %v1177_v31 = vmax.f32 %v1168_v46, 0.0  ;;  %v683_v0 = vpop.permute.xlu1 %682  ;;  %5312 = vst [vmem:[#allocation30_spill] sm:$0xff] %v4039_v34 }
 0x102   : > { %v911_v59 = vadd.f32 %v3926_v18, %v683_v0  ;;  %v4064_v18 = vmul.f32 %v3994_v7, %v1184_v45 }
 0x103   : > { %v1185_v10 = vsel %vm1174_vm0, %v1177_v31, 0.0 }
 0x104   : > { %1195 = vst [vmem:[#allocation2 + $0x18] sm:$0xff] %v1185_v10  ;;  %v4056_v58 = vmul.f32 %v3941_v61, %v1185_v10  ;;  %5316 = vst [vmem:[#allocation25_spill] sm:$0xff] %v4064_v18  ;;  %v4073_v29 = vmul.f32 %v3964_v24, %v1185_v10  ;;  %v4076_v41 = vmul.f32 %v4011_v17, %v1185_v10 }
 0x105   : > { %v4049_v6 = vld [vmem:[#allocation2 + $0x9] sm:$0xff]  ;;  %v4089_v0 = vmul.f32 %v4021_v9, %v1185_v10  ;;  %v4092_v32 = vmul.f32 %v3994_v7, %v1185_v10 }
 0x106   : > { %5313 = vst [vmem:[#allocation31_spill] sm:$0xff] %v4049_v6  ;;  %v4051_v39 = vld [vmem:[#allocation2 + $0xa] sm:$0xff]  ;;  %v1281_v2 = vmul.f32 %v3944_v50, %v4049_v6  ;;  %v1403_v33 = vmul.f32 %v3967_v49, %v4049_v6 }
 0x107   : > { %5314 = vst [vmem:[#allocation24_spill] sm:$0xff] %v4051_v39  ;;  %v4053_v48 = vld [vmem:[#allocation2 + $0xe] sm:$0xff]  ;;  %v1139_v46 = vpop.permute.xlu0 %1138  ;;  %v1307_v31 = vmul.f32 %v3951_v53, %v4051_v39  ;;  %5318 = vst [vmem:[#allocation27_spill] sm:$0xff] %v4092_v32  ;;  %v1421_v27 = vmul.f32 %v4008_v55, %v4051_v39  ;;  %v1633_v10 = vmul.f32 %v4017_v57, %v4051_v39 }
 0x108   : > { %5315 = vst [vmem:[#allocation32_spill] sm:$0xff] %v4053_v48  ;;  %v4070_v36 = vld [vmem:[#allocation2 + $0xf] sm:$0xff]  ;;  %v1212_v54 = vmul.f32 %v3935_v1, %v4053_v48  ;;  %v1358_v52 = vmul.f32 %v3954_v20, %v4053_v48  ;;  %v1159_v13 = vadd.f32 %v1139_v46, %v911_v59  ;;  %v1289_v19 = vadd.f32 %v1281_v2, %v1263_v14 }
 0x109   : > { %5317 = vst [vmem:[#allocation34_spill] sm:$0xff] %v4070_v36  ;;  %v1230_v45 = vmul.f32 %v3938_v12, %v4070_v36  ;;  %v1368_v22 = vmul.f32 %v3957_v51, %v4070_v36  ;;  %v1411_v11 = vadd.f32 %v1403_v33, %v1393_v43  ;;  %v1615_v14 = vmul.f32 %v4014_v40, %v4049_v6 }
 0x10a   : > { %v1169_v60 = vadd.f32 %v3848_v5, %v1159_v13  ;;  %v1315_v18 = vadd.f32 %v1307_v31, %v1289_v19 }
 0x10b   : > { %v1238_v3 = vadd.f32 %v1230_v45, %v1212_v54  ;;  %v1376_v38 = vadd.f32 %v1368_v22, %v1358_v52  ;;  %v4099_v2 = vld [vmem:[#allocation2 + $0x11] sm:$0xff]  ;;  %v1570_v54 = vmul.f32 %v3970_v56, %v4053_v48  ;;  %v1429_v19 = vadd.f32 %v1421_v27, %v1411_v11 }
 0x10c   : > { %5319 = vst [vmem:[#allocation26_spill] sm:$0xff] %v4099_v2  ;;  %v4101_v46 = vld [vmem:[#allocation2 + $0x12] sm:$0xff]  ;;  %v1178_v45 = vmax.f32 %v1169_v60, 0.0  ;;  %1331 = vrot.lane.b32.xlu0 %v1315_v18, %s2677_s0  ;;  %v1404_v52 = vmul.f32 %v3967_v49, %v4099_v2  ;;  %v1623_v34 = vadd.f32 %v1615_v14, %v1605_v21  ;;  %v1616_v21 = vmul.f32 %v4014_v40, %v4099_v2 }
 0x10d   : > { %v1264_v59 = vadd.f32 %v1256_v47, %v1238_v3  ;;  %v1394_v43 = vadd.f32 %v1386_v62, %v1376_v38  ;;  %v4103_v33 = vld [vmem:[#allocation2 + $0x16] sm:$0xff]  ;;  %v1282_v47 = vmul.f32 %v3944_v50, %v4099_v2  ;;  %v1580_v62 = vmul.f32 %v3976_v8, %v4070_v36  ;;  %v685_v13 = vpop.permute.xlu1 %684 }
 0x10e   : > { %5320 = vst [vmem:[#allocation35_spill] sm:$0xff] %v4103_v33  ;;  %v4114_v22 = vld [vmem:[#allocation2 + $0x17] sm:$0xff]  ;;  %v1213_v31 = vmul.f32 %v3935_v1, %v4103_v33  ;;  %v1359_v18 = vmul.f32 %v3954_v20, %v4103_v33  ;;  %v4126_v38 = vsel %vm1174_vm0, %v1178_v45, 0.0  ;;  %v1308_v7 = vmul.f32 %v3951_v53, %v4101_v46 }
 0x10f   : > { %5321 = vst [vmem:[#allocation46_spill] sm:$0xff] %v4114_v22  ;;  %v1231_v3 = vmul.f32 %v3938_v12, %v4114_v22  ;;  %5322 = vst [vmem:[#allocation40_spill] sm:$0xff] %v4126_v38  ;;  %v1290_v60 = vadd.f32 %v1282_v47, %v1264_v59  ;;  %v1412_v32 = vadd.f32 %v1404_v52, %v1394_v43 }
 0x110   : > { %1196 = vst [vmem:[#allocation2 + $0x20] sm:$0xff] %v4126_v38  ;;  %v912_v27 = vadd.f32 %v3928_v44, %v685_v13  ;;  %v1369_v42 = vmul.f32 %v3957_v51, %v4114_v22  ;;  %1445 = vrot.lane.b32.xlu0 %v1429_v19, %s5323_s1  ;;  %v1422_v45 = vmul.f32 %v4008_v55, %v4101_v46 }
 0x111   : > { %v1239_v11 = vadd.f32 %v1231_v3, %v1213_v31  ;;  %v1316_v37 = vadd.f32 %v1308_v7, %v1290_v60  ;;  %v1588_v59 = vadd.f32 %v1580_v62, %v1570_v54  ;;  %v1737_v47 = vmul.f32 %v4024_v16, %v4049_v6 }
 0x112   : > { %v1377_v43 = vadd.f32 %v1369_v42, %v1359_v18  ;;  %v4141_v52 = vmul.f32 %v3941_v61, %v4126_v38  ;;  %v4145_v44 = vmul.f32 %v3964_v24, %v4126_v38  ;;  %v1141_v7 = vpop.permute.xlu0 %1140  ;;  %v1430_v14 = vadd.f32 %v1422_v45, %v1412_v32 }
 0x113   : > { %1333 = vrot.lane.b32.xlu1 %v1316_v37, %s2677_s0  ;;  %v1606_v54 = vadd.f32 %v4047_v35, %v1588_v59  ;;  %v1571_v42 = vmul.f32 %v3970_v56, %v4103_v33  ;;  %v1581_v62 = vmul.f32 %v3976_v8, %v4114_v22  ;;  %v1160_v13 = vadd.f32 %v1141_v7, %v912_v27 }
 0x114   : > { %v1265_v19 = vadd.f32 %v4056_v58, %v1239_v11  ;;  %v4156_v31 = vadd.f32 %v1633_v10, %v1623_v34  ;;  %v1692_v3 = vmul.f32 %v3986_v26, %v4053_v48  ;;  %v1634_v37 = vmul.f32 %v4017_v57, %v4101_v46 }
 0x115   : > { %v1589_v32 = vadd.f32 %v1581_v62, %v1571_v42  ;;  %v1745_v35 = vadd.f32 %v1737_v47, %v4058_v15  ;;  %v1702_v18 = vmul.f32 %v3989_v25, %v4070_v36  ;;  %v1170_v60 = vadd.f32 %v3848_v5, %v1160_v13 }
 0x116   : > { %v1395_v27 = vadd.f32 %v4073_v29, %v1377_v43  ;;  %v1624_v45 = vadd.f32 %v1616_v21, %v1606_v54  ;;  %v1755_v34 = vmul.f32 %v4037_v23, %v4051_v39  ;;  %v1738_v47 = vmul.f32 %v4024_v16, %v4099_v2 }
 0x117   : > { %1447 = vrot.lane.b32.xlu1 %v1430_v14, %s5323_s1  ;;  %v4170_v58 = vld [vmem:[#allocation2 + $0x19] sm:$0xff]  ;;  %v1607_v15 = vadd.f32 %v4076_v41, %v1589_v32  ;;  %v1710_v59 = vadd.f32 %v1702_v18, %v1692_v3  ;;  %v1693_v29 = vmul.f32 %v3986_v26, %v4103_v33  ;;  %v1179_v43 = vmax.f32 %v1170_v60, 0.0 }
 0x118   : > { %5324 = vst [vmem:[#allocation28_spill] sm:$0xff] %v4170_v58  ;;  %v4172_v10 = vld [vmem:[#allocation2 + $0x1a] sm:$0xff]  ;;  %v1283_v21 = vmul.f32 %v3944_v50, %v4170_v58  ;;  %v1405_v7 = vmul.f32 %v3967_v49, %v4170_v58  ;;  %v1703_v54 = vmul.f32 %v3989_v25, %v4114_v22  ;;  %v4207_v36 = vadd.f32 %v1755_v34, %v1745_v35 }
 0x119   : > { %5325 = vst [vmem:[#allocation33_spill] sm:$0xff] %v4172_v10  ;;  %v4174_v11 = vld [vmem:[#allocation2 + $0x1e] sm:$0xff]  ;;  %v687_v41 = vpop.permute.xlu1 %686  ;;  %v1309_v42 = vmul.f32 %v3951_v53, %v4172_v10  ;;  %v4199_v32 = vsel %vm1174_vm0, %v1179_v43, 0.0  ;;  %v1423_v22 = vmul.f32 %v4008_v55, %v4172_v10  ;;  %v1756_v48 = vmul.f32 %v4037_v23, %v4101_v46 }
 0x11a   : > { %5326 = vst [vmem:[#allocation36_spill] sm:$0xff] %v4174_v11  ;;  %v4185_v14 = vld [vmem:[#allocation2 + $0x1f] sm:$0xff]  ;;  %v1214_v62 = vmul.f32 %v3935_v1, %v4174_v11  ;;  %v1360_v3 = vmul.f32 %v3954_v20, %v4174_v11  ;;  %5328 = vst [vmem:[#allocation56_spill] sm:$0xff] %v4199_v32  ;;  %v1291_v18 = vadd.f32 %v1283_v21, %v1265_v19 }
 0x11b   : > { %5327 = vst [vmem:[#allocation49_spill] sm:$0xff] %v4185_v14  ;;  %v1232_v13 = vmul.f32 %v3938_v12, %v4185_v14  ;;  %v1413_v60 = vadd.f32 %v1405_v7, %v1395_v27  ;;  %1197 = vst [vmem:[#allocation2 + $0x28] sm:$0xff] %v4199_v32  ;;  %v913_v33 = vadd.f32 %v3961_v28, %v687_v41 }
 0x11c   : > { %v1370_v2 = vmul.f32 %v3957_v51, %v4185_v14  ;;  %v1317_v39 = vadd.f32 %v1309_v42, %v1291_v18  ;;  %v1617_v19 = vmul.f32 %v4014_v40, %v4170_v58  ;;  %v4213_v21 = vadd.f32 %v1634_v37, %v1624_v45 }
 0x11d   : > { %v1431_v43 = vadd.f32 %v1423_v22, %v1413_v60  ;;  %v1240_v6 = vadd.f32 %v1232_v13, %v1214_v62  ;;  %v1728_v7 = vadd.f32 %v4061_v63, %v1710_v59  ;;  %v1711_v28 = vadd.f32 %v1703_v54, %v1693_v29 }
 0x11e   : > { %v1378_v27 = vadd.f32 %v1370_v2, %v1360_v3  ;;  %1335 = vrot.lane.b32.xlu0 %v1317_v39, %s2677_s0  ;;  %v4220_v35 = vmul.f32 %v3941_v61, %v4199_v32  ;;  %v1625_v34 = vadd.f32 %v1617_v19, %v1607_v15  ;;  %v1739_v22 = vmul.f32 %v4024_v16, %v4170_v58 }
 0x11f   : > { %1449 = vrot.lane.b32.xlu1 %v1431_v43, %s5323_s1  ;;  %v1143_v41 = vpop.permute.xlu0 %1142  ;;  %v4226_v2 = vmul.f32 %v3964_v24, %v4199_v32  ;;  %v1635_v63 = vmul.f32 %v4017_v57, %v4172_v10  ;;  %v1729_v39 = vadd.f32 %v4089_v0, %v1711_v28  ;;  %v1572_v37 = vmul.f32 %v3970_v56, %v4174_v11 }
 0x120   : > { %v1161_v45 = vadd.f32 %v1143_v41, %v913_v33  ;;  %v1266_v59 = vadd.f32 %v4141_v52, %v1240_v6  ;;  %v1757_v15 = vmul.f32 %v4037_v23, %v4172_v10  ;;  %v1582_v29 = vmul.f32 %v3976_v8, %v4185_v14 }
 0x121   : > { %v1396_v54 = vadd.f32 %v4145_v44, %v1378_v27  ;;  %v4239_v42 = vadd.f32 %v1635_v63, %v1625_v34  ;;  %v1746_v62 = vadd.f32 %v1738_v47, %v1728_v7  ;;  %v1600_v0 = vmul.f32 %v4011_v17, %v4126_v38 }
 0x122   : > { %v1171_v33 = vadd.f32 %v3848_v5, %v1161_v45  ;;  %v4246_v13 = vld [vmem:[#allocation2 + $0x21] sm:$0xff]  ;;  %v1747_v3 = vadd.f32 %v1739_v22, %v1729_v39  ;;  %v1590_v18 = vadd.f32 %v1582_v29, %v1572_v37  ;;  %v1694_v44 = vmul.f32 %v3986_v26, %v4174_v11 }
 0x123   : > { %5329 = vst [vmem:[#allocation57_spill] sm:$0xff] %v4246_v13  ;;  %v4248_v6 = vld [vmem:[#allocation2 + $0x22] sm:$0xff]  ;;  %v1284_v47 = vmul.f32 %v3944_v50, %v4246_v13  ;;  %v1406_v43 = vmul.f32 %v3967_v49, %v4246_v13  ;;  %v1704_v27 = vmul.f32 %v3989_v25, %v4185_v14  ;;  %v1601_v14 = vmul.f32 %v4011_v17, %v4199_v32 }
 0x124   : > { %5330 = vst [vmem:[#allocation41_spill] sm:$0xff] %v4248_v6  ;;  %v4250_v52 = vld [vmem:[#allocation2 + $0x26] sm:$0xff]  ;;  %v1310_v60 = vmul.f32 %v3951_v53, %v4248_v6  ;;  %v1180_v7 = vmax.f32 %v1171_v33, 0.0  ;;  %v1424_v37 = vmul.f32 %v4008_v55, %v4248_v6  ;;  %v4280_v33 = vadd.f32 %v1756_v48, %v1746_v62 }
 0x125   : > { %5331 = vst [vmem:[#allocation59_spill] sm:$0xff] %v4250_v52  ;;  %v4260_v19 = vld [vmem:[#allocation2 + $0x27] sm:$0xff]  ;;  %v1215_v28 = vmul.f32 %v3935_v1, %v4250_v52  ;;  %v1361_v22 = vmul.f32 %v3954_v20, %v4250_v52  ;;  %v689_v41 = vpop.permute.xlu1 %688  ;;  %v1292_v63 = vadd.f32 %v1284_v47, %v1266_v59  ;;  %v1414_v39 = vadd.f32 %v1406_v43, %v1396_v54 }
 0x126   : > { %5332 = vst [vmem:[#allocation37_spill] sm:$0xff] %v4260_v19  ;;  %v1233_v34 = vmul.f32 %v3938_v12, %v4260_v19  ;;  %v1371_v45 = vmul.f32 %v3957_v51, %v4260_v19  ;;  %v4278_v29 = vsel %vm1174_vm0, %v1180_v7, 0.0  ;;  %v1608_v10 = vadd.f32 %v1600_v0, %v1590_v18 }
 0x127   : > { %5333 = vst [vmem:[#allocation38_spill] sm:$0xff] %v4278_v29  ;;  %v1722_v59 = vmul.f32 %v4021_v9, %v4126_v38  ;;  %1198 = vst [vmem:[#allocation2 + $0x30] sm:$0xff] %v4278_v29  ;;  %v914_v54 = vadd.f32 %v3880_v30, %v689_v41  ;;  %v1318_v47 = vadd.f32 %v1310_v60, %v1292_v63  ;;  %v4301_v18 = vstv %s4243_s3 }
 0x128   : > { %v1432_v43 = vadd.f32 %v1424_v37, %v1414_v39  ;;  %v1241_v11 = vadd.f32 %v1233_v34, %v1215_v28  ;;  %v1379_v58 = vadd.f32 %v1371_v45, %v1361_v22  ;;  %v4288_v7 = vadd.f32 %v1757_v15, %v1747_v3 }
 0x129   : > { %v1618_v48 = vmul.f32 %v4014_v40, %v4246_v13  ;;  %1337 = vrot.lane.b32.xlu0 %v1318_v47, %s2677_s0  ;;  %v4296_v62 = vmul.f32 %v3964_v24, %v4278_v29  ;;  %v1636_v30 = vmul.f32 %v4017_v57, %v4248_v6  ;;  %v1712_v0 = vadd.f32 %v1704_v27, %v1694_v44 }
 0x12a   : > { %1451 = vrot.lane.b32.xlu1 %v1432_v43, %s5323_s1  ;;  %v1145_v60 = vpop.permute.xlu0 %1144  ;;  %v1740_v3 = vmul.f32 %v4024_v16, %v4246_v13  ;;  %v1573_v28 = vmul.f32 %v3970_v56, %v4250_v52  ;;  %v1583_v34 = vmul.f32 %v3976_v8, %v4260_v19  ;;  %v1695_v63 = vmul.f32 %v3986_v26, %v4250_v52 }
 0x12b   : > { %v1626_v15 = vadd.f32 %v1618_v48, %v1608_v10  ;;  %v1162_v22 = vadd.f32 %v1145_v60, %v914_v54  ;;  %v1730_v41 = vadd.f32 %v1722_v59, %v1712_v0  ;;  %v1705_v44 = vmul.f32 %v3989_v25, %v4260_v19  ;;  %v5337_v19 = vld [vmem:[#allocation31_spill] sm:$0xff] }
 0x12c   : > { %v1267_v10 = vadd.f32 %v4220_v35, %v1241_v11  ;;  %v1397_v27 = vadd.f32 %v4226_v2, %v1379_v58  ;;  %v1260_v39 = vmul.f32 %v3941_v61, %v4278_v29  ;;  %v1591_v37 = vadd.f32 %v1583_v34, %v1573_v28 }
 0x12d   : > { %v1172_v45 = vadd.f32 %v3848_v5, %v1162_v22  ;;  %1657 = vrot.lane.b32.xlu0 %v4156_v31, %s5334_s17  ;;  %v4322_v59 = vadd.f32 %v1636_v30, %v1626_v15  ;;  %v1758_v54 = vmul.f32 %v4037_v23, %v4248_v6  ;;  %v4327_v11 = vstv %s4274_s15  ;;  %s5021_s15 = scalar_lea.hbm %s5072_s9, %s2485_s12 }
 0x12e   : > { %1659 = vrot.lane.b32.xlu1 %v4213_v21, %s5334_s17  ;;  %v4329_v58 = vld [vmem:[#allocation2 + $0x29] sm:$0xff]  ;;  %v1748_v47 = vadd.f32 %v1740_v3, %v1730_v41  ;;  %v1713_v43 = vadd.f32 %v1705_v44, %v1695_v63  ;;  %v1723_v31 = vmul.f32 %v4021_v9, %v4199_v32  ;;  %v4339_v21 = vmul.f32 %v4011_v17, %v4278_v29 }
 0x12f   : > { %v4331_v35 = vld [vmem:[#allocation2 + $0x2a] sm:$0xff]  ;;  %v1181_v48 = vmax.f32 %v1172_v45, 0.0  ;;  %v1285_v30 = vmul.f32 %v3944_v50, %v4329_v58  ;;  %v1407_v0 = vmul.f32 %v3967_v49, %v4329_v58  ;;  %v1609_v15 = vadd.f32 %v1601_v14, %v1591_v37 }
 0x130   : > { %5335 = vst [vmem:[#allocation39_spill] sm:$0xff] %v4331_v35  ;;  %v4333_v2 = vld [vmem:[#allocation2 + $0x2e] sm:$0xff]  ;;  %v691_v28 = vpop.permute.xlu1 %690  ;;  %v1311_v3 = vmul.f32 %v3951_v53, %v4331_v35  ;;  %v1425_v14 = vmul.f32 %v4008_v55, %v4331_v35  ;;  %v4366_v6 = vmul.f32 %v4021_v9, %v4278_v29  ;;  %v1525_v52 = vmul.f32 %v4301_v18, %v5337_v19 }
 0x131   : > { %v4345_v60 = vld [vmem:[#allocation2 + $0x2f] sm:$0xff]  ;;  %v1362_v34 = vmul.f32 %v3954_v20, %v4333_v2  ;;  %v1216_v41 = vmul.f32 %v3935_v1, %v4333_v2  ;;  %v4357_v63 = vsel %vm1174_vm0, %v1181_v48, 0.0  ;;  %v1293_v44 = vadd.f32 %v1285_v30, %v1267_v10 }
 0x132   : > { %5336 = vst [vmem:[#allocation60_spill] sm:$0xff] %v4345_v60  ;;  %v1372_v22 = vmul.f32 %v3957_v51, %v4345_v60  ;;  %v1415_v45 = vadd.f32 %v1407_v0, %v1397_v27  ;;  %1199 = vst [vmem:[#allocation2 + $0x38] sm:$0xff] %v4357_v63  ;;  %v1234_v32 = vmul.f32 %v3938_v12, %v4345_v60  ;;  %v5338_v48 = vld [vmem:[#allocation21_spill] sm:$0xff]  ;;  %v5339_v29 = vld [vmem:[#allocation24_spill] sm:$0xff] }
 0x133   : > { %v915_v13 = vadd.f32 %v5338_v48, %v691_v28  ;;  %v1319_v10 = vadd.f32 %v1311_v3, %v1293_v44  ;;  %v1619_v30 = vmul.f32 %v4014_v40, %v4329_v58  ;;  %v4383_v38 = vmul.f32 %v4327_v11, %v5339_v29 }
 0x134   : > { %v1380_v37 = vadd.f32 %v1372_v22, %v1362_v34  ;;  %v1433_v27 = vadd.f32 %v1425_v14, %v1415_v45  ;;  %v1242_v0 = vadd.f32 %v1234_v32, %v1216_v41  ;;  %v4375_v34 = vmul.f32 %v3964_v24, %v4357_v63 }
 0x135   : > { %v4379_v22 = vmul.f32 %v3941_v61, %v4357_v63  ;;  %1339 = vrot.lane.b32.xlu0 %v1319_v10, %s2677_s0  ;;  %v4387_v19 = vadd.f32 %v1758_v54, %v1748_v47  ;;  %v1731_v28 = vadd.f32 %v1723_v31, %v1713_v43  ;;  %v1741_v32 = vmul.f32 %v4024_v16, %v4329_v58 }
 0x136   : > { %1453 = vrot.lane.b32.xlu1 %v1433_v27, %s5323_s1  ;;  %v1147_v3 = vpop.permute.xlu1 %1146  ;;  %v1398_v41 = vadd.f32 %v4296_v62, %v1380_v37  ;;  %v1574_v44 = vmul.f32 %v3970_v56, %v4333_v2  ;;  %v1584_v29 = vmul.f32 %v3976_v8, %v4345_v60  ;;  %v1696_v45 = vmul.f32 %v3986_v26, %v4333_v2  ;;  %v5340_v37 = vld [vmem:[#allocation30_spill] sm:$0xff] }
 0x137   : > { %v1163_v14 = vadd.f32 %v1147_v3, %v915_v13  ;;  %v1627_v48 = vadd.f32 %v1619_v30, %v1609_v15  ;;  %v1637_v54 = vmul.f32 %v4017_v57, %v4331_v35  ;;  %v1706_v47 = vmul.f32 %v3989_v25, %v4345_v60 }
 0x138   : > { %v1268_v43 = vadd.f32 %v1260_v39, %v1242_v0  ;;  %v1759_v62 = vmul.f32 %v4037_v23, %v4331_v35  ;;  %v1592_v31 = vadd.f32 %v1584_v29, %v1574_v44  ;;  %v1533_v10 = vadd.f32 %v1525_v52, %v5340_v37 }
 0x139   : > { %v1173_v27 = vadd.f32 %v3848_v5, %v1163_v14  ;;  %1661 = vrot.lane.b32.xlu0 %v4239_v42, %s5334_s17  ;;  %v4410_v13 = vld [vmem:[#allocation2 + $0x31] sm:$0xff]  ;;  %v1749_v30 = vadd.f32 %v1741_v32, %v1731_v28  ;;  %v1714_v0 = vadd.f32 %v1706_v47, %v1696_v45  ;;  %v1725_v4 = vmul.f32 %v4021_v9, %v4357_v63 }
 0x13a   : > { %1779 = vrot.lane.b32.xlu1 %v4207_v36, %s2678_s20  ;;  %v4412_v15 = vld [vmem:[#allocation2 + $0x32] sm:$0xff]  ;;  %v1408_v52 = vmul.f32 %v3967_v49, %v4410_v13  ;;  %v1286_v42 = vmul.f32 %v3944_v50, %v4410_v13  ;;  %v1610_v37 = vadd.f32 %v4339_v21, %v1592_v31  ;;  %v1620_v35 = vmul.f32 %v4014_v40, %v4410_v13 }
 0x13b   : > { %5341 = vst [vmem:[#allocation42_spill] sm:$0xff] %v4412_v15  ;;  %v4414_v39 = vld [vmem:[#allocation2 + $0x36] sm:$0xff]  ;;  %v1426_v5 = vmul.f32 %v4008_v55, %v4412_v15  ;;  %v1312_v36 = vmul.f32 %v3951_v53, %v4412_v15  ;;  %v1182_v44 = vmax.f32 %v1173_v27, 0.0  ;;  %v4441_v27 = vadd.f32 %v1637_v54, %v1627_v48 }
 0x13c   : > { %v4424_v3 = vld [vmem:[#allocation2 + $0x37] sm:$0xff]  ;;  %v1363_v29 = vmul.f32 %v3954_v20, %v4414_v39  ;;  %v1217_v32 = vmul.f32 %v3935_v1, %v4414_v39  ;;  %v1416_v45 = vadd.f32 %v1408_v52, %v1398_v41  ;;  %v1294_v14 = vadd.f32 %v1286_v42, %v1268_v43 }
 0x13d   : > { %v1373_v28 = vmul.f32 %v3957_v51, %v4424_v3  ;;  %v1235_v47 = vmul.f32 %v3938_v12, %v4424_v3  ;;  %v4437_v60 = vsel %vm1174_vm0, %v1182_v44, 0.0  ;;  %1781 = vrot.lane.b32.xlu0 %v4280_v33, %s2678_s20  ;;  %v1603_v41 = vmul.f32 %v4011_v17, %v4357_v63 }
 0x13e   : > { %1200 = vst [vmem:[#allocation2 + $0x40] sm:$0xff] %v4437_v60  ;;  %v1320_v43 = vadd.f32 %v1312_v36, %v1294_v14  ;;  %v4448_v21 = vadd.f32 %v1759_v62, %v1749_v30  ;;  %v1434_v31 = vadd.f32 %v1426_v5, %v1416_v45  ;;  %v1638_v33 = vmul.f32 %v4017_v57, %v4412_v15  ;;  %v5343_v14 = vld [vmem:[#allocation32_spill] sm:$0xff] }
 0x13f   : > { %v1381_v52 = vadd.f32 %v1373_v28, %v1363_v29  ;;  %v1243_v42 = vadd.f32 %v1235_v47, %v1217_v32  ;;  %v1732_v48 = vadd.f32 %v4366_v6, %v1714_v0  ;;  %v1392_v54 = vmul.f32 %v3964_v24, %v4437_v60  ;;  %v5344_v47 = vld [vmem:[#allocation22_spill] sm:$0xff] }
 0x140   : > { %1341 = vrot.lane.b32.xlu1 %v1320_v43, %s2677_s0  ;;  %v1628_v44 = vadd.f32 %v1620_v35, %v1610_v37  ;;  %v1742_v62 = vmul.f32 %v4024_v16, %v4410_v13  ;;  %v1575_v30 = vmul.f32 %v3970_v56, %v4414_v39  ;;  %v1760_v5 = vmul.f32 %v4037_v23, %v4412_v15  ;;  %v5345_v43 = vld [vmem:[#allocation34_spill] sm:$0xff] }
 0x141   : > { %1455 = vrot.lane.b32.xlu0 %v1434_v31, %s5323_s1  ;;  %v1585_v6 = vmul.f32 %v3976_v8, %v4424_v3  ;;  %v1697_v0 = vmul.f32 %v3986_v26, %v4414_v39  ;;  %v1707_v24 = vmul.f32 %v3989_v25, %v4424_v3  ;;  %v1399_v35 = vadd.f32 %v4375_v34, %v1381_v52  ;;  %v5346_v31 = vld [vmem:[#allocation23_spill] sm:$0xff] }
 0x142   : > { %v1262_v36 = vmul.f32 %v3941_v61, %v4437_v60  ;;  %v1750_v29 = vadd.f32 %v1742_v62, %v1732_v48  ;;  %v4475_v28 = vadd.f32 %v4383_v38, %v1533_v10  ;;  %v1480_v37 = vmul.f32 %v5344_v47, %v5343_v14 }
 0x143   : > { %v1593_v32 = vadd.f32 %v1585_v6, %v1575_v30  ;;  %v1715_v45 = vadd.f32 %v1707_v24, %v1697_v0  ;;  %v1490_v15 = vmul.f32 %v5346_v31, %v5345_v43  ;;  %v1269_v34 = vadd.f32 %v4379_v22, %v1243_v42 }
 0x144   : > { %5342 = vst [vmem:[#allocation51_spill] sm:$0xff] %v4475_v28  ;;  %1663 = vrot.lane.b32.xlu1 %v4322_v59, %s5334_s17  ;;  %v4484_v52 = vadd.f32 %v1638_v33, %v1628_v44  ;;  %v1604_v61 = vmul.f32 %v4011_v17, %v4437_v60  ;;  %v4490_v38 = vmul.f32 %v4021_v9, %v4437_v60  ;;  %v5347_v33 = vld [vmem:[#allocation26_spill] sm:$0xff] }
 0x145   : > { %1783 = vrot.lane.b32.xlu0 %v4288_v7, %s2678_s20  ;;  %v4494_v10 = vld [vmem:[#allocation2 + $0x39] sm:$0xff]  ;;  %v4500_v59 = vadd.f32 %v1760_v5, %v1750_v29  ;;  %v1611_v22 = vadd.f32 %v1603_v41, %v1593_v32  ;;  %v1498_v42 = vadd.f32 %v1490_v15, %v1480_v37  ;;  %v1526_v17 = vmul.f32 %v4301_v18, %v5347_v33  ;;  %v4514_v5 = vld [vmem:[#allocation2 + $0x41] sm:$0xff] }
 0x146   : > { %v4496_v48 = vld [vmem:[#allocation2 + $0x3a] sm:$0xff]  ;;  %v1409_v9 = vmul.f32 %v3967_v49, %v4494_v10  ;;  %v1287_v7 = vmul.f32 %v3944_v50, %v4494_v10  ;;  %v4516_v15 = vld [vmem:[#allocation2 + $0x42] sm:$0xff]  ;;  %v1410_v24 = vmul.f32 %v3967_v49, %v4514_v5  ;;  %v1733_v29 = vadd.f32 %v1725_v4, %v1715_v45 }
 0x147   : > { %v4498_v62 = vld [vmem:[#allocation2 + $0x3e] sm:$0xff]  ;;  %v1427_v44 = vmul.f32 %v4008_v55, %v4496_v48  ;;  %v1313_v30 = vmul.f32 %v3951_v53, %v4496_v48  ;;  %v1428_v28 = vmul.f32 %v4008_v55, %v4516_v15  ;;  %v1639_v45 = vmul.f32 %v4017_v57, %v4496_v48 }
 0x148   : > { %v4512_v6 = vld [vmem:[#allocation2 + $0x3f] sm:$0xff]  ;;  %v1364_v41 = vmul.f32 %v3954_v20, %v4498_v62  ;;  %v1417_v32 = vadd.f32 %v1409_v9, %v1399_v35  ;;  %v1295_v14 = vadd.f32 %v1287_v7, %v1269_v34  ;;  %v1218_v37 = vmul.f32 %v3935_v1, %v4498_v62 }
 0x149   : > { %v1374_v0 = vmul.f32 %v3957_v51, %v4512_v6  ;;  %v1236_v43 = vmul.f32 %v3938_v12, %v4512_v6  ;;  %v1288_v20 = vmul.f32 %v3944_v50, %v4514_v5  ;;  %v1621_v51 = vmul.f32 %v4014_v40, %v4494_v10 }
 0x14a   : > { %v1435_v49 = vadd.f32 %v1427_v44, %v1417_v32  ;;  %v1321_v4 = vadd.f32 %v1313_v30, %v1295_v14  ;;  %v1743_v12 = vmul.f32 %v4024_v16, %v4494_v10  ;;  %v1761_v55 = vmul.f32 %v4037_v23, %v4496_v48 }
 0x14b   : > { %v1382_v33 = vadd.f32 %v1374_v0, %v1364_v41  ;;  %v1244_v35 = vadd.f32 %v1236_v43, %v1218_v37  ;;  %v1629_v34 = vadd.f32 %v1621_v51, %v1611_v22  ;;  %v1576_v9 = vmul.f32 %v3970_v56, %v4498_v62  ;;  %v5348_v22 = vld [vmem:[#allocation35_spill] sm:$0xff]  ;;  %v5349_v41 = vld [vmem:[#allocation46_spill] sm:$0xff]  ;;  %v5351_v51 = vld [vmem:[#allocation28_spill] sm:$0xff] }
 0x14c   : > { %1457 = vrot.lane.b32.xlu0 %v1435_v49, %s5323_s1  ;;  %1343 = vrot.lane.b32.xlu1 %v1321_v4, %s2677_s0  ;;  %v1586_v44 = vmul.f32 %v3976_v8, %v4512_v6  ;;  %v1481_v30 = vmul.f32 %v5344_v47, %v5348_v22  ;;  %v1491_v0 = vmul.f32 %v5346_v31, %v5349_v41  ;;  %v5352_v4 = vld [vmem:[#allocation36_spill] sm:$0xff]  ;;  %v5358_v22 = vld [vmem:[#allocation33_spill] sm:$0xff]  ;;  %v5359_v41 = vld [vmem:[#allocation59_spill] sm:$0xff] }
 0x14d   : > { %v1400_v1 = vadd.f32 %v1392_v54, %v1382_v33  ;;  %v1270_v50 = vadd.f32 %v1262_v36, %v1244_v35  ;;  %v1751_v54 = vadd.f32 %v1743_v12, %v1733_v29  ;;  %v1314_v14 = vmul.f32 %v3951_v53, %v4516_v15  ;;  %v5350_v33 = vld [vmem:[#allocation25_spill] sm:$0xff]  ;;  %v5355_v12 = vld [vmem:[#allocation40_spill] sm:$0xff] }
 0x14e   : > { %v1594_v37 = vadd.f32 %v1586_v44, %v1576_v9  ;;  %v1698_v36 = vmul.f32 %v3986_v26, %v4498_v62  ;;  %v1647_v43 = vadd.f32 %v1639_v45, %v1629_v34  ;;  %v1708_v8 = vmul.f32 %v3989_v25, %v4512_v6  ;;  %v5353_v35 = vld [vmem:[#allocation49_spill] sm:$0xff] }
 0x14f   : > { %v1418_v7 = vadd.f32 %v1410_v24, %v1400_v1  ;;  %v1296_v32 = vadd.f32 %v1288_v20, %v1270_v50  ;;  %v1544_v24 = vmul.f32 %v4327_v11, %v4101_v46  ;;  %v4562_v29 = vadd.f32 %v1761_v55, %v1751_v54  ;;  %v5356_v55 = vld [vmem:[#allocation29_spill] sm:$0xff] }
 0x150   : > { %1785 = vrot.lane.b32.xlu0 %v4387_v19, %s2678_s20  ;;  %1665 = vrot.lane.b32.xlu1 %v4441_v27, %s5334_s17  ;;  %v1622_v53 = vmul.f32 %v4014_v40, %v4514_v5  ;;  %v1640_v26 = vmul.f32 %v4017_v57, %v4516_v15  ;;  %v1516_v25 = vadd.f32 %v5350_v33, %v1498_v42  ;;  %v5354_v42 = vld [vmem:[#allocation27_spill] sm:$0xff]  ;;  %v5357_v9 = vld [vmem:[#allocation57_spill] sm:$0xff] }
 0x151   : > { %v1436_v56 = vadd.f32 %v1428_v28, %v1418_v7  ;;  %v1612_v28 = vadd.f32 %v1604_v61, %v1594_v37  ;;  %v1499_v20 = vadd.f32 %v1491_v0, %v1481_v30  ;;  %v1527_v46 = vmul.f32 %v4301_v18, %v5351_v51 }
 0x152   : > { %v1322_v49 = vadd.f32 %v1314_v14, %v1296_v32  ;;  %v1716_v19 = vadd.f32 %v1708_v8, %v1698_v36  ;;  %v1482_v27 = vmul.f32 %v5344_v47, %v5352_v4  ;;  %v1492_v45 = vmul.f32 %v5346_v31, %v5353_v35  ;;  %v5360_v32 = vld [vmem:[#allocation37_spill] sm:$0xff]  ;;  %v5362_v8 = vld [vmem:[#allocation56_spill] sm:$0xff] }
 0x153   : > { %v1744_v40 = vmul.f32 %v4024_v16, %v4514_v5  ;;  %v1762_v57 = vmul.f32 %v4037_v23, %v4516_v15  ;;  %v1534_v61 = vadd.f32 %v1526_v17, %v1516_v25  ;;  %v1517_v1 = vadd.f32 %v5354_v42, %v1499_v20  ;;  %v5361_v36 = vld [vmem:[#allocation41_spill] sm:$0xff]  ;;  %v5363_v20 = vld [vmem:[#allocation39_spill] sm:$0xff] }
 0x154   : > { %1459 = vrot.lane.b32.xlu0 %v1436_v56, %s5323_s1  ;;  %1345 = vrot.lane.b32.xlu1 %v1322_v49, %s2677_s0  ;;  %v1500_v34 = vadd.f32 %v1492_v45, %v1482_v27  ;;  %v1510_v50 = vmul.f32 %v5356_v55, %v5355_v12  ;;  %v1528_v44 = vmul.f32 %v4301_v18, %v5357_v9  ;;  %s2196_s0 = sshll.u32 %s353_s28, 4  ;;  %s5023_s0 = int_to_ptr.vmem [resolvable:$true] %s2196_s0 }
 0x155   : > { %v1630_v7 = vadd.f32 %v1622_v53, %v1612_v28  ;;  %v4586_v54 = vadd.f32 %v1544_v24, %v1534_v61  ;;  %v1535_v16 = vadd.f32 %v1527_v46, %v1517_v1  ;;  %v1545_v23 = vmul.f32 %v4327_v11, %v5358_v22  ;;  %v5364_v46 = vld [vmem:[#allocation60_spill] sm:$0xff]  ;;  %v5366_v1 = vld [vmem:[#allocation42_spill] sm:$0xff] }
 0x156   : > { %v1734_v17 = vadd.f32 %v4490_v38, %v1716_v19  ;;  %v1518_v30 = vadd.f32 %v1510_v50, %v1500_v34  ;;  %v1483_v0 = vmul.f32 %v5344_v47, %v5359_v41  ;;  %v1493_v14 = vmul.f32 %v5346_v31, %v5360_v32  ;;  %v5365_v19 = vld [vmem:[#allocation38_spill] sm:$0xff]  ;;  %v5367_v32 = vld [vmem:[#allocation51_spill] sm:$0xff] }
 0x157   : > { %v4595_v37 = vadd.f32 %v1545_v23, %v1535_v16  ;;  %v1546_v56 = vmul.f32 %v4327_v11, %v5361_v36  ;;  %v1511_v24 = vmul.f32 %v5356_v55, %v5362_v8  ;;  %v1529_v53 = vmul.f32 %v4301_v18, %v4329_v58 }
 0x158   : > { %1787 = vrot.lane.b32.xlu0 %v4448_v21, %s2678_s20  ;;  %1667 = vrot.lane.b32.xlu1 %v4484_v52, %s5334_s17  ;;  %v1536_v38 = vadd.f32 %v1528_v44, %v1518_v30  ;;  %v1501_v28 = vadd.f32 %v1493_v14, %v1483_v0  ;;  %v1484_v33 = vmul.f32 %v5344_v47, %v4333_v2  ;;  %v4665_v8 = vstv %s1811_s19  ;;  %s2604_s19 = sshll.u32 %s2680_s2, 4  ;;  %s2605_s19 = int_to_ptr.vmem [resolvable:$false] %s2604_s19 }
 0x159   : > { %v1648_v25 = vadd.f32 %v1640_v26, %v1630_v7  ;;  %v1547_v51 = vmul.f32 %v4327_v11, %v5363_v20  ;;  %v1494_v49 = vmul.f32 %v5346_v31, %v5364_v46  ;;  %v1512_v58 = vmul.f32 %v5356_v55, %v5365_v19  ;;  %v2413_v19 = vld [vmem:[%s5068_s5 + $0x40] sm:$0xff]  ;;  %s2606_s23 = scalar_lea.vmem %s2605_s19, 32  ;;  %p2607_p8 = scmp.lt.s32.totalorder %s5023_s0, %s2605_s19 }
 0x15a   : > { %v4615_v4 = vadd.f32 %v1546_v56, %v1536_v38  ;;  %v1519_v21 = vadd.f32 %v1511_v24, %v1501_v28  ;;  %v1485_v52 = vmul.f32 %v5344_v47, %v4414_v39  ;;  %v1495_v27 = vmul.f32 %v5346_v31, %v4424_v3 }
 0x15b   : > { %v1502_v2 = vadd.f32 %v1494_v49, %v1484_v33  ;;  %v1530_v26 = vmul.f32 %v4301_v18, %v4410_v13  ;;  %v1513_v35 = vmul.f32 %v5356_v55, %v4357_v63  ;;  %v1531_v45 = vmul.f32 %v4301_v18, %v4494_v10  ;;  %v1829_v49 = vld [vmem:[%s5068_s5] sm:$0xff] }
 0x15c   : > { %1789 = vrot.lane.b32.xlu0 %v4500_v59, %s2678_s20  ;;  %1669 = vrot.lane.b32.xlu1 %v1647_v43, %s5334_s17  ;;  %v1537_v61 = vadd.f32 %v1529_v53, %v1519_v21  ;;  %v1503_v39 = vadd.f32 %v1495_v27, %v1485_v52  ;;  %v1486_v3 = vmul.f32 %v5344_v47, %v4498_v62  ;;  %v2414_v21 = vld [vmem:[%s5068_s5 + $0x48] sm:$0xff]  ;;  %v2421_v52 = vld [vmem:[%s5068_s5 + $0x80] sm:$0xff] }
 0x15d   : > { %v1520_v42 = vadd.f32 %v1512_v58, %v1502_v2  ;;  %v1548_v13 = vmul.f32 %v4327_v11, %v5366_v1  ;;  %v1496_v63 = vmul.f32 %v5346_v31, %v4512_v6  ;;  %v1514_v10 = vmul.f32 %v5356_v55, %v4437_v60  ;;  %v2429_v27 = vld [vmem:[%s5068_s5 + $0xc0] sm:$0xff]  ;;  %v2422_v1 = vld [vmem:[%s5068_s5 + $0x88] sm:$0xff] }
 0x15e   : > { %v1752_v34 = vadd.f32 %v1744_v40, %v1734_v17  ;;  %v4638_v12 = vadd.f32 %v1547_v51, %v1537_v61  ;;  %v1521_v59 = vadd.f32 %v1513_v35, %v1503_v39  ;;  %v1549_v43 = vmul.f32 %v4327_v11, %v4496_v48  ;;  %v2477_v35 = vld [vmem:[%s5068_s5 + $0x240] sm:$0xff] }
 0x15f   : > { %v1538_v50 = vadd.f32 %v1530_v26, %v1520_v42  ;;  %v1504_v9 = vadd.f32 %v1496_v63, %v1486_v3  ;;  %v1532_v47 = vmul.f32 %v4301_v18, %v4514_v5  ;;  %v1550_v6 = vmul.f32 %v4327_v11, %v4516_v15  ;;  %v2445_v61 = vld [vmem:[%s5068_s5 + $0x140] sm:$0xff] }
 0x160   : > { %1791 = vrot.lane.b32.xlu0 %v4562_v29, %s2678_s20  ;;  %1671 = vrot.lane.b32.xlu1 %v1648_v25, %s5334_s17  ;;  %v1539_v31 = vadd.f32 %v1531_v45, %v1521_v59  ;;  %v1770_v40 = vadd.f32 %v1762_v57, %v1752_v34  ;;  %v2437_v45 = vld [vmem:[%s5068_s5 + $0x100] sm:$0xff]  ;;  %s2184_s17 = scalar_lea.sflag [#allocation6], %s352_s25 }
 0x161   : > { %v4647_v62 = vadd.f32 %v1548_v13, %v1538_v50  ;;  %v1522_v60 = vadd.f32 %v1514_v10, %v1504_v9  ;;  %v2430_v13 = vld [vmem:[%s5068_s5 + $0xc8] sm:$0xff]  ;;  %v2453_v63 = vld [vmem:[%s5068_s5 + $0x180] sm:$0xff] }
 0x162   : > { %v4651_v55 = vadd.f32 %v1549_v43, %v1539_v31  ;;  %v2470_v50 = vld [vmem:[%s5068_s5 + $0x208] sm:$0xff] }
 0x163   : > { %v1540_v48 = vadd.f32 %v1532_v47, %v1522_v60  ;;  %v2478_v9 = vld [vmem:[%s5068_s5 + $0x248] sm:$0xff]  ;;  %v2461_v47 = vld [vmem:[%s5068_s5 + $0x1c0] sm:$0xff] }
 0x164   : > { %1793 = vrot.lane.b32.xlu1 %v1770_v40, %s2678_s20  ;;  %s2600_s20 = scalar_lea.vmem %s5023_s0, 16 }
 0x165   : > { %v4654_v44 = vadd.f32 %v1550_v6, %v1540_v48  ;;  %p2601_p10 = scmp.ne.s32.totalorder %s5023_s0, %s2600_s20  ;;  %p2608_p11 = scmp.lt.s32.totalorder %s2606_s23, %s2600_s20 }
 0x167   : > { %p2602_p0 = pnand %p2601_p10, %p5368_p12  ;;  %p2609_p13 = por %p2608_p11, %p2607_p8 }
 0x169   : > { %p2603_p7 = pneg %p2602_p0 }
 0x16b   : > { %p2610_p1 = pnand %p2609_p13, %p2603_p7 }
 0x17e   : > { %v1332_v18 = vpop.permute.xlu0 %1331 }
 0x182   : > { %v1446_v29 = vpop.permute.xlu0 %1445 }
 0x183   : > { %v1469_v15 = vadd.f32 %v1446_v29, %v1332_v18  ;;  %v2438_v29 = vld [vmem:[%s5068_s5 + $0x108] sm:$0xff] }
 0x185   : > { %v1334_v5 = vpop.permute.xlu1 %1333  ;;  %v1559_v14 = vadd.f32 %v5367_v32, %v1469_v15  ;;  %v2446_v15 = vld [vmem:[%s5068_s5 + $0x148] sm:$0xff] }
 0x186   : > { %v2462_v32 = vld [vmem:[%s5068_s5 + $0x1c8] sm:$0xff] }
 0x189   : > { %v1448_v7 = vpop.permute.xlu1 %1447 }
 0x18a   : > { %v1470_v0 = vadd.f32 %v1448_v7, %v1334_v5 }
 0x18c   : > { %v1560_v53 = vadd.f32 %v4586_v54, %v1470_v0  ;;  %v1830_v54 = vld [vmem:[%s5068_s5 + $0x8] sm:$0xff] }
 0x18d   : > { %v2454_v0 = vld [vmem:[%s5068_s5 + $0x188] sm:$0xff] }
 0x190   : > { %v1336_v16 = vpop.permute.xlu0 %1335 }
 0x191   : > { %v1450_v22 = vpop.permute.xlu1 %1449 }
 0x192   : > { %v1471_v28 = vadd.f32 %v1450_v22, %v1336_v16 }
 0x194   : > { %v1561_v58 = vadd.f32 %v4595_v37, %v1471_v28  ;;  %v2469_v37 = vld [vmem:[%s5068_s5 + $0x200] sm:$0xff] }
 0x19b   : > { %v4656_v23 = vpop.permute.xlu0 %1337 }
 0x19c   : > { %v4658_v17 = vpop.permute.xlu1 %1451 }
 0x19f   : > { %v1658_v30 = vpop.permute.xlu0 %1657 }
 0x1a0   : > { %v1660_v11 = vpop.permute.xlu1 %1659  ;;  %v1681_v36 = vadd.f32 %v1658_v30, %v1559_v14 }
 0x1a1   : > { %v1682_v33 = vadd.f32 %v1660_v11, %v1560_v53 }
 0x1a7   : > { %v4660_v57 = vpop.permute.xlu0 %1339 }
 0x1a8   : > { %v4662_v41 = vpop.permute.xlu1 %1453 }
 0x1ab   : > { %v1662_v56 = vpop.permute.xlu0 %1661 }
 0x1ac   : > { %v1780_v24 = vpop.permute.xlu1 %1779  ;;  %v1683_v39 = vadd.f32 %v1662_v56, %v1561_v58 }
 0x1ad   : > { %v1803_v38 = vadd.f32 %v1780_v24, %v1681_v36 }
 0x1af   : > { %v1813_v25 = vadd.f32 %v4665_v8, %v1803_v38  ;;  %v1782_v20 = vpop.permute.xlu0 %1781 }
 0x1b0   : > { %v1804_v46 = vadd.f32 %v1782_v20, %v1682_v33 }
 0x1b1   : > { %v1821_v51 = vmax.f32 %v1813_v25, 0.0 }
 0x1b2   : > { %v1814_v2 = vadd.f32 %v4665_v8, %v1804_v46  ;;  %v4692_v26 = vpop.permute.xlu1 %1341 }
 0x1b3   : > { %v4703_v3 = vpop.permute.xlu0 %1455  ;;  %v1837_v42 = vmul.f32 %v1829_v49, %v1821_v51  ;;  %v1867_v34 = vmul.f32 %v2413_v19, %v1821_v51  ;;  %v1897_v59 = vmul.f32 %v2421_v52, %v1821_v51  ;;  %v1927_v43 = vmul.f32 %v2429_v27, %v1821_v51  ;;  %v1831_v49 = vld [vmem:[%s5068_s5 + $0x10] sm:$0xff] }
 0x1b4   : > { %v1822_v10 = vmax.f32 %v1814_v2, 0.0  ;;  %v2077_v31 = vmul.f32 %v2469_v37, %v1821_v51  ;;  %v2107_v60 = vmul.f32 %v2477_v35, %v1821_v51  ;;  %v1957_v6 = vmul.f32 %v2437_v45, %v1821_v51  ;;  %v2423_v52 = vld [vmem:[%s5068_s5 + $0x90] sm:$0xff] }
 0x1b5   : > { %v1987_v40 = vmul.f32 %v2445_v61, %v1821_v51  ;;  %v2017_v7 = vmul.f32 %v2453_v63, %v1821_v51  ;;  %v2047_v14 = vmul.f32 %v2461_v47, %v1821_v51  ;;  %v1472_v51 = vadd.f32 %v4658_v17, %v4656_v23  ;;  %v2431_v27 = vld [vmem:[%s5068_s5 + $0xd0] sm:$0xff] }
 0x1b6   : > { %v1838_v48 = vmul.f32 %v1830_v54, %v1822_v10  ;;  %v1868_v18 = vmul.f32 %v2414_v21, %v1822_v10  ;;  %v1898_v5 = vmul.f32 %v2422_v1, %v1822_v10  ;;  %v1928_v22 = vmul.f32 %v2430_v13, %v1822_v10  ;;  %v1664_v36 = vpop.permute.xlu1 %1663  ;;  %v2415_v21 = vld [vmem:[%s5068_s5 + $0x50] sm:$0xff] }
 0x1b7   : > { %v1784_v16 = vpop.permute.xlu0 %1783  ;;  %v2078_v30 = vmul.f32 %v2470_v50, %v1822_v10  ;;  %v2108_v11 = vmul.f32 %v2478_v9, %v1822_v10  ;;  %v1958_v20 = vmul.f32 %v2438_v29, %v1822_v10  ;;  %v1988_v19 = vmul.f32 %v2446_v15, %v1822_v10  ;;  %v2471_v35 = vld [vmem:[%s5068_s5 + $0x210] sm:$0xff] }
 0x1b8   : > { %v1805_v56 = vadd.f32 %v1784_v16, %v1683_v39  ;;  %v1845_v24 = vadd.f32 %v1838_v48, %v1837_v42  ;;  %v1875_v53 = vadd.f32 %v1868_v18, %v1867_v34  ;;  %v1905_v38 = vadd.f32 %v1898_v5, %v1897_v59  ;;  %v2479_v23 = vld [vmem:[%s5068_s5 + $0x250] sm:$0xff] }
 0x1b9   : > { %v1935_v28 = vadd.f32 %v1928_v22, %v1927_v43  ;;  %v2085_v33 = vadd.f32 %v2078_v30, %v2077_v31  ;;  %v2115_v25 = vadd.f32 %v2108_v11, %v2107_v60  ;;  %v2018_v58 = vmul.f32 %v2454_v0, %v1822_v10  ;;  %v2439_v17 = vld [vmem:[%s5068_s5 + $0x110] sm:$0xff] }
 0x1ba   : > { %v1815_v46 = vadd.f32 %v4665_v8, %v1805_v56  ;;  %v2048_v54 = vmul.f32 %v2462_v32, %v1822_v10  ;;  %v1965_v37 = vadd.f32 %v1958_v20, %v1957_v6  ;;  %v1995_v45 = vadd.f32 %v1988_v19, %v1987_v40  ;;  %v2447_v47 = vld [vmem:[%s5068_s5 + $0x150] sm:$0xff]  ;;  %v2472_v20 = vld [vmem:[%s5068_s5 + $0x218] sm:$0xff] }
 0x1bb   : > { %v2025_v61 = vadd.f32 %v2018_v58, %v2017_v7  ;;  %v1562_v59 = vadd.f32 %v4615_v4, %v1472_v51  ;;  %v2455_v31 = vld [vmem:[%s5068_s5 + $0x190] sm:$0xff]  ;;  %v1473_v16 = vadd.f32 %v4662_v41, %v4660_v57 }
 0x1bc   : > { %v1823_v2 = vmax.f32 %v1815_v46, 0.0  ;;  %v2055_v39 = vadd.f32 %v2048_v54, %v2047_v14  ;;  %v2463_v60 = vld [vmem:[%s5068_s5 + $0x1d0] sm:$0xff]  ;;  %v1474_v14 = vadd.f32 %v4703_v3, %v4692_v26  ;;  %v2424_v26 = vld [vmem:[%s5068_s5 + $0x98] sm:$0xff] }
 0x1bd   : > { %v1684_v4 = vadd.f32 %v1664_v36, %v1562_v59  ;;  %v1563_v57 = vadd.f32 %v4638_v12, %v1473_v16  ;;  %v2432_v3 = vld [vmem:[%s5068_s5 + $0xd8] sm:$0xff]  ;;  %v2481_v16 = vld [vmem:[%s5068_s5 + $0x260] sm:$0xff] }
 0x1be   : > { %v1344_v42 = vpop.permute.xlu1 %1343  ;;  %v1458_v1 = vpop.permute.xlu0 %1457  ;;  %v1839_v13 = vmul.f32 %v1831_v49, %v1823_v2  ;;  %v1869_v63 = vmul.f32 %v2415_v21, %v1823_v2  ;;  %v1899_v10 = vmul.f32 %v2423_v52, %v1823_v2  ;;  %v1929_v34 = vmul.f32 %v2431_v27, %v1823_v2  ;;  %v2480_v12 = vld [vmem:[%s5068_s5 + $0x258] sm:$0xff] }
 0x1bf   : > { %v2079_v43 = vmul.f32 %v2471_v35, %v1823_v2  ;;  %v2109_v50 = vmul.f32 %v2479_v23, %v1823_v2  ;;  %v1959_v9 = vmul.f32 %v2439_v17, %v1823_v2  ;;  %v1989_v11 = vmul.f32 %v2447_v47, %v1823_v2  ;;  %v2440_v46 = vld [vmem:[%s5068_s5 + $0x118] sm:$0xff] }
 0x1c0   : > { %v1846_v6 = vadd.f32 %v1845_v24, %v1839_v13  ;;  %v1876_v40 = vadd.f32 %v1875_v53, %v1869_v63  ;;  %v1906_v48 = vadd.f32 %v1905_v38, %v1899_v10  ;;  %v1936_v18 = vadd.f32 %v1935_v28, %v1929_v34  ;;  %v1832_v38 = vld [vmem:[%s5068_s5 + $0x18] sm:$0xff] }
 0x1c1   : > { %v2086_v5 = vadd.f32 %v2085_v33, %v2079_v43  ;;  %v2116_v29 = vadd.f32 %v2115_v25, %v2109_v50  ;;  %v1966_v7 = vadd.f32 %v1965_v37, %v1959_v9  ;;  %v2019_v15 = vmul.f32 %v2455_v31, %v1823_v2  ;;  %v2416_v33 = vld [vmem:[%s5068_s5 + $0x58] sm:$0xff]  ;;  %v1833_v50 = vld [vmem:[%s5068_s5 + $0x20] sm:$0xff] }
 0x1c2   : > { %v1666_v22 = vpop.permute.xlu1 %1665  ;;  %v1786_v30 = vpop.permute.xlu0 %1785  ;;  %v2049_v0 = vmul.f32 %v2463_v60, %v1823_v2  ;;  %v1996_v56 = vadd.f32 %v1995_v45, %v1989_v11  ;;  %v1475_v49 = vadd.f32 %v1458_v1, %v1344_v42  ;;  %v1564_v58 = vadd.f32 %v4647_v62, %v1474_v14  ;;  %v2448_v45 = vld [vmem:[%s5068_s5 + $0x158] sm:$0xff] }
 0x1c3   : > { %v1806_v32 = vadd.f32 %v1786_v30, %v1684_v4  ;;  %v2026_v24 = vadd.f32 %v2025_v61, %v2019_v15  ;;  %v1685_v19 = vadd.f32 %v1666_v22, %v1563_v57  ;;  %v2456_v61 = vld [vmem:[%s5068_s5 + $0x198] sm:$0xff]  ;;  %v2433_v4 = vld [vmem:[%s5068_s5 + $0xe0] sm:$0xff] }
 0x1c4   : > { %v2056_v53 = vadd.f32 %v2055_v39, %v2049_v0  ;;  %v2464_v13 = vld [vmem:[%s5068_s5 + $0x1d8] sm:$0xff]  ;;  %v2441_v22 = vld [vmem:[%s5068_s5 + $0x120] sm:$0xff] }
 0x1c5   : > { %v1816_v36 = vadd.f32 %v4665_v8, %v1806_v32 }
 0x1c6   : > { %v1346_v41 = vpop.permute.xlu1 %1345  ;;  %v1460_v28 = vpop.permute.xlu0 %1459 }
 0x1c7   : > { %v1824_v25 = vmax.f32 %v1816_v36, 0.0  ;;  %v1476_v54 = vadd.f32 %v1460_v28, %v1346_v41 }
 0x1c9   : > { %v1840_v51 = vmul.f32 %v1832_v38, %v1824_v25  ;;  %v1870_v21 = vmul.f32 %v2416_v33, %v1824_v25  ;;  %v1900_v52 = vmul.f32 %v2424_v26, %v1824_v25  ;;  %v1930_v2 = vmul.f32 %v2432_v3, %v1824_v25 }
 0x1ca   : > { %v1668_v27 = vpop.permute.xlu1 %1667  ;;  %v1788_v37 = vpop.permute.xlu0 %1787  ;;  %v2080_v35 = vmul.f32 %v2472_v20, %v1824_v25  ;;  %v2110_v23 = vmul.f32 %v2480_v12, %v1824_v25  ;;  %v1960_v17 = vmul.f32 %v2440_v46, %v1824_v25  ;;  %v1990_v47 = vmul.f32 %v2448_v45, %v1824_v25  ;;  %v2419_v45 = vld [vmem:[%s5068_s5 + $0x70] sm:$0xff] }
 0x1cb   : > { %v1686_v39 = vadd.f32 %v1668_v27, %v1564_v58  ;;  %v1807_v62 = vadd.f32 %v1788_v37, %v1685_v19  ;;  %v1847_v42 = vadd.f32 %v1846_v6, %v1840_v51  ;;  %v1877_v1 = vadd.f32 %v1876_v40, %v1870_v21  ;;  %v2474_v19 = vld [vmem:[%s5068_s5 + $0x228] sm:$0xff]  ;;  %v1835_v37 = vld [vmem:[%s5068_s5 + $0x30] sm:$0xff] }
 0x1cc   : > { %v1907_v63 = vadd.f32 %v1906_v48, %v1900_v52  ;;  %v1937_v10 = vadd.f32 %v1936_v18, %v1930_v2  ;;  %v2087_v34 = vadd.f32 %v2086_v5, %v2080_v35  ;;  %v2117_v59 = vadd.f32 %v2116_v29, %v2110_v23  ;;  %v2417_v48 = vld [vmem:[%s5068_s5 + $0x60] sm:$0xff]  ;;  %v2482_v58 = vld [vmem:[%s5068_s5 + $0x268] sm:$0xff] }
 0x1cd   : > { %v1817_v43 = vadd.f32 %v4665_v8, %v1807_v62  ;;  %v4810_v9 = vadd.f32 %v1966_v7, %v1960_v17  ;;  %v2020_v31 = vmul.f32 %v2456_v61, %v1824_v25  ;;  %v1565_v6 = vadd.f32 %v4651_v55, %v1475_v49  ;;  %v2425_v18 = vld [vmem:[%s5068_s5 + $0xa0] sm:$0xff]  ;;  %v2434_v49 = vld [vmem:[%s5068_s5 + $0xe8] sm:$0xff] }
 0x1ce   : > { %v1670_v60 = vpop.permute.xlu1 %1669  ;;  %v1790_v40 = vpop.permute.xlu0 %1789  ;;  %v2050_v5 = vmul.f32 %v2464_v13, %v1824_v25  ;;  %v2473_v55 = vld [vmem:[%s5068_s5 + $0x220] sm:$0xff]  ;;  %v4833_v30 = vadd.f32 %v1996_v56, %v1990_v47  ;;  %v1566_v15 = vadd.f32 %v4654_v44, %v1476_v54  ;;  %v1834_v56 = vld [vmem:[%s5068_s5 + $0x28] sm:$0xff]  ;;  %v2435_v47 = vld [vmem:[%s5068_s5 + $0xf0] sm:$0xff] }
 0x1cf   : > { %v4822_v29 = vmax.f32 %v1817_v43, 0.0  ;;  %v1808_v7 = vadd.f32 %v1790_v40, %v1686_v39  ;;  %v1687_v11 = vadd.f32 %v1670_v60, %v1565_v6  ;;  %v4836_v0 = vadd.f32 %v2026_v24, %v2020_v31  ;;  %v2418_v44 = vld [vmem:[%s5068_s5 + $0x68] sm:$0xff]  ;;  %v2475_v39 = vld [vmem:[%s5068_s5 + $0x230] sm:$0xff] }
 0x1d0   : > { %v4838_v32 = vadd.f32 %v2056_v53, %v2050_v5  ;;  %v2426_v24 = vld [vmem:[%s5068_s5 + $0xa8] sm:$0xff] }
 0x1d1   : > { %v1818_v14 = vadd.f32 %v4665_v8, %v1808_v7  ;;  %v1841_v36 = vmul.f32 %v1833_v50, %v4822_v29  ;;  %v1871_v38 = vmul.f32 %v2417_v48, %v4822_v29  ;;  %v1901_v57 = vmul.f32 %v2425_v18, %v4822_v29  ;;  %v2427_v50 = vld [vmem:[%s5068_s5 + $0xb0] sm:$0xff]  ;;  %v2442_v31 = vld [vmem:[%s5068_s5 + $0x128] sm:$0xff]  ;;  %v1836_v18 = vld [vmem:[%s5068_s5 + $0x38] sm:$0xff] }
 0x1d2   : > { %v1672_v41 = vpop.permute.xlu1 %1671  ;;  %v1792_v28 = vpop.permute.xlu0 %1791  ;;  %v1931_v53 = vmul.f32 %v2433_v4, %v4822_v29  ;;  %v2081_v33 = vmul.f32 %v2473_v55, %v4822_v29  ;;  %v2111_v26 = vmul.f32 %v2481_v16, %v4822_v29  ;;  %v4857_v3 = vmul.f32 %v2441_v22, %v4822_v29  ;;  %v2443_v55 = vld [vmem:[%s5068_s5 + $0x130] sm:$0xff]  ;;  %v2420_v16 = vld [vmem:[%s5068_s5 + $0x78] sm:$0xff] }
 0x1d3   : > { %v4859_v25 = vmax.f32 %v1818_v14, 0.0  ;;  %v1688_v20 = vadd.f32 %v1672_v41, %v1566_v15  ;;  %v1809_v12 = vadd.f32 %v1792_v28, %v1687_v11  ;;  %v1848_v46 = vadd.f32 %v1847_v42, %v1841_v36  ;;  %v2483_v42 = vld [vmem:[%s5068_s5 + $0x270] sm:$0xff]  ;;  %v2436_v22 = vld [vmem:[%s5068_s5 + $0xf8] sm:$0xff] }
 0x1d4   : > { %v1878_v54 = vadd.f32 %v1877_v1, %v1871_v38  ;;  %v1908_v51 = vadd.f32 %v1907_v63, %v1901_v57  ;;  %v1938_v21 = vadd.f32 %v1937_v10, %v1931_v53  ;;  %v2088_v52 = vadd.f32 %v2087_v34, %v2081_v33  ;;  %v2476_v57 = vld [vmem:[%s5068_s5 + $0x238] sm:$0xff] }
 0x1d5   : > { %v1819_v27 = vadd.f32 %v4665_v8, %v1809_v12  ;;  %v1842_v2 = vmul.f32 %v1834_v56, %v4859_v25  ;;  %v1872_v35 = vmul.f32 %v2418_v44, %v4859_v25  ;;  %v1902_v23 = vmul.f32 %v2426_v24, %v4859_v25  ;;  %v2484_v28 = vld [vmem:[%s5068_s5 + $0x278] sm:$0xff] }
 0x1d6   : > { %v1794_v17 = vpop.permute.xlu1 %1793  ;;  %v1932_v61 = vmul.f32 %v2434_v49, %v4859_v25  ;;  %v2082_v62 = vmul.f32 %v2474_v19, %v4859_v25  ;;  %v2112_v1 = vmul.f32 %v2482_v58, %v4859_v25  ;;  %v2118_v13 = vadd.f32 %v2117_v59, %v2111_v26  ;;  %v2444_v24 = vld [vmem:[%s5068_s5 + $0x138] sm:$0xff]  ;;  %v2449_v58 = vld [vmem:[%s5068_s5 + $0x160] sm:$0xff] }
 0x1d7   : > { %v4889_v63 = vmax.f32 %v1819_v27, 0.0  ;;  %v1810_v10 = vadd.f32 %v1794_v17, %v1688_v20  ;;  %v1849_v34 = vadd.f32 %v1848_v46, %v1842_v2  ;;  %v1879_v43 = vadd.f32 %v1878_v54, %v1872_v35 }
 0x1d8   : > { %v1909_v60 = vadd.f32 %v1908_v51, %v1902_v23  ;;  %v1939_v6 = vadd.f32 %v1938_v21, %v1932_v61  ;;  %v2089_v59 = vadd.f32 %v2088_v52, %v2082_v62  ;;  %v2119_v40 = vadd.f32 %v2118_v13, %v2112_v1  ;;  %v2450_v23 = vld [vmem:[%s5068_s5 + $0x168] sm:$0xff] }
 0x1d9   : > { %v1820_v48 = vadd.f32 %v4665_v8, %v1810_v10  ;;  %v2083_v4 = vmul.f32 %v2475_v39, %v4889_v63  ;;  %v2113_v5 = vmul.f32 %v2483_v42, %v4889_v63  ;;  %v1843_v7 = vmul.f32 %v1835_v37, %v4889_v63  ;;  %v2428_v8 = vld [vmem:[%s5068_s5 + $0xb8] sm:$0xff] }
 0x1da   : > { %v1873_v11 = vmul.f32 %v2419_v45, %v4889_v63  ;;  %v1903_v15 = vmul.f32 %v2427_v50, %v4889_v63  ;;  %v1933_v14 = vmul.f32 %v2435_v47, %v4889_v63  ;;  %v1962_v36 = vmul.f32 %v2442_v31, %v4859_v25 }
 0x1db   : > { %v4923_v38 = vmax.f32 %v1820_v48, 0.0  ;;  %v2090_v41 = vadd.f32 %v2089_v59, %v2083_v4  ;;  %v2120_v56 = vadd.f32 %v2119_v40, %v2113_v5  ;;  %v1850_v44 = vadd.f32 %v1849_v34, %v1843_v7 }
 0x1dc   : > { %v1880_v53 = vadd.f32 %v1879_v43, %v1873_v11  ;;  %v1910_v33 = vadd.f32 %v1909_v60, %v1903_v15  ;;  %v1940_v26 = vadd.f32 %v1939_v6, %v1933_v14  ;;  %v1963_v20 = vmul.f32 %v2443_v55, %v4889_v63  ;;  %v2452_v6 = vld [vmem:[%s5068_s5 + $0x178] sm:$0xff] }
 0x1dd   : > { %v1844_v12 = vmul.f32 %v1836_v18, %v4923_v38  ;;  %v1874_v46 = vmul.f32 %v2420_v16, %v4923_v38  ;;  %v1904_v49 = vmul.f32 %v2428_v8, %v4923_v38  ;;  %v1934_v19 = vmul.f32 %v2436_v22, %v4923_v38 }
 0x1de   : > { %v2084_v54 = vmul.f32 %v2476_v57, %v4923_v38  ;;  %v2114_v51 = vmul.f32 %v2484_v28, %v4923_v38  ;;  %v1964_v21 = vmul.f32 %v2444_v24, %v4923_v38  ;;  %v1968_v52 = vadd.f32 %v4810_v9, %v4857_v3  ;;  %v2451_v9 = vld [vmem:[%s5068_s5 + $0x170] sm:$0xff] }
 0x1df   : > { %v1851_v27 = vadd.f32 %v1850_v44, %v1844_v12  ;;  %v1881_v37 = vadd.f32 %v1880_v53, %v1874_v46  ;;  %v1911_v2 = vadd.f32 %v1910_v33, %v1904_v49  ;;  %v1941_v35 = vadd.f32 %v1940_v26, %v1934_v19  ;;  %v2457_v19 = vld [vmem:[%s5068_s5 + $0x1a0] sm:$0xff] }
 0x1e0   : > { %v2091_v17 = vadd.f32 %v2090_v41, %v2084_v54  ;;  %v2121_v45 = vadd.f32 %v2120_v56, %v2114_v51  ;;  %v1969_v61 = vadd.f32 %v1968_v52, %v1962_v36  ;;  %v1991_v39 = vmul.f32 %v2449_v58, %v4822_v29  ;;  %v2458_v58 = vld [vmem:[%s5068_s5 + $0x1a8] sm:$0xff] }
 0x1e1   : > { %v1852_v62 = vrot.slane %v1851_v27, 4  ;;  %v1882_v42 = vrot.slane %v1881_v37, 4  ;;  %v1912_v1 = vrot.slane %v1911_v2, 4  ;;  %v1942_v13 = vrot.slane %v1941_v35, 4 }
 0x1e2   : > { %v2092_v3 = vrot.slane %v2091_v17, 4  ;;  %v2122_v10 = vrot.slane %v2121_v45, 4  ;;  %v1970_v34 = vadd.f32 %v1969_v61, %v1963_v20  ;;  %v1992_v43 = vmul.f32 %v2450_v23, %v4859_v25  ;;  %v2465_v61 = vld [vmem:[%s5068_s5 + $0x1e0] sm:$0xff] }
 0x1e3   : > { %v1853_v50 = vadd.f32 %v1852_v62, %v1851_v27  ;;  %v1883_v47 = vadd.f32 %v1882_v42, %v1881_v37  ;;  %v1913_v31 = vadd.f32 %v1912_v1, %v1911_v2  ;;  %v1943_v60 = vadd.f32 %v1942_v13, %v1941_v35  ;;  %v2459_v2 = vld [vmem:[%s5068_s5 + $0x1b0] sm:$0xff] }
 0x1e4   : > { %v2093_v59 = vadd.f32 %v2092_v3, %v2091_v17  ;;  %v2123_v40 = vadd.f32 %v2122_v10, %v2121_v45  ;;  %v1971_v48 = vadd.f32 %v1970_v34, %v1964_v21  ;;  %v1993_v18 = vmul.f32 %v2451_v9, %v4889_v63  ;;  %v2460_v9 = vld [vmem:[%s5068_s5 + $0x1b8] sm:$0xff] }
 0x1e5   : > { %v1854_v4 = vrot.slane %v1853_v50, 2  ;;  %v1884_v5 = vrot.slane %v1883_v47, 2  ;;  %v1914_v7 = vrot.slane %v1913_v31, 2  ;;  %v1944_v55 = vrot.slane %v1943_v60, 2 }
 0x1e6   : > { %v2094_v16 = vrot.slane %v2093_v59, 2  ;;  %v2124_v8 = vrot.slane %v2123_v40, 2  ;;  %v1972_v22 = vrot.slane %v1971_v48, 4  ;;  %v1994_v11 = vmul.f32 %v2452_v6, %v4923_v38 }
 0x1e7   : > { %v1855_v15 = vadd.f32 %v1854_v4, %v1853_v50  ;;  %v1885_v14 = vadd.f32 %v1884_v5, %v1883_v47  ;;  %v1915_v36 = vadd.f32 %v1914_v7, %v1913_v31  ;;  %v1945_v57 = vadd.f32 %v1944_v55, %v1943_v60  ;;  %v2467_v50 = vld [vmem:[%s5068_s5 + $0x1f0] sm:$0xff] }
 0x1e8   : > { %v2095_v41 = vadd.f32 %v2094_v16, %v2093_v59  ;;  %v2125_v28 = vadd.f32 %v2124_v8, %v2123_v40  ;;  %v1973_v56 = vadd.f32 %v1972_v22, %v1971_v48  ;;  %v1998_v44 = vadd.f32 %v4833_v30, %v1991_v39  ;;  %v2466_v39 = vld [vmem:[%s5068_s5 + $0x1e8] sm:$0xff]  ;;  %v2468_v48 = vld [vmem:[%s5068_s5 + $0x1f8] sm:$0xff] }
 0x1e9   : > { %v1856_v24 = vrot.slane %v1855_v15, 1  ;;  %v1886_v53 = vrot.slane %v1885_v14, 1  ;;  %v1916_v33 = vrot.slane %v1915_v36, 1  ;;  %v1946_v26 = vrot.slane %v1945_v57, 1 }
 0x1ea   : > { %v2096_v20 = vrot.slane %v2095_v41, 1  ;;  %v2126_v12 = vrot.slane %v2125_v28, 1  ;;  %v1974_v46 = vrot.slane %v1973_v56, 2  ;;  %v1999_v49 = vadd.f32 %v1998_v44, %v1992_v43 }
 0x1eb   : > { %v1857_v54 = vadd.f32 %v1856_v24, %v1855_v15  ;;  %v1887_v51 = vadd.f32 %v1886_v53, %v1885_v14  ;;  %v1917_v21 = vadd.f32 %v1916_v33, %v1915_v36  ;;  %v1947_v35 = vadd.f32 %v1946_v26, %v1945_v57 }
 0x1ec   : > { %v2097_v30 = vadd.f32 %v2096_v20, %v2095_v41  ;;  %v2127_v52 = vadd.f32 %v2126_v12, %v2125_v28  ;;  %v1975_v27 = vadd.f32 %v1974_v46, %v1973_v56  ;;  %v2000_v37 = vadd.f32 %v1999_v49, %v1993_v18  ;;  %v2149_v49 = vld [vmem:[%s5069_s6 + $0x8] sm:$0x3] }
 0x1ed   : > { %v2129_v23 = vsel %vm2128_vm1, %v1857_v54, %v1887_v51  ;;  %v2021_v17 = vmul.f32 %v2457_v19, %v4822_v29  ;;  %v2022_v45 = vmul.f32 %v2458_v58, %v4859_v25  ;;  %v2023_v34 = vmul.f32 %v2459_v2, %v4889_v63  ;;  %v2148_v51 = vld [vmem:[%s5069_s6] sm:$0xff] }
 0x1ee   : > { %v2142_v62 = vsel %vm2128_vm1, %v2097_v30, %v2127_v52  ;;  %v2131_v42 = vsel %vm2130_vm2, %v2129_v23, %v1917_v21  ;;  %v1976_v1 = vrot.slane %v1975_v27, 1  ;;  %v2001_v13 = vadd.f32 %v2000_v37, %v1994_v11  ;;  %v2154_v2 = vld [vmem:[%s5070_s7] sm:$0xff] }
 0x1ef   : > { %v2145_v3 = vsel %vm2130_vm2, %v2142_v62, 0.0  ;;  %v2133_v10 = vsel %vm2132_vm3, %v2131_v42, %v1947_v35  ;;  %v2028_v43 = vadd.f32 %v4836_v0, %v2021_v17  ;;  %v2051_v60 = vmul.f32 %v2465_v61, %v4822_v29 }
 0x1f0   : > { %2146 = vadd.xlane.f32.xlu1 %v2145_v3  ;;  %v1977_v47 = vadd.f32 %v1976_v1, %v1975_v27  ;;  %v2002_v31 = vrot.slane %v2001_v13, 4  ;;  %v2052_v6 = vmul.f32 %v2466_v39, %v4859_v25  ;;  %v2024_v59 = vmul.f32 %v2460_v9, %v4923_v38  ;;  %v2155_v27 = vld [vmem:[%s5070_s7 + $0x8] sm:$0x3]  ;;  %v2179_v3 = vld [vmem:[%s5071_s8] sm:$0x1] }
 0x1f1   : > { %v2029_v40 = vadd.f32 %v2028_v43, %v2022_v45  ;;  %v2053_v0 = vmul.f32 %v2467_v50, %v4889_v63  ;;  %v2058_v4 = vadd.f32 %v4838_v32, %v2051_v60  ;;  %v2054_v29 = vmul.f32 %v2468_v48, %v4923_v38 }
 0x1f2   : > { %v2003_v18 = vadd.f32 %v2002_v31, %v2001_v13  ;;  %v2135_v5 = vsel %vm2134_vm4, %v2133_v10, %v1977_v47  ;;  %v2679_v33 = vmov 0  }
 0x1f3   : > { %v2030_v7 = vadd.f32 %v2029_v40, %v2023_v34  ;;  %v2059_v16 = vadd.f32 %v2058_v4, %v2052_v6  ;;  %2556 = vset.pattern.permute.xlu1 %v2679_v33  ;;  %2555 = vset.pattern.permute.xlu0 %v2679_v33 }
 0x1f4   : > { %v2004_v55 = vrot.slane %v2003_v18, 2 }
 0x1f5   : > { %v2031_v25 = vadd.f32 %v2030_v7, %v2024_v59  ;;  %v2060_v22 = vadd.f32 %v2059_v16, %v2053_v0 }
 0x1f6   : > { %v2005_v8 = vadd.f32 %v2004_v55, %v2003_v18 }
 0x1f7   : > { %v2032_v11 = vrot.slane %v2031_v25, 4  ;;  %v2061_v14 = vadd.f32 %v2060_v22, %v2054_v29 }
 0x1f8   : > { %v2006_v15 = vrot.slane %v2005_v8, 1 }
 0x1f9   : > { %v2033_v36 = vadd.f32 %v2032_v11, %v2031_v25  ;;  %v2062_v41 = vrot.slane %v2061_v14, 4 }
 0x1fa   : > { %v2007_v57 = vadd.f32 %v2006_v15, %v2005_v8 }
 0x1fb   : > { %v2034_v63 = vrot.slane %v2033_v36, 2  ;;  %v2063_v28 = vadd.f32 %v2062_v41, %v2061_v14 }
 0x1fc   : > { %v2137_v32 = vsel %vm2136_vm5, %v2135_v5, %v2007_v57 }
 0x1fd   : > { %v2035_v56 = vadd.f32 %v2034_v63, %v2033_v36  ;;  %v2064_v44 = vrot.slane %v2063_v28, 2 }
 0x1ff   : > { %v2036_v24 = vrot.slane %v2035_v56, 1  ;;  %v2065_v53 = vadd.f32 %v2064_v44, %v2063_v28 }
 0x201   : > { %v2037_v38 = vadd.f32 %v2036_v24, %v2035_v56  ;;  %v2066_v26 = vrot.slane %v2065_v53, 1 }
 0x203   : > { %v2139_v20 = vsel %vm2138_vm6, %v2137_v32, %v2037_v38  ;;  %v2067_v12 = vadd.f32 %v2066_v26, %v2065_v53 }
 0x205   : > { %v2141_v46 = vsel %vm2140_vm7, %v2139_v20, %v2067_v12 }
 0x206   : > { %2143 = vadd.xlane.f32.xlu0 %v2141_v46 }
 0x27d   : > { %v2147_v19 = vpop.xlane.xlu1 %2146 }
 0x27e   : > { %v2151_v58 = vadd.f32 %v2149_v49, %v2147_v19 }
 0x280   : > { %v2153_v54 = vmax.f32 %v2151_v58, 0.0 }
 0x282   : > { %2163 = vperm.xlu1 %2556, %v2153_v54  }
 0x293   : > { %v2144_v21 = vpop.xlane.xlu0 %2143 }
 0x294   : > { %v2150_v30 = vadd.f32 %v2148_v51, %v2144_v21 }
 0x296   : > { %v2152_v52 = vmax.f32 %v2150_v30, 0.0 }
 0x298   : > { %2158 = vperm.xlu0 %2555, %v2152_v52  }
 0x301   : > { %v2164_v37 = vpop.permute.xlu1 %2163 }
 0x302   : > { %v2167_v35 = vmul.f32 %v2164_v37, %v2155_v27 }
 0x304   : > { %v2171_v45 = vsel %vm2170_vm8, %v2167_v35, 0.0 }
 0x317   : > { %v2159_v23 = vpop.permute.xlu0 %2158 }
 0x318   : > { %v2166_v17 = vmul.f32 %v2159_v23, %v2154_v2 }
 0x31a   : > { %v2169_v61 = vsel %vm2168_vm9, %v2166_v17, 0.0 }
 0x31b   : > { %v2172_v39 = vadd.f32 %v2171_v45, %v2169_v61 }
 0x31d   : > { %v2173_v62 = vrot.slane %v2172_v39, 4 }
 0x31f   : > { %v2174_v42 = vadd.f32 %v2173_v62, %v2172_v39 }
 0x321   : > { %v2175_v1 = vrot.slane %v2174_v42, 2 }
 0x323   : > { %v2176_v13 = vadd.f32 %v2175_v1, %v2174_v42 }
 0x325   : > { %v2177_v9 = vrot.slane %v2176_v13, 1 }
 0x327   : > { %v2178_v10 = vadd.f32 %v2177_v9, %v2176_v13 }
 0x329   : > { %v2180_v34 = vadd.f32 %v2179_v3, %v2178_v10 }
 0x32b   : > { %2182 = vst.msk [vmem:[%s353_s28] sm:$0x1] %vm2181_vm10, %v2180_v34 }
 0x32c   : > { %2613 = shalt.err (!%p2610_p1)
}
 0x32d   : > { %s2614_s29 = scalar_lea.hbm %s5021_s15, 16  ;;  %s2618_s11 = scalar_lea.hbm %s5072_s9, 32 }
 0x32e   : > { %p2615_p2 = scmp.ne.s32.totalorder %s5021_s15, %s2614_s29  ;;  %p2619_p9 = scmp.lt.u32.totalorder %s5021_s15, %s5072_s9 }
 0x32f   : > { %p2620_p5 = scmp.lt.u32.totalorder %s2618_s11, %s2614_s29  ;;  %p2622_p10 = scmp.lt.u32.totalorder %s2614_s29, %s5021_s15 }
 0x330   : > { %p2616_p3 = pnand %p2615_p2, %p5368_p12 }
 0x331   : > { %p2621_p6 = por %p2620_p5, %p2619_p9 }
 0x332   : > { %p2617_p4 = pneg %p2616_p3 }
 0x333   : > { %p2623_p0 = por %p2622_p10, %p2621_p6 }
 0x335   : > { %p2624_p7 = pnand %p2623_p0, %p2617_p4 }
 0x337   : > { %2627 = shalt.err (!%p2624_p7)
}
 0x338   : > { %2497 = dma.vmem_to_hbm [thread:$0]  (%p5368_p12), %s5023_s0, 16, %s5021_s15, %s2184_s17  }
 0x339 PF: > { %p2514_p8 = scmp.ge.s32.totalorder %s2670_s16, 2  ;;  %s2208_s18 = sand.u32 1, %s2658_s13  }
 0x33a   : > { %p5369_p11 = scmp.ne.s32.totalorder %s5174_s22, 0  ;;  %s2209_s25 = scalar_lea.sflag [#allocation6], %s2208_s18 }
 0x33c   : > { %p2507_p13 = pnand %p2514_p8, %p5369_p11 }
 0x33e   : > { %2653 = dma.done.wait (!%p2507_p13), %s2209_s25, 16  }
 0x33f   : > { %2655 = vsyncadd (!%p2507_p13), %s2209_s25, 4294967280  ;;  %s5370_s16 = sld [smem:[#allocation15_spill]]  ;;  %s5371_s26 = sld [smem:[#allocation14_spill]] }
 0x340   : > { %s5372_s15 = sld [smem:[#allocation16_spill]]  ;;  %s5373_s13 = smov %s2662_s14 }
 0x345   : > { %p23_p1 = scmp.ge.s32.totalorder %s5370_s16, 4   ;;  %s5374_s14 = smov %s5371_s26 }
 0x347   :  { %25 = sbr.rel (!%p23_p1) target bundleno = 11 (0xb), region = 112 }
 0x34e   :  { %2213 = vsyncpa [#allocation6], 1 }
 0x34f   :  { %2215 = vsyncpa [#allocation6 + $0x1], 1 }
 0x350   :  { %2216 = vsyncpa [#allocation7], 1 }
 0x351   :  { %2218 = vsyncpa [#allocation7 + $0x1], 1 }
 0x352   :  { %2219 = vsyncpa [#allocation9], 1 }

</bundles_post_ra>
